<compile_context>
chip_gen: v7x
topology: tpu7x:2x2x1
jax: 0.10.0
libtpu: 0.0.40
codegen_flags: <defaults>
</compile_context>

<pallas_src>
import functools

import numpy as np
import jax
import jax.numpy as jnp
from jax.experimental import pallas as pl
from jax.experimental.pallas import tpu as pltpu


# ----------------------------------------------------------------------------
# helpers
# ----------------------------------------------------------------------------
def _pick(dim, pref):
    """Largest block size <= pref that divides dim (falls back to full dim)."""
    if dim <= pref:
        return dim
    b = pref
    while dim % b:
        b //= 2
    return max(b, 1)


_VMEM_LIMIT = 32 * 1024 * 1024     # explicit, safe on v5e/v6e/v7x


# ----------------------------------------------------------------------------
# Pallas kernel 1: tiled GEMM with fused bias (row or col) + activation
# ----------------------------------------------------------------------------
def _mm_kernel(*refs, bias_kind, activation):
    if bias_kind == "none":
        a_ref, b_ref, o_ref, acc_ref = refs
        bias_ref = None
    else:
        a_ref, b_ref, bias_ref, o_ref, acc_ref = refs

    kk = pl.program_id(2)

    @pl.when(kk == 0)
    def _():
        acc_ref[...] = jnp.zeros_like(acc_ref)

    acc_ref[...] += jnp.dot(a_ref[...], b_ref[...],
                            preferred_element_type=jnp.float32)

    @pl.when(kk == pl.num_programs(2) - 1)
    def _():
        y = acc_ref[...]
        if bias_ref is not None:
            y = y + bias_ref[...]          # (bm,1) or (1,bn) broadcast
        if activation == "tanh":
            y = jnp.tanh(y)
        o_ref[...] = y.astype(o_ref.dtype)


def matmul_bias_act(a, b, bias=None, bias_kind="none", activation="none",
                    out_dtype=jnp.float32):
    """out = act(a @ b + bias).  a:(m,k), b:(k,n); f32 accumulation."""
    m, k = a.shape
    k2, n = b.shape
    assert k == k2 and bias_kind in ("none", "row", "col")

    bm = _pick(m, 128)
    bk = _pick(k, 512)
    bn = _pick(n, 2048)
    # Give megacore (v7x: 2 TCs) >=2 blocks on a parallel axis when cheap.
    if n // bn < 2 and n >= 256 and (n // 2) % 128 == 0:
        bn = n // 2
    grid = (m // bm, n // bn, k // bk)

    in_specs = [pl.BlockSpec((bm, bk), lambda i, j, kk: (i, kk)),
                pl.BlockSpec((bk, bn), lambda i, j, kk: (kk, j))]
    inputs = [a, b]
    bias_bytes = 0
    if bias_kind == "row":
        in_specs.append(pl.BlockSpec((bm, 1), lambda i, j, kk: (i, 0)))
        inputs.append(bias.reshape(m, 1).astype(jnp.float32))
        bias_bytes = m * 4
    elif bias_kind == "col":
        in_specs.append(pl.BlockSpec((1, bn), lambda i, j, kk: (0, j)))
        inputs.append(bias.reshape(1, n).astype(jnp.float32))
        bias_bytes = n * 4

    cost = pl.CostEstimate(
        flops=int(2 * m * n * k),
        transcendentals=int(m * n if activation == "tanh" else 0),
        bytes_accessed=int(a.size * a.dtype.itemsize
                           + b.size * b.dtype.itemsize
                           + m * n * jnp.dtype(out_dtype).itemsize
                           + bias_bytes))

    kernel = functools.partial(_mm_kernel, bias_kind=bias_kind,
                               activation=activation)
    return pl.pallas_call(
        kernel,
        out_shape=jax.ShapeDtypeStruct((m, n), out_dtype),
        grid_spec=pltpu.PrefetchScalarGridSpec(
            num_scalar_prefetch=0,
            grid=grid,
            in_specs=in_specs,
            out_specs=pl.BlockSpec((bm, bn), lambda i, j, kk: (i, j)),
            scratch_shapes=[pltpu.VMEM((bm, bn), jnp.float32)]),
        compiler_params=pltpu.CompilerParams(
            dimension_semantics=("parallel", "parallel", "arbitrary"),
            vmem_limit_bytes=_VMEM_LIMIT),
        cost_estimate=cost,
    )(*inputs)


# ----------------------------------------------------------------------------
# Pallas kernel 2: BatchNorm statistics over the 4 phase outputs (one pass).
#   Inputs are the transposed conv outputs (C, M) -> lane axis is M (dense).
#   Elementwise accumulation into (C, bm) VMEM scratch; single final lane
#   reduction at the last grid step (no per-step thin-tile read-modify-write).
# ----------------------------------------------------------------------------
def _bn_stats_kernel(y0, y1, y2, y3, sum_ref, sq_ref, acc_s, acc_q):
    @pl.when(pl.program_id(0) == 0)
    def _():
        acc_s[...] = jnp.zeros_like(acc_s)
        acc_q[...] = jnp.zeros_like(acc_q)

    for yr in (y0, y1, y2, y3):
        v = yr[...]
        acc_s[...] += v
        acc_q[...] += v * v

    @pl.when(pl.program_id(0) == pl.num_programs(0) - 1)
    def _():
        sum_ref[...] = jnp.sum(acc_s[...], axis=1, keepdims=True)
        sq_ref[...] = jnp.sum(acc_q[...], axis=1, keepdims=True)


def bn_stats(y_phases):
    C, M = y_phases[0].shape
    bm = _pick(M, 2048)
    in_spec = pl.BlockSpec((C, bm), lambda i: (0, i))
    out_spec = pl.BlockSpec((C, 1), lambda i: (0, 0))
    cost = pl.CostEstimate(flops=int(3 * 4 * C * M), transcendentals=0,
                           bytes_accessed=int(4 * C * M * 4 + 2 * C * 4))
    return pl.pallas_call(
        _bn_stats_kernel,
        out_shape=(jax.ShapeDtypeStruct((C, 1), jnp.float32),
                   jax.ShapeDtypeStruct((C, 1), jnp.float32)),
        grid_spec=pltpu.PrefetchScalarGridSpec(
            num_scalar_prefetch=0,
            grid=(M // bm,),
            in_specs=[in_spec] * 4,
            out_specs=(out_spec, out_spec),
            scratch_shapes=[pltpu.VMEM((C, bm), jnp.float32),
                            pltpu.VMEM((C, bm), jnp.float32)]),
        compiler_params=pltpu.CompilerParams(
            dimension_semantics=("arbitrary",),
            vmem_limit_bytes=_VMEM_LIMIT),
        cost_estimate=cost,
    )(*y_phases)


def bn_affine_params(y_phases, gamma, beta, eps=1e-5):
    """Training-mode BatchNorm constants from the 4 phase outputs (C, M)."""
    C, M = y_phases[0].shape
    s, q = bn_stats(y_phases)
    cnt = 4.0 * M
    mean = s[:, 0] / cnt
    var = jnp.maximum(q[:, 0] / cnt - mean * mean, 0.0)   # clamp (review note)
    inv = jax.lax.rsqrt(var + eps)
    scale = gamma * inv
    shift = beta - mean * scale
    return scale, shift


# ----------------------------------------------------------------------------
# Stride-phase decomposition glue (pure data movement / per-channel affine,
# fused by XLA into the patch gather — the post-BN activation is never
# materialized on its own).
#
# ConvT(k=4,s=2,p=1):  out[2j+py, 2i+px] = sum_{dy,dx,ci}
#       x[j+py+dy-1, i+px+dx-1, ci] * W[ci, co, KY[py][dy], KX[px][dx]]
# with KY = KX = ((3,1),(2,0)) and zero padding of x by 1.
# ----------------------------------------------------------------------------
_TAPS = ((3, 1), (2, 0))                       # [phase][d] -> kernel tap index
_PHASES = ((0, 0), (0, 1), (1, 0), (1, 1))


def build_phase_patches(x, scale=None, shift=None, relu=False,
                        dtype=jnp.bfloat16):
    """x: (C, N, H, W) pre-BN tensor -> dict phase -> (4C, N*H*W) patches."""
    C, N, H, W = x.shape
    v = x.astype(jnp.float32)
    if scale is not None:                      # fused BN apply (+ReLU)
        v = v * scale.reshape(C, 1, 1, 1) + shift.reshape(C, 1, 1, 1)
    if relu:
        v = jnp.maximum(v, 0.0)
    v = v.astype(dtype)
    vp = jnp.pad(v, ((0, 0), (0, 0), (1, 1), (1, 1)))
    patches = {}
    for py, px in _PHASES:
        taps = [vp[:, :, py + dy:py + dy + H, px + dx:px + dx + W]
                for dy in range(2) for dx in range(2)]
        pt = jnp.stack(taps, axis=0)           # (4, C, N, H, W), (dy,dx) major
        patches[(py, px)] = pt.reshape(4 * C, N * H * W)
    return patches


def phase_weight_matrices(wt, dtype=jnp.bfloat16):
    """wt: (Cin, Cout, 4, 4) -> dict phase -> (Cout, 4*Cin) matrices."""
    Cin, Cout = wt.shape[0], wt.shape[1]
    mats = {}
    for py, px in _PHASES:
        w = jnp.take(wt, jnp.asarray(_TAPS[py]), axis=2)   # (Cin,Cout,2,4)
        w = jnp.take(w, jnp.asarray(_TAPS[px]), axis=3)    # (Cin,Cout,2,2)
        mats[(py, px)] = (w.transpose(1, 2, 3, 0)          # (Cout,dy,dx,Cin)
                           .reshape(Cout, 4 * Cin).astype(dtype))
    return mats


def interleave_phases(phase_out, C, N, H, W):
    """phase_out[(py,px)]: (C, N*H*W) -> (C, N, 2H, 2W)."""
    ys = jnp.stack([phase_out[ph] for ph in _PHASES],
                   axis=0).reshape(2, 2, C, N, H, W)
    return ys.transpose(2, 3, 4, 0, 5, 1).reshape(C, N, 2 * H, 2 * W)


# ----------------------------------------------------------------------------
# Decoder forward (Pallas) and pure-JAX reference
# ----------------------------------------------------------------------------
def decoder_forward(z, p, ndf=8, img_dim=3):
    B = z.shape[0]
    chans = [ndf * 16, ndf * 8, ndf * 4, ndf * 2, ndf, img_dim]

    # gen_z linear (tiny; kept in f32)
    y = matmul_bias_act(z, p["w_lin"].T, bias=p["b_lin"], bias_kind="col")
    x = y.reshape(B, chans[0], 4, 4).transpose(1, 0, 2, 3)   # (C, N, 4, 4)

    scale = shift = None
    relu = False
    H = W = 4
    for li in range(1, 6):
        Cout = chans[li]
        last = (li == 5)
        patches = build_phase_patches(x, scale, shift, relu)     # bf16
        wmats = phase_weight_matrices(p[f"w{li}"])               # bf16
        phase_out = {}
        for ph in _PHASES:
            phase_out[ph] = matmul_bias_act(
                wmats[ph], patches[ph],
                bias=(p["b5"] if last else None),
                bias_kind=("row" if last else "none"),
                activation=("tanh" if last else "none"))          # (Cout, M) f32
        if last:
            out = interleave_phases(phase_out, Cout, B, H, W)     # (C,N,2H,2W)
            return out.transpose(1, 0, 2, 3)                      # -> NCHW
        # BN constants from this layer's (pre-activation) output; the affine
        # + ReLU is applied inside the NEXT layer's patch build.
        scale, shift = bn_affine_params(
            [phase_out[ph] for ph in _PHASES], p[f"g{li}"], p[f"bt{li}"])
        relu = True
        x = interleave_phases(phase_out, Cout, B, H, W)
        H, W = 2 * H, 2 * W


# --- independent f32 reference (zero-upsampled im2col formulation) ----------
def conv_transpose_im2col(x_nhwc, K=4, stride=2, pad=1):
    N, H, W, C = x_nhwc.shape
    Hu, Wu = (H - 1) * stride + 1, (W - 1) * stride + 1
    up = jnp.zeros((N, Hu, Wu, C), x_nhwc.dtype)
    up = up.at[:, ::stride, ::stride, :].set(x_nhwc)
    pp = K - 1 - pad
    up = jnp.pad(up, ((0, 0), (pp, pp), (pp, pp), (0, 0)))
    Hout = (H - 1) * stride - 2 * pad + K
    Wout = (W - 1) * stride - 2 * pad + K
    pats = [up[:, ky:ky + Hout, kx:kx + Wout, :]
            for ky in range(K) for kx in range(K)]
    patches = jnp.stack(pats, axis=3)
    return patches.reshape(N * Hout * Wout, K * K * C), (N, Hout, Wout)


def convT_weight_to_matrix(wt):
    Cin, Cout, K, _ = wt.shape
    wflip = wt[:, :, ::-1, ::-1]
    return wflip.transpose(2, 3, 0, 1).reshape(K * K * Cin, Cout)


def decoder_forward_ref(z, p, ndf=8, img_dim=3):
    hp = jax.lax.Precision.HIGHEST
    y = jnp.dot(z, p["w_lin"].T, precision=hp) + p["b_lin"]
    x = y.reshape(z.shape[0], ndf * 16, 4, 4).transpose(0, 2, 3, 1)
    for i in range(1, 5):
        patches, (N, Ho, Wo) = conv_transpose_im2col(x)
        wmat = convT_weight_to_matrix(p[f"w{i}"])
        conv = jnp.dot(patches, wmat, precision=hp)
        mean = conv.mean(axis=0)
        var = conv.var(axis=0)
        normed = (conv - mean) * jax.lax.rsqrt(var + 1e-5)
        act = jnp.maximum(normed * p[f"g{i}"] + p[f"bt{i}"], 0.0)
        x = act.reshape(N, Ho, Wo, wmat.shape[1])
    patches, (N, Ho, Wo) = conv_transpose_im2col(x)
    out = jnp.tanh(jnp.dot(patches, convT_weight_to_matrix(p["w5"]),
                           precision=hp) + p["b5"])
    return out.reshape(N, Ho, Wo, img_dim).transpose(0, 3, 1, 2)


# ----------------------------------------------------------------------------
# deterministic parameter init (synthetic, no checkpoint load)
# ----------------------------------------------------------------------------
def init_params(key, ndf=8, img_dim=3):
    ks = iter(jax.random.split(key, 32))
    nrm = lambda k, s, sc=0.05: sc * jax.random.normal(k, s, jnp.float32)
    p = {}
    p["w_lin"] = nrm(next(ks), (ndf * 16 * 4 * 4, ndf * 2))
    p["b_lin"] = nrm(next(ks), (ndf * 16 * 4 * 4,))
    chans = [ndf * 16, ndf * 8, ndf * 4, ndf * 2, ndf, img_dim]
    for i in range(5):
        cin, cout = chans[i], chans[i + 1]
        p[f"w{i+1}"] = nrm(next(ks), (cin, cout, 4, 4))
        if i < 4:
            p[f"g{i+1}"] = 1.0 + 0.1 * jax.random.normal(next(ks), (cout,),
                                                         jnp.float32)
            p[f"bt{i+1}"] = 0.1 * jax.random.normal(next(ks), (cout,),
                                                    jnp.float32)
    p["b5"] = nrm(next(ks), (img_dim,))
    return p


# ----------------------------------------------------------------------------
if __name__ == "__main__":
    ndf, img_dim, B = 8, 3, 2          # small config: z is (2, 16)
    key = jax.random.PRNGKey(0)
    kp, kz = jax.random.split(key)
    params = init_params(kp, ndf, img_dim)
    z = jax.random.normal(kz, (B, ndf * 2), jnp.float32)

    fwd = jax.jit(functools.partial(decoder_forward, ndf=ndf, img_dim=img_dim))
    out = jax.block_until_ready(fwd(z, params))
    assert out.shape == (B, img_dim, 128, 128), out.shape

    ref = decoder_forward_ref(z, params, ndf, img_dim)
    # Tolerance sized for bf16 GEMM operands (f32 accumulation) vs f32 reference.
    np.testing.assert_allclose(np.asarray(out), np.asarray(ref),
                               rtol=2e-2, atol=2e-2)
    print("KERNEL_OK")
</pallas_src>

<mosaic_0001>
module attributes {stable_mosaic.version = 11 : i64} {
  func.func @_mm_kernel(%arg0: i32, %arg1: i32, %arg2: i32, %arg3: memref<2x16xf32, #tpu.memory_space<vmem>>, %arg4: memref<16x1024xf32, #tpu.memory_space<vmem>>, %arg5: memref<1x1024xf32, #tpu.memory_space<vmem>>, %arg6: memref<2x1024xf32, #tpu.memory_space<vmem>>, %arg7: memref<2x1024xf32, #tpu.memory_space<vmem>>) attributes {dimension_semantics = [#tpu.dimension_semantics<parallel>, #tpu.dimension_semantics<parallel>, #tpu.dimension_semantics<arbitrary>], iteration_bounds = array<i64: 1, 2, 1>, scalar_prefetch = 0 : i64, scratch_operands = 1 : i64, tpu.core_type = #tpu.core_type<tc>, window_params = [{transform_indices = @transform_0, window_bounds = array<i64: 2, 16>}, {transform_indices = @transform_1, window_bounds = array<i64: 16, 1024>}, {transform_indices = @transform_2, window_bounds = array<i64: 1, 1024>}, {transform_indices = @transform_3, window_bounds = array<i64: 2, 1024>}]} {
    %c0_i32 = arith.constant 0 : i32
    %0 = arith.cmpi eq, %arg2, %c0_i32 : i32
    %1 = arith.extui %0 : i1 to i32
    %c0_i32_0 = arith.constant 0 : i32
    %2 = arith.cmpi ne, %1, %c0_i32_0 : i32
    scf.if %2 {
      %cst_10 = arith.constant 0.000000e+00 : f32
      %12 = vector.broadcast %cst_10 : f32 to vector<2x1024xf32>
      %c0_11 = arith.constant 0 : index
      %c0_12 = arith.constant 0 : index
      %13 = vector.load %arg7[%c0_11, %c0_12] : memref<2x1024xf32, #tpu.memory_space<vmem>>, vector<2x1024xf32>
      tpu.vector_store %arg7[%c0_11, %c0_12], %12 {strides = array<i32>} : memref<2x1024xf32, #tpu.memory_space<vmem>>, vector<2x1024xf32>,
    } else {
    }
    %c0 = arith.constant 0 : index
    %c0_1 = arith.constant 0 : index
    %3 = vector.load %arg7[%c0, %c0_1] : memref<2x1024xf32, #tpu.memory_space<vmem>>, vector<2x1024xf32>
    %c0_2 = arith.constant 0 : index
    %c0_3 = arith.constant 0 : index
    %4 = vector.load %arg3[%c0_2, %c0_3] : memref<2x16xf32, #tpu.memory_space<vmem>>, vector<2x16xf32>
    %c0_4 = arith.constant 0 : index
    %c0_5 = arith.constant 0 : index
    %5 = vector.load %arg4[%c0_4, %c0_5] : memref<16x1024xf32, #tpu.memory_space<vmem>>, vector<16x1024xf32>
    %cst = arith.constant dense<0.000000e+00> : vector<2x1024xf32>
    %6 = tpu.matmul %4, %5, %cst {dimension_numbers = #tpu.dot_dimension_numbers<[1], [0], [0], [1], [0, 0, 1, 1], [], []>} : vector<2x16xf32>, vector<16x1024xf32>, vector<2x1024xf32> -> vector<2x1024xf32>
    %7 = arith.addf %3, %6 : vector<2x1024xf32>
    %c0_6 = arith.constant 0 : index
    %c0_7 = arith.constant 0 : index
    %8 = vector.load %arg7[%c0_6, %c0_7] : memref<2x1024xf32, #tpu.memory_space<vmem>>, vector<2x1024xf32>
    tpu.vector_store %arg7[%c0_6, %c0_7], %7 {strides = array<i32>} : memref<2x1024xf32, #tpu.memory_space<vmem>>, vector<2x1024xf32>,
    %c0_i32_8 = arith.constant 0 : i32
    %9 = arith.cmpi eq, %arg2, %c0_i32_8 : i32
    %10 = arith.extui %9 : i1 to i32
    %c0_i32_9 = arith.constant 0 : i32
    %11 = arith.cmpi ne, %10, %c0_i32_9 : i32
    scf.if %11 {
      %c0_10 = arith.constant 0 : index
      %c0_11 = arith.constant 0 : index
      %12 = vector.load %arg7[%c0_10, %c0_11] : memref<2x1024xf32, #tpu.memory_space<vmem>>, vector<2x1024xf32>
      %c0_12 = arith.constant 0 : index
      %c0_13 = arith.constant 0 : index
      %13 = vector.load %arg5[%c0_12, %c0_13] : memref<1x1024xf32, #tpu.memory_space<vmem>>, vector<1x1024xf32>
      %14 = vector.broadcast %13 : vector<1x1024xf32> to vector<2x1024xf32>
      %15 = arith.addf %12, %14 : vector<2x1024xf32>
      %c0_14 = arith.constant 0 : index
      %c0_15 = arith.constant 0 : index
      %16 = vector.load %arg6[%c0_14, %c0_15] : memref<2x1024xf32, #tpu.memory_space<vmem>>, vector<2x1024xf32>
      tpu.vector_store %arg6[%c0_14, %c0_15], %15 {strides = array<i32>} : memref<2x1024xf32, #tpu.memory_space<vmem>>, vector<2x1024xf32>,
    } else {
    }
    return
  }
  func.func @transform_0(%arg0: i32, %arg1: i32, %arg2: i32) -> (i32, i32) {
    %c0_i32 = arith.constant 0 : i32
    return %arg0, %arg2 : i32, i32
  }
  func.func @transform_1(%arg0: i32, %arg1: i32, %arg2: i32) -> (i32, i32) {
    %c0_i32 = arith.constant 0 : i32
    return %arg2, %arg1 : i32, i32
  }
  func.func @transform_2(%arg0: i32, %arg1: i32, %arg2: i32) -> (i32, i32) {
    %c0_i32 = arith.constant 0 : i32
    %c0_i32_0 = arith.constant 0 : i32
    return %c0_i32, %arg1 : i32, i32
  }
  func.func @transform_3(%arg0: i32, %arg1: i32, %arg2: i32) -> (i32, i32) {
    %c0_i32 = arith.constant 0 : i32
    return %arg0, %arg1 : i32, i32
  }
}

module attributes {stable_mosaic.version = 11 : i64} {
  func.func @_mm_kernel(%arg0: i32, %arg1: i32, %arg2: i32, %arg3: memref<64x512xbf16, #tpu.memory_space<vmem>>, %arg4: memref<512x32xbf16, #tpu.memory_space<vmem>>, %arg5: memref<64x32xf32, #tpu.memory_space<vmem>>, %arg6: memref<64x32xf32, #tpu.memory_space<vmem>>) attributes {dimension_semantics = [#tpu.dimension_semantics<parallel>, #tpu.dimension_semantics<parallel>, #tpu.dimension_semantics<arbitrary>], iteration_bounds = array<i64: 1, 1, 1>, scalar_prefetch = 0 : i64, scratch_operands = 1 : i64, tpu.core_type = #tpu.core_type<tc>, window_params = [{transform_indices = @transform_0, window_bounds = array<i64: 64, 512>}, {transform_indices = @transform_1, window_bounds = array<i64: 512, 32>}, {transform_indices = @transform_2, window_bounds = array<i64: 64, 32>}]} {
    %c0_i32 = arith.constant 0 : i32
    %0 = arith.cmpi eq, %arg2, %c0_i32 : i32
    %1 = arith.extui %0 : i1 to i32
    %c0_i32_0 = arith.constant 0 : i32
    %2 = arith.cmpi ne, %1, %c0_i32_0 : i32
    scf.if %2 {
      %cst_10 = arith.constant 0.000000e+00 : f32
      %12 = vector.broadcast %cst_10 : f32 to vector<64x32xf32>
      %c0_11 = arith.constant 0 : index
      %c0_12 = arith.constant 0 : index
      %13 = vector.load %arg6[%c0_11, %c0_12] : memref<64x32xf32, #tpu.memory_space<vmem>>, vector<64x32xf32>
      tpu.vector_store %arg6[%c0_11, %c0_12], %12 {strides = array<i32>} : memref<64x32xf32, #tpu.memory_space<vmem>>, vector<64x32xf32>,
    } else {
    }
    %c0 = arith.constant 0 : index
    %c0_1 = arith.constant 0 : index
    %3 = vector.load %arg6[%c0, %c0_1] : memref<64x32xf32, #tpu.memory_space<vmem>>, vector<64x32xf32>
    %c0_2 = arith.constant 0 : index
    %c0_3 = arith.constant 0 : index
    %4 = vector.load %arg3[%c0_2, %c0_3] : memref<64x512xbf16, #tpu.memory_space<vmem>>, vector<64x512xbf16>
    %c0_4 = arith.constant 0 : index
    %c0_5 = arith.constant 0 : index
    %5 = vector.load %arg4[%c0_4, %c0_5] : memref<512x32xbf16, #tpu.memory_space<vmem>>, vector<512x32xbf16>
    %cst = arith.constant dense<0.000000e+00> : vector<64x32xf32>
    %6 = tpu.matmul %4, %5, %cst {dimension_numbers = #tpu.dot_dimension_numbers<[1], [0], [0], [1], [0, 0, 1, 1], [], []>} : vector<64x512xbf16>, vector<512x32xbf16>, vector<64x32xf32> -> vector<64x32xf32>
    %7 = arith.addf %3, %6 : vector<64x32xf32>
    %c0_6 = arith.constant 0 : index
    %c0_7 = arith.constant 0 : index
    %8 = vector.load %arg6[%c0_6, %c0_7] : memref<64x32xf32, #tpu.memory_space<vmem>>, vector<64x32xf32>
    tpu.vector_store %arg6[%c0_6, %c0_7], %7 {strides = array<i32>} : memref<64x32xf32, #tpu.memory_space<vmem>>, vector<64x32xf32>,
    %c0_i32_8 = arith.constant 0 : i32
    %9 = arith.cmpi eq, %arg2, %c0_i32_8 : i32
    %10 = arith.extui %9 : i1 to i32
    %c0_i32_9 = arith.constant 0 : i32
    %11 = arith.cmpi ne, %10, %c0_i32_9 : i32
    scf.if %11 {
      %c0_10 = arith.constant 0 : index
      %c0_11 = arith.constant 0 : index
      %12 = vector.load %arg6[%c0_10, %c0_11] : memref<64x32xf32, #tpu.memory_space<vmem>>, vector<64x32xf32>
      %c0_12 = arith.constant 0 : index
      %c0_13 = arith.constant 0 : index
      %13 = vector.load %arg5[%c0_12, %c0_13] : memref<64x32xf32, #tpu.memory_space<vmem>>, vector<64x32xf32>
      tpu.vector_store %arg5[%c0_12, %c0_13], %12 {strides = array<i32>} : memref<64x32xf32, #tpu.memory_space<vmem>>, vector<64x32xf32>,
    } else {
    }
    return
  }
  func.func @transform_0(%arg0: i32, %arg1: i32, %arg2: i32) -> (i32, i32) {
    %c0_i32 = arith.constant 0 : i32
    return %arg0, %arg2 : i32, i32
  }
  func.func @transform_1(%arg0: i32, %arg1: i32, %arg2: i32) -> (i32, i32) {
    %c0_i32 = arith.constant 0 : i32
    return %arg2, %arg1 : i32, i32
  }
  func.func @transform_2(%arg0: i32, %arg1: i32, %arg2: i32) -> (i32, i32) {
    %c0_i32 = arith.constant 0 : i32
    return %arg0, %arg1 : i32, i32
  }
}

module attributes {stable_mosaic.version = 11 : i64} {
  func.func @_bn_stats_kernel(%arg0: i32, %arg1: memref<64x32xf32, #tpu.memory_space<vmem>>, %arg2: memref<64x32xf32, #tpu.memory_space<vmem>>, %arg3: memref<64x32xf32, #tpu.memory_space<vmem>>, %arg4: memref<64x32xf32, #tpu.memory_space<vmem>>, %arg5: memref<64x1xf32, #tpu.memory_space<vmem>>, %arg6: memref<64x1xf32, #tpu.memory_space<vmem>>, %arg7: memref<64x32xf32, #tpu.memory_space<vmem>>, %arg8: memref<64x32xf32, #tpu.memory_space<vmem>>) attributes {dimension_semantics = [#tpu.dimension_semantics<arbitrary>], iteration_bounds = array<i64: 1>, scalar_prefetch = 0 : i64, scratch_operands = 2 : i64, tpu.core_type = #tpu.core_type<tc>, window_params = [{transform_indices = @transform_0, window_bounds = array<i64: 64, 32>}, {transform_indices = @transform_1, window_bounds = array<i64: 64, 32>}, {transform_indices = @transform_2, window_bounds = array<i64: 64, 32>}, {transform_indices = @transform_3, window_bounds = array<i64: 64, 32>}, {pipeline_mode = #tpu.pipeline_mode<synchronous>, transform_indices = @transform_4, window_bounds = array<i64: 64, 1>}, {pipeline_mode = #tpu.pipeline_mode<synchronous>, transform_indices = @transform_5, window_bounds = array<i64: 64, 1>}]} {
    %c0_i32 = arith.constant 0 : i32
    %0 = arith.cmpi eq, %arg0, %c0_i32 : i32
    %1 = arith.extui %0 : i1 to i32
    %c0_i32_0 = arith.constant 0 : i32
    %2 = arith.cmpi ne, %1, %c0_i32_0 : i32
    scf.if %2 {
      %cst = arith.constant 0.000000e+00 : f32
      %38 = vector.broadcast %cst : f32 to vector<64x32xf32>
      %c0_42 = arith.constant 0 : index
      %c0_43 = arith.constant 0 : index
      %39 = vector.load %arg7[%c0_42, %c0_43] : memref<64x32xf32, #tpu.memory_space<vmem>>, vector<64x32xf32>
      tpu.vector_store %arg7[%c0_42, %c0_43], %38 {strides = array<i32>} : memref<64x32xf32, #tpu.memory_space<vmem>>, vector<64x32xf32>,
      %cst_44 = arith.constant 0.000000e+00 : f32
      %40 = vector.broadcast %cst_44 : f32 to vector<64x32xf32>
      %c0_45 = arith.constant 0 : index
      %c0_46 = arith.constant 0 : index
      %41 = vector.load %arg8[%c0_45, %c0_46] : memref<64x32xf32, #tpu.memory_space<vmem>>, vector<64x32xf32>
      tpu.vector_store %arg8[%c0_45, %c0_46], %40 {strides = array<i32>} : memref<64x32xf32, #tpu.memory_space<vmem>>, vector<64x32xf32>,
    } else {
    }
    %c0 = arith.constant 0 : index
    %c0_1 = arith.constant 0 : index
    %3 = vector.load %arg1[%c0, %c0_1] : memref<64x32xf32, #tpu.memory_space<vmem>>, vector<64x32xf32>
    %c0_2 = arith.constant 0 : index
    %c0_3 = arith.constant 0 : index
    %4 = vector.load %arg7[%c0_2, %c0_3] : memref<64x32xf32, #tpu.memory_space<vmem>>, vector<64x32xf32>
    %5 = arith.addf %4, %3 : vector<64x32xf32>
    %c0_4 = arith.constant 0 : index
    %c0_5 = arith.constant 0 : index
    %6 = vector.load %arg7[%c0_4, %c0_5] : memref<64x32xf32, #tpu.memory_space<vmem>>, vector<64x32xf32>
    tpu.vector_store %arg7[%c0_4, %c0_5], %5 {strides = array<i32>} : memref<64x32xf32, #tpu.memory_space<vmem>>, vector<64x32xf32>,
    %c0_6 = arith.constant 0 : index
    %c0_7 = arith.constant 0 : index
    %7 = vector.load %arg8[%c0_6, %c0_7] : memref<64x32xf32, #tpu.memory_space<vmem>>, vector<64x32xf32>
    %8 = arith.mulf %3, %3 : vector<64x32xf32>
    %9 = arith.addf %7, %8 : vector<64x32xf32>
    %c0_8 = arith.constant 0 : index
    %c0_9 = arith.constant 0 : index
    %10 = vector.load %arg8[%c0_8, %c0_9] : memref<64x32xf32, #tpu.memory_space<vmem>>, vector<64x32xf32>
    tpu.vector_store %arg8[%c0_8, %c0_9], %9 {strides = array<i32>} : memref<64x32xf32, #tpu.memory_space<vmem>>, vector<64x32xf32>,
    %c0_10 = arith.constant 0 : index
    %c0_11 = arith.constant 0 : index
    %11 = vector.load %arg2[%c0_10, %c0_11] : memref<64x32xf32, #tpu.memory_space<vmem>>, vector<64x32xf32>
    %c0_12 = arith.constant 0 : index
    %c0_13 = arith.constant 0 : index
    %12 = vector.load %arg7[%c0_12, %c0_13] : memref<64x32xf32, #tpu.memory_space<vmem>>, vector<64x32xf32>
    %13 = arith.addf %12, %11 : vector<64x32xf32>
    %c0_14 = arith.constant 0 : index
    %c0_15 = arith.constant 0 : index
    %14 = vector.load %arg7[%c0_14, %c0_15] : memref<64x32xf32, #tpu.memory_space<vmem>>, vector<64x32xf32>
    tpu.vector_store %arg7[%c0_14, %c0_15], %13 {strides = array<i32>} : memref<64x32xf32, #tpu.memory_space<vmem>>, vector<64x32xf32>,
    %c0_16 = arith.constant 0 : index
    %c0_17 = arith.constant 0 : index
    %15 = vector.load %arg8[%c0_16, %c0_17] : memref<64x32xf32, #tpu.memory_space<vmem>>, vector<64x32xf32>
    %16 = arith.mulf %11, %11 : vector<64x32xf32>
    %17 = arith.addf %15, %16 : vector<64x32xf32>
    %c0_18 = arith.constant 0 : index
    %c0_19 = arith.constant 0 : index
    %18 = vector.load %arg8[%c0_18, %c0_19] : memref<64x32xf32, #tpu.memory_space<vmem>>, vector<64x32xf32>
    tpu.vector_store %arg8[%c0_18, %c0_19], %17 {strides = array<i32>} : memref<64x32xf32, #tpu.memory_space<vmem>>, vector<64x32xf32>,
    %c0_20 = arith.constant 0 : index
    %c0_21 = arith.constant 0 : index
    %19 = vector.load %arg3[%c0_20, %c0_21] : memref<64x32xf32, #tpu.memory_space<vmem>>, vector<64x32xf32>
    %c0_22 = arith.constant 0 : index
    %c0_23 = arith.constant 0 : index
    %20 = vector.load %arg7[%c0_22, %c0_23] : memref<64x32xf32, #tpu.memory_space<vmem>>, vector<64x32xf32>
    %21 = arith.addf %20, %19 : vector<64x32xf32>
    %c0_24 = arith.constant 0 : index
    %c0_25 = arith.constant 0 : index
    %22 = vector.load %arg7[%c0_24, %c0_25] : memref<64x32xf32, #tpu.memory_space<vmem>>, vector<64x32xf32>
    tpu.vector_store %arg7[%c0_24, %c0_25], %21 {strides = array<i32>} : memref<64x32xf32, #tpu.memory_space<vmem>>, vector<64x32xf32>,
    %c0_26 = arith.constant 0 : index
    %c0_27 = arith.constant 0 : index
    %23 = vector.load %arg8[%c0_26, %c0_27] : memref<64x32xf32, #tpu.memory_space<vmem>>, vector<64x32xf32>
    %24 = arith.mulf %19, %19 : vector<64x32xf32>
    %25 = arith.addf %23, %24 : vector<64x32xf32>
    %c0_28 = arith.constant 0 : index
    %c0_29 = arith.constant 0 : index
    %26 = vector.load %arg8[%c0_28, %c0_29] : memref<64x32xf32, #tpu.memory_space<vmem>>, vector<64x32xf32>
    tpu.vector_store %arg8[%c0_28, %c0_29], %25 {strides = array<i32>} : memref<64x32xf32, #tpu.memory_space<vmem>>, vector<64x32xf32>,
    %c0_30 = arith.constant 0 : index
    %c0_31 = arith.constant 0 : index
    %27 = vector.load %arg4[%c0_30, %c0_31] : memref<64x32xf32, #tpu.memory_space<vmem>>, vector<64x32xf32>
    %c0_32 = arith.constant 0 : index
    %c0_33 = arith.constant 0 : index
    %28 = vector.load %arg7[%c0_32, %c0_33] : memref<64x32xf32, #tpu.memory_space<vmem>>, vector<64x32xf32>
    %29 = arith.addf %28, %27 : vector<64x32xf32>
    %c0_34 = arith.constant 0 : index
    %c0_35 = arith.constant 0 : index
    %30 = vector.load %arg7[%c0_34, %c0_35] : memref<64x32xf32, #tpu.memory_space<vmem>>, vector<64x32xf32>
    tpu.vector_store %arg7[%c0_34, %c0_35], %29 {strides = array<i32>} : memref<64x32xf32, #tpu.memory_space<vmem>>, vector<64x32xf32>,
    %c0_36 = arith.constant 0 : index
    %c0_37 = arith.constant 0 : index
    %31 = vector.load %arg8[%c0_36, %c0_37] : memref<64x32xf32, #tpu.memory_space<vmem>>, vector<64x32xf32>
    %32 = arith.mulf %27, %27 : vector<64x32xf32>
    %33 = arith.addf %31, %32 : vector<64x32xf32>
    %c0_38 = arith.constant 0 : index
    %c0_39 = arith.constant 0 : index
    %34 = vector.load %arg8[%c0_38, %c0_39] : memref<64x32xf32, #tpu.memory_space<vmem>>, vector<64x32xf32>
    tpu.vector_store %arg8[%c0_38, %c0_39], %33 {strides = array<i32>} : memref<64x32xf32, #tpu.memory_space<vmem>>, vector<64x32xf32>,
    %c0_i32_40 = arith.constant 0 : i32
    %35 = arith.cmpi eq, %arg0, %c0_i32_40 : i32
    %36 = arith.extui %35 : i1 to i32
    %c0_i32_41 = arith.constant 0 : i32
    %37 = arith.cmpi ne, %36, %c0_i32_41 : i32
    scf.if %37 {
      %c0_42 = arith.constant 0 : index
      %c0_43 = arith.constant 0 : index
      %38 = vector.load %arg7[%c0_42, %c0_43] : memref<64x32xf32, #tpu.memory_space<vmem>>, vector<64x32xf32>
      %cst = arith.constant dense<0.000000e+00> : vector<64xf32>
      %39 = vector.multi_reduction <add>, %38, %cst [1] : vector<64x32xf32> to vector<64xf32>
      %40 = vector.shape_cast %39 : vector<64xf32> to vector<64x1xf32>
      %c0_44 = arith.constant 0 : index
      %c0_45 = arith.constant 0 : index
      %41 = vector.load %arg5[%c0_44, %c0_45] : memref<64x1xf32, #tpu.memory_space<vmem>>, vector<64x1xf32>
      tpu.vector_store %arg5[%c0_44, %c0_45], %40 {strides = array<i32>} : memref<64x1xf32, #tpu.memory_space<vmem>>, vector<64x1xf32>,
      %c0_46 = arith.constant 0 : index
      %c0_47 = arith.constant 0 : index
      %42 = vector.load %arg8[%c0_46, %c0_47] : memref<64x32xf32, #tpu.memory_space<vmem>>, vector<64x32xf32>
      %cst_48 = arith.constant dense<0.000000e+00> : vector<64xf32>
      %43 = vector.multi_reduction <add>, %42, %cst_48 [1] : vector<64x32xf32> to vector<64xf32>
      %44 = vector.shape_cast %43 : vector<64xf32> to vector<64x1xf32>
      %c0_49 = arith.constant 0 : index
      %c0_50 = arith.constant 0 : index
      %45 = vector.load %arg6[%c0_49, %c0_50] : memref<64x1xf32, #tpu.memory_space<vmem>>, vector<64x1xf32>
      tpu.vector_store %arg6[%c0_49, %c0_50], %44 {strides = array<i32>} : memref<64x1xf32, #tpu.memory_space<vmem>>, vector<64x1xf32>,
    } else {
    }
    return
  }
  func.func @transform_0(%arg0: i32) -> (i32, i32) {
    %c0_i32 = arith.constant 0 : i32
    %c0_i32_0 = arith.constant 0 : i32
    return %c0_i32, %arg0 : i32, i32
  }
  func.func @transform_1(%arg0: i32) -> (i32, i32) {
    %c0_i32 = arith.constant 0 : i32
    %c0_i32_0 = arith.constant 0 : i32
    return %c0_i32, %arg0 : i32, i32
  }
  func.func @transform_2(%arg0: i32) -> (i32, i32) {
    %c0_i32 = arith.constant 0 : i32
    %c0_i32_0 = arith.constant 0 : i32
    return %c0_i32, %arg0 : i32, i32
  }
  func.func @transform_3(%arg0: i32) -> (i32, i32) {
    %c0_i32 = arith.constant 0 : i32
    %c0_i32_0 = arith.constant 0 : i32
    return %c0_i32, %arg0 : i32, i32
  }
  func.func @transform_4(%arg0: i32) -> (i32, i32) {
    %c0_i32 = arith.constant 0 : i32
    %c0_i32_0 = arith.constant 0 : i32
    %c0_i32_1 = arith.constant 0 : i32
    return %c0_i32, %c0_i32_0 : i32, i32
  }
  func.func @transform_5(%arg0: i32) -> (i32, i32) {
    %c0_i32 = arith.constant 0 : i32
    %c0_i32_0 = arith.constant 0 : i32
    %c0_i32_1 = arith.constant 0 : i32
    return %c0_i32, %c0_i32_0 : i32, i32
  }
}

module attributes {stable_mosaic.version = 11 : i64} {
  func.func @_mm_kernel(%arg0: i32, %arg1: i32, %arg2: i32, %arg3: memref<32x256xbf16, #tpu.memory_space<vmem>>, %arg4: memref<256x128xbf16, #tpu.memory_space<vmem>>, %arg5: memref<32x128xf32, #tpu.memory_space<vmem>>, %arg6: memref<32x128xf32, #tpu.memory_space<vmem>>) attributes {dimension_semantics = [#tpu.dimension_semantics<parallel>, #tpu.dimension_semantics<parallel>, #tpu.dimension_semantics<arbitrary>], iteration_bounds = array<i64: 1, 1, 1>, scalar_prefetch = 0 : i64, scratch_operands = 1 : i64, tpu.core_type = #tpu.core_type<tc>, window_params = [{transform_indices = @transform_0, window_bounds = array<i64: 32, 256>}, {transform_indices = @transform_1, window_bounds = array<i64: 256, 128>}, {transform_indices = @transform_2, window_bounds = array<i64: 32, 128>}]} {
    %c0_i32 = arith.constant 0 : i32
    %0 = arith.cmpi eq, %arg2, %c0_i32 : i32
    %1 = arith.extui %0 : i1 to i32
    %c0_i32_0 = arith.constant 0 : i32
    %2 = arith.cmpi ne, %1, %c0_i32_0 : i32
    scf.if %2 {
      %cst_10 = arith.constant 0.000000e+00 : f32
      %12 = vector.broadcast %cst_10 : f32 to vector<32x128xf32>
      %c0_11 = arith.constant 0 : index
      %c0_12 = arith.constant 0 : index
      %13 = vector.load %arg6[%c0_11, %c0_12] : memref<32x128xf32, #tpu.memory_space<vmem>>, vector<32x128xf32>
      tpu.vector_store %arg6[%c0_11, %c0_12], %12 {strides = array<i32>} : memref<32x128xf32, #tpu.memory_space<vmem>>, vector<32x128xf32>,
    } else {
    }
    %c0 = arith.constant 0 : index
    %c0_1 = arith.constant 0 : index
    %3 = vector.load %arg6[%c0, %c0_1] : memref<32x128xf32, #tpu.memory_space<vmem>>, vector<32x128xf32>
    %c0_2 = arith.constant 0 : index
    %c0_3 = arith.constant 0 : index
    %4 = vector.load %arg3[%c0_2, %c0_3] : memref<32x256xbf16, #tpu.memory_space<vmem>>, vector<32x256xbf16>
    %c0_4 = arith.constant 0 : index
    %c0_5 = arith.constant 0 : index
    %5 = vector.load %arg4[%c0_4, %c0_5] : memref<256x128xbf16, #tpu.memory_space<vmem>>, vector<256x128xbf16>
    %cst = arith.constant dense<0.000000e+00> : vector<32x128xf32>
    %6 = tpu.matmul %4, %5, %cst {dimension_numbers = #tpu.dot_dimension_numbers<[1], [0], [0], [1], [0, 0, 1, 1], [], []>} : vector<32x256xbf16>, vector<256x128xbf16>, vector<32x128xf32> -> vector<32x128xf32>
    %7 = arith.addf %3, %6 : vector<32x128xf32>
    %c0_6 = arith.constant 0 : index
    %c0_7 = arith.constant 0 : index
    %8 = vector.load %arg6[%c0_6, %c0_7] : memref<32x128xf32, #tpu.memory_space<vmem>>, vector<32x128xf32>
    tpu.vector_store %arg6[%c0_6, %c0_7], %7 {strides = array<i32>} : memref<32x128xf32, #tpu.memory_space<vmem>>, vector<32x128xf32>,
    %c0_i32_8 = arith.constant 0 : i32
    %9 = arith.cmpi eq, %arg2, %c0_i32_8 : i32
    %10 = arith.extui %9 : i1 to i32
    %c0_i32_9 = arith.constant 0 : i32
    %11 = arith.cmpi ne, %10, %c0_i32_9 : i32
    scf.if %11 {
      %c0_10 = arith.constant 0 : index
      %c0_11 = arith.constant 0 : index
      %12 = vector.load %arg6[%c0_10, %c0_11] : memref<32x128xf32, #tpu.memory_space<vmem>>, vector<32x128xf32>
      %c0_12 = arith.constant 0 : index
      %c0_13 = arith.constant 0 : index
      %13 = vector.load %arg5[%c0_12, %c0_13] : memref<32x128xf32, #tpu.memory_space<vmem>>, vector<32x128xf32>
      tpu.vector_store %arg5[%c0_12, %c0_13], %12 {strides = array<i32>} : memref<32x128xf32, #tpu.memory_space<vmem>>, vector<32x128xf32>,
    } else {
    }
    return
  }
  func.func @transform_0(%arg0: i32, %arg1: i32, %arg2: i32) -> (i32, i32) {
    %c0_i32 = arith.constant 0 : i32
    return %arg0, %arg2 : i32, i32
  }
  func.func @transform_1(%arg0: i32, %arg1: i32, %arg2: i32) -> (i32, i32) {
    %c0_i32 = arith.constant 0 : i32
    return %arg2, %arg1 : i32, i32
  }
  func.func @transform_2(%arg0: i32, %arg1: i32, %arg2: i32) -> (i32, i32) {
    %c0_i32 = arith.constant 0 : i32
    return %arg0, %arg1 : i32, i32
  }
}

module attributes {stable_mosaic.version = 11 : i64} {
  func.func @_bn_stats_kernel(%arg0: i32, %arg1: memref<32x128xf32, #tpu.memory_space<vmem>>, %arg2: memref<32x128xf32, #tpu.memory_space<vmem>>, %arg3: memref<32x128xf32, #tpu.memory_space<vmem>>, %arg4: memref<32x128xf32, #tpu.memory_space<vmem>>, %arg5: memref<32x1xf32, #tpu.memory_space<vmem>>, %arg6: memref<32x1xf32, #tpu.memory_space<vmem>>, %arg7: memref<32x128xf32, #tpu.memory_space<vmem>>, %arg8: memref<32x128xf32, #tpu.memory_space<vmem>>) attributes {dimension_semantics = [#tpu.dimension_semantics<arbitrary>], iteration_bounds = array<i64: 1>, scalar_prefetch = 0 : i64, scratch_operands = 2 : i64, tpu.core_type = #tpu.core_type<tc>, window_params = [{transform_indices = @transform_0, window_bounds = array<i64: 32, 128>}, {transform_indices = @transform_1, window_bounds = array<i64: 32, 128>}, {transform_indices = @transform_2, window_bounds = array<i64: 32, 128>}, {transform_indices = @transform_3, window_bounds = array<i64: 32, 128>}, {pipeline_mode = #tpu.pipeline_mode<synchronous>, transform_indices = @transform_4, window_bounds = array<i64: 32, 1>}, {pipeline_mode = #tpu.pipeline_mode<synchronous>, transform_indices = @transform_5, window_bounds = array<i64: 32, 1>}]} {
    %c0_i32 = arith.constant 0 : i32
    %0 = arith.cmpi eq, %arg0, %c0_i32 : i32
    %1 = arith.extui %0 : i1 to i32
    %c0_i32_0 = arith.constant 0 : i32
    %2 = arith.cmpi ne, %1, %c0_i32_0 : i32
    scf.if %2 {
      %cst = arith.constant 0.000000e+00 : f32
      %38 = vector.broadcast %cst : f32 to vector<32x128xf32>
      %c0_42 = arith.constant 0 : index
      %c0_43 = arith.constant 0 : index
      %39 = vector.load %arg7[%c0_42, %c0_43] : memref<32x128xf32, #tpu.memory_space<vmem>>, vector<32x128xf32>
      tpu.vector_store %arg7[%c0_42, %c0_43], %38 {strides = array<i32>} : memref<32x128xf32, #tpu.memory_space<vmem>>, vector<32x128xf32>,
      %cst_44 = arith.constant 0.000000e+00 : f32
      %40 = vector.broadcast %cst_44 : f32 to vector<32x128xf32>
      %c0_45 = arith.constant 0 : index
      %c0_46 = arith.constant 0 : index
      %41 = vector.load %arg8[%c0_45, %c0_46] : memref<32x128xf32, #tpu.memory_space<vmem>>, vector<32x128xf32>
      tpu.vector_store %arg8[%c0_45, %c0_46], %40 {strides = array<i32>} : memref<32x128xf32, #tpu.memory_space<vmem>>, vector<32x128xf32>,
    } else {
    }
    %c0 = arith.constant 0 : index
    %c0_1 = arith.constant 0 : index
    %3 = vector.load %arg1[%c0, %c0_1] : memref<32x128xf32, #tpu.memory_space<vmem>>, vector<32x128xf32>
    %c0_2 = arith.constant 0 : index
    %c0_3 = arith.constant 0 : index
    %4 = vector.load %arg7[%c0_2, %c0_3] : memref<32x128xf32, #tpu.memory_space<vmem>>, vector<32x128xf32>
    %5 = arith.addf %4, %3 : vector<32x128xf32>
    %c0_4 = arith.constant 0 : index
    %c0_5 = arith.constant 0 : index
    %6 = vector.load %arg7[%c0_4, %c0_5] : memref<32x128xf32, #tpu.memory_space<vmem>>, vector<32x128xf32>
    tpu.vector_store %arg7[%c0_4, %c0_5], %5 {strides = array<i32>} : memref<32x128xf32, #tpu.memory_space<vmem>>, vector<32x128xf32>,
    %c0_6 = arith.constant 0 : index
    %c0_7 = arith.constant 0 : index
    %7 = vector.load %arg8[%c0_6, %c0_7] : memref<32x128xf32, #tpu.memory_space<vmem>>, vector<32x128xf32>
    %8 = arith.mulf %3, %3 : vector<32x128xf32>
    %9 = arith.addf %7, %8 : vector<32x128xf32>
    %c0_8 = arith.constant 0 : index
    %c0_9 = arith.constant 0 : index
    %10 = vector.load %arg8[%c0_8, %c0_9] : memref<32x128xf32, #tpu.memory_space<vmem>>, vector<32x128xf32>
    tpu.vector_store %arg8[%c0_8, %c0_9], %9 {strides = array<i32>} : memref<32x128xf32, #tpu.memory_space<vmem>>, vector<32x128xf32>,
    %c0_10 = arith.constant 0 : index
    %c0_11 = arith.constant 0 : index
    %11 = vector.load %arg2[%c0_10, %c0_11] : memref<32x128xf32, #tpu.memory_space<vmem>>, vector<32x128xf32>
    %c0_12 = arith.constant 0 : index
    %c0_13 = arith.constant 0 : index
    %12 = vector.load %arg7[%c0_12, %c0_13] : memref<32x128xf32, #tpu.memory_space<vmem>>, vector<32x128xf32>
    %13 = arith.addf %12, %11 : vector<32x128xf32>
    %c0_14 = arith.constant 0 : index
    %c0_15 = arith.constant 0 : index
    %14 = vector.load %arg7[%c0_14, %c0_15] : memref<32x128xf32, #tpu.memory_space<vmem>>, vector<32x128xf32>
    tpu.vector_store %arg7[%c0_14, %c0_15], %13 {strides = array<i32>} : memref<32x128xf32, #tpu.memory_space<vmem>>, vector<32x128xf32>,
    %c0_16 = arith.constant 0 : index
    %c0_17 = arith.constant 0 : index
    %15 = vector.load %arg8[%c0_16, %c0_17] : memref<32x128xf32, #tpu.memory_space<vmem>>, vector<32x128xf32>
    %16 = arith.mulf %11, %11 : vector<32x128xf32>
    %17 = arith.addf %15, %16 : vector<32x128xf32>
    %c0_18 = arith.constant 0 : index
    %c0_19 = arith.constant 0 : index
    %18 = vector.load %arg8[%c0_18, %c0_19] : memref<32x128xf32, #tpu.memory_space<vmem>>, vector<32x128xf32>
    tpu.vector_store %arg8[%c0_18, %c0_19], %17 {strides = array<i32>} : memref<32x128xf32, #tpu.memory_space<vmem>>, vector<32x128xf32>,
    %c0_20 = arith.constant 0 : index
    %c0_21 = arith.constant 0 : index
    %19 = vector.load %arg3[%c0_20, %c0_21] : memref<32x128xf32, #tpu.memory_space<vmem>>, vector<32x128xf32>
    %c0_22 = arith.constant 0 : index
    %c0_23 = arith.constant 0 : index
    %20 = vector.load %arg7[%c0_22, %c0_23] : memref<32x128xf32, #tpu.memory_space<vmem>>, vector<32x128xf32>
    %21 = arith.addf %20, %19 : vector<32x128xf32>
    %c0_24 = arith.constant 0 : index
    %c0_25 = arith.constant 0 : index
    %22 = vector.load %arg7[%c0_24, %c0_25] : memref<32x128xf32, #tpu.memory_space<vmem>>, vector<32x128xf32>
    tpu.vector_store %arg7[%c0_24, %c0_25], %21 {strides = array<i32>} : memref<32x128xf32, #tpu.memory_space<vmem>>, vector<32x128xf32>,
    %c0_26 = arith.constant 0 : index
    %c0_27 = arith.constant 0 : index
    %23 = vector.load %arg8[%c0_26, %c0_27] : memref<32x128xf32, #tpu.memory_space<vmem>>, vector<32x128xf32>
    %24 = arith.mulf %19, %19 : vector<32x128xf32>
    %25 = arith.addf %23, %24 : vector<32x128xf32>
    %c0_28 = arith.constant 0 : index
    %c0_29 = arith.constant 0 : index
    %26 = vector.load %arg8[%c0_28, %c0_29] : memref<32x128xf32, #tpu.memory_space<vmem>>, vector<32x128xf32>
    tpu.vector_store %arg8[%c0_28, %c0_29], %25 {strides = array<i32>} : memref<32x128xf32, #tpu.memory_space<vmem>>, vector<32x128xf32>,
    %c0_30 = arith.constant 0 : index
    %c0_31 = arith.constant 0 : index
    %27 = vector.load %arg4[%c0_30, %c0_31] : memref<32x128xf32, #tpu.memory_space<vmem>>, vector<32x128xf32>
    %c0_32 = arith.constant 0 : index
    %c0_33 = arith.constant 0 : index
    %28 = vector.load %arg7[%c0_32, %c0_33] : memref<32x128xf32, #tpu.memory_space<vmem>>, vector<32x128xf32>
    %29 = arith.addf %28, %27 : vector<32x128xf32>
    %c0_34 = arith.constant 0 : index
    %c0_35 = arith.constant 0 : index
    %30 = vector.load %arg7[%c0_34, %c0_35] : memref<32x128xf32, #tpu.memory_space<vmem>>, vector<32x128xf32>
    tpu.vector_store %arg7[%c0_34, %c0_35], %29 {strides = array<i32>} : memref<32x128xf32, #tpu.memory_space<vmem>>, vector<32x128xf32>,
    %c0_36 = arith.constant 0 : index
    %c0_37 = arith.constant 0 : index
    %31 = vector.load %arg8[%c0_36, %c0_37] : memref<32x128xf32, #tpu.memory_space<vmem>>, vector<32x128xf32>
    %32 = arith.mulf %27, %27 : vector<32x128xf32>
    %33 = arith.addf %31, %32 : vector<32x128xf32>
    %c0_38 = arith.constant 0 : index
    %c0_39 = arith.constant 0 : index
    %34 = vector.load %arg8[%c0_38, %c0_39] : memref<32x128xf32, #tpu.memory_space<vmem>>, vector<32x128xf32>
    tpu.vector_store %arg8[%c0_38, %c0_39], %33 {strides = array<i32>} : memref<32x128xf32, #tpu.memory_space<vmem>>, vector<32x128xf32>,
    %c0_i32_40 = arith.constant 0 : i32
    %35 = arith.cmpi eq, %arg0, %c0_i32_40 : i32
    %36 = arith.extui %35 : i1 to i32
    %c0_i32_41 = arith.constant 0 : i32
    %37 = arith.cmpi ne, %36, %c0_i32_41 : i32
    scf.if %37 {
      %c0_42 = arith.constant 0 : index
      %c0_43 = arith.constant 0 : index
      %38 = vector.load %arg7[%c0_42, %c0_43] : memref<32x128xf32, #tpu.memory_space<vmem>>, vector<32x128xf32>
      %cst = arith.constant dense<0.000000e+00> : vector<32xf32>
      %39 = vector.multi_reduction <add>, %38, %cst [1] : vector<32x128xf32> to vector<32xf32>
      %40 = vector.shape_cast %39 : vector<32xf32> to vector<32x1xf32>
      %c0_44 = arith.constant 0 : index
      %c0_45 = arith.constant 0 : index
      %41 = vector.load %arg5[%c0_44, %c0_45] : memref<32x1xf32, #tpu.memory_space<vmem>>, vector<32x1xf32>
      tpu.vector_store %arg5[%c0_44, %c0_45], %40 {strides = array<i32>} : memref<32x1xf32, #tpu.memory_space<vmem>>, vector<32x1xf32>,
      %c0_46 = arith.constant 0 : index
      %c0_47 = arith.constant 0 : index
      %42 = vector.load %arg8[%c0_46, %c0_47] : memref<32x128xf32, #tpu.memory_space<vmem>>, vector<32x128xf32>
      %cst_48 = arith.constant dense<0.000000e+00> : vector<32xf32>
      %43 = vector.multi_reduction <add>, %42, %cst_48 [1] : vector<32x128xf32> to vector<32xf32>
      %44 = vector.shape_cast %43 : vector<32xf32> to vector<32x1xf32>
      %c0_49 = arith.constant 0 : index
      %c0_50 = arith.constant 0 : index
      %45 = vector.load %arg6[%c0_49, %c0_50] : memref<32x1xf32, #tpu.memory_space<vmem>>, vector<32x1xf32>
      tpu.vector_store %arg6[%c0_49, %c0_50], %44 {strides = array<i32>} : memref<32x1xf32, #tpu.memory_space<vmem>>, vector<32x1xf32>,
    } else {
    }
    return
  }
  func.func @transform_0(%arg0: i32) -> (i32, i32) {
    %c0_i32 = arith.constant 0 : i32
    %c0_i32_0 = arith.constant 0 : i32
    return %c0_i32, %arg0 : i32, i32
  }
  func.func @transform_1(%arg0: i32) -> (i32, i32) {
    %c0_i32 = arith.constant 0 : i32
    %c0_i32_0 = arith.constant 0 : i32
    return %c0_i32, %arg0 : i32, i32
  }
  func.func @transform_2(%arg0: i32) -> (i32, i32) {
    %c0_i32 = arith.constant 0 : i32
    %c0_i32_0 = arith.constant 0 : i32
    return %c0_i32, %arg0 : i32, i32
  }
  func.func @transform_3(%arg0: i32) -> (i32, i32) {
    %c0_i32 = arith.constant 0 : i32
    %c0_i32_0 = arith.constant 0 : i32
    return %c0_i32, %arg0 : i32, i32
  }
  func.func @transform_4(%arg0: i32) -> (i32, i32) {
    %c0_i32 = arith.constant 0 : i32
    %c0_i32_0 = arith.constant 0 : i32
    %c0_i32_1 = arith.constant 0 : i32
    return %c0_i32, %c0_i32_0 : i32, i32
  }
  func.func @transform_5(%arg0: i32) -> (i32, i32) {
    %c0_i32 = arith.constant 0 : i32
    %c0_i32_0 = arith.constant 0 : i32
    %c0_i32_1 = arith.constant 0 : i32
    return %c0_i32, %c0_i32_0 : i32, i32
  }
}

module attributes {stable_mosaic.version = 11 : i64} {
  func.func @_mm_kernel(%arg0: i32, %arg1: i32, %arg2: i32, %arg3: memref<16x128xbf16, #tpu.memory_space<vmem>>, %arg4: memref<128x256xbf16, #tpu.memory_space<vmem>>, %arg5: memref<16x256xf32, #tpu.memory_space<vmem>>, %arg6: memref<16x256xf32, #tpu.memory_space<vmem>>) attributes {dimension_semantics = [#tpu.dimension_semantics<parallel>, #tpu.dimension_semantics<parallel>, #tpu.dimension_semantics<arbitrary>], iteration_bounds = array<i64: 1, 2, 1>, scalar_prefetch = 0 : i64, scratch_operands = 1 : i64, tpu.core_type = #tpu.core_type<tc>, window_params = [{transform_indices = @transform_0, window_bounds = array<i64: 16, 128>}, {transform_indices = @transform_1, window_bounds = array<i64: 128, 256>}, {transform_indices = @transform_2, window_bounds = array<i64: 16, 256>}]} {
    %c0_i32 = arith.constant 0 : i32
    %0 = arith.cmpi eq, %arg2, %c0_i32 : i32
    %1 = arith.extui %0 : i1 to i32
    %c0_i32_0 = arith.constant 0 : i32
    %2 = arith.cmpi ne, %1, %c0_i32_0 : i32
    scf.if %2 {
      %cst_10 = arith.constant 0.000000e+00 : f32
      %12 = vector.broadcast %cst_10 : f32 to vector<16x256xf32>
      %c0_11 = arith.constant 0 : index
      %c0_12 = arith.constant 0 : index
      %13 = vector.load %arg6[%c0_11, %c0_12] : memref<16x256xf32, #tpu.memory_space<vmem>>, vector<16x256xf32>
      tpu.vector_store %arg6[%c0_11, %c0_12], %12 {strides = array<i32>} : memref<16x256xf32, #tpu.memory_space<vmem>>, vector<16x256xf32>,
    } else {
    }
    %c0 = arith.constant 0 : index
    %c0_1 = arith.constant 0 : index
    %3 = vector.load %arg6[%c0, %c0_1] : memref<16x256xf32, #tpu.memory_space<vmem>>, vector<16x256xf32>
    %c0_2 = arith.constant 0 : index
    %c0_3 = arith.constant 0 : index
    %4 = vector.load %arg3[%c0_2, %c0_3] : memref<16x128xbf16, #tpu.memory_space<vmem>>, vector<16x128xbf16>
    %c0_4 = arith.constant 0 : index
    %c0_5 = arith.constant 0 : index
    %5 = vector.load %arg4[%c0_4, %c0_5] : memref<128x256xbf16, #tpu.memory_space<vmem>>, vector<128x256xbf16>
    %cst = arith.constant dense<0.000000e+00> : vector<16x256xf32>
    %6 = tpu.matmul %4, %5, %cst {dimension_numbers = #tpu.dot_dimension_numbers<[1], [0], [0], [1], [0, 0, 1, 1], [], []>} : vector<16x128xbf16>, vector<128x256xbf16>, vector<16x256xf32> -> vector<16x256xf32>
    %7 = arith.addf %3, %6 : vector<16x256xf32>
    %c0_6 = arith.constant 0 : index
    %c0_7 = arith.constant 0 : index
    %8 = vector.load %arg6[%c0_6, %c0_7] : memref<16x256xf32, #tpu.memory_space<vmem>>, vector<16x256xf32>
    tpu.vector_store %arg6[%c0_6, %c0_7], %7 {strides = array<i32>} : memref<16x256xf32, #tpu.memory_space<vmem>>, vector<16x256xf32>,
    %c0_i32_8 = arith.constant 0 : i32
    %9 = arith.cmpi eq, %arg2, %c0_i32_8 : i32
    %10 = arith.extui %9 : i1 to i32
    %c0_i32_9 = arith.constant 0 : i32
    %11 = arith.cmpi ne, %10, %c0_i32_9 : i32
    scf.if %11 {
      %c0_10 = arith.constant 0 : index
      %c0_11 = arith.constant 0 : index
      %12 = vector.load %arg6[%c0_10, %c0_11] : memref<16x256xf32, #tpu.memory_space<vmem>>, vector<16x256xf32>
      %c0_12 = arith.constant 0 : index
      %c0_13 = arith.constant 0 : index
      %13 = vector.load %arg5[%c0_12, %c0_13] : memref<16x256xf32, #tpu.memory_space<vmem>>, vector<16x256xf32>
      tpu.vector_store %arg5[%c0_12, %c0_13], %12 {strides = array<i32>} : memref<16x256xf32, #tpu.memory_space<vmem>>, vector<16x256xf32>,
    } else {
    }
    return
  }
  func.func @transform_0(%arg0: i32, %arg1: i32, %arg2: i32) -> (i32, i32) {
    %c0_i32 = arith.constant 0 : i32
    return %arg0, %arg2 : i32, i32
  }
  func.func @transform_1(%arg0: i32, %arg1: i32, %arg2: i32) -> (i32, i32) {
    %c0_i32 = arith.constant 0 : i32
    return %arg2, %arg1 : i32, i32
  }
  func.func @transform_2(%arg0: i32, %arg1: i32, %arg2: i32) -> (i32, i32) {
    %c0_i32 = arith.constant 0 : i32
    return %arg0, %arg1 : i32, i32
  }
}

module attributes {stable_mosaic.version = 11 : i64} {
  func.func @_bn_stats_kernel(%arg0: i32, %arg1: memref<16x512xf32, #tpu.memory_space<vmem>>, %arg2: memref<16x512xf32, #tpu.memory_space<vmem>>, %arg3: memref<16x512xf32, #tpu.memory_space<vmem>>, %arg4: memref<16x512xf32, #tpu.memory_space<vmem>>, %arg5: memref<16x1xf32, #tpu.memory_space<vmem>>, %arg6: memref<16x1xf32, #tpu.memory_space<vmem>>, %arg7: memref<16x512xf32, #tpu.memory_space<vmem>>, %arg8: memref<16x512xf32, #tpu.memory_space<vmem>>) attributes {dimension_semantics = [#tpu.dimension_semantics<arbitrary>], iteration_bounds = array<i64: 1>, scalar_prefetch = 0 : i64, scratch_operands = 2 : i64, tpu.core_type = #tpu.core_type<tc>, window_params = [{transform_indices = @transform_0, window_bounds = array<i64: 16, 512>}, {transform_indices = @transform_1, window_bounds = array<i64: 16, 512>}, {transform_indices = @transform_2, window_bounds = array<i64: 16, 512>}, {transform_indices = @transform_3, window_bounds = array<i64: 16, 512>}, {pipeline_mode = #tpu.pipeline_mode<synchronous>, transform_indices = @transform_4, window_bounds = array<i64: 16, 1>}, {pipeline_mode = #tpu.pipeline_mode<synchronous>, transform_indices = @transform_5, window_bounds = array<i64: 16, 1>}]} {
    %c0_i32 = arith.constant 0 : i32
    %0 = arith.cmpi eq, %arg0, %c0_i32 : i32
    %1 = arith.extui %0 : i1 to i32
    %c0_i32_0 = arith.constant 0 : i32
    %2 = arith.cmpi ne, %1, %c0_i32_0 : i32
    scf.if %2 {
      %cst = arith.constant 0.000000e+00 : f32
      %38 = vector.broadcast %cst : f32 to vector<16x512xf32>
      %c0_42 = arith.constant 0 : index
      %c0_43 = arith.constant 0 : index
      %39 = vector.load %arg7[%c0_42, %c0_43] : memref<16x512xf32, #tpu.memory_space<vmem>>, vector<16x512xf32>
      tpu.vector_store %arg7[%c0_42, %c0_43], %38 {strides = array<i32>} : memref<16x512xf32, #tpu.memory_space<vmem>>, vector<16x512xf32>,
      %cst_44 = arith.constant 0.000000e+00 : f32
      %40 = vector.broadcast %cst_44 : f32 to vector<16x512xf32>
      %c0_45 = arith.constant 0 : index
      %c0_46 = arith.constant 0 : index
      %41 = vector.load %arg8[%c0_45, %c0_46] : memref<16x512xf32, #tpu.memory_space<vmem>>, vector<16x512xf32>
      tpu.vector_store %arg8[%c0_45, %c0_46], %40 {strides = array<i32>} : memref<16x512xf32, #tpu.memory_space<vmem>>, vector<16x512xf32>,
    } else {
    }
    %c0 = arith.constant 0 : index
    %c0_1 = arith.constant 0 : index
    %3 = vector.load %arg1[%c0, %c0_1] : memref<16x512xf32, #tpu.memory_space<vmem>>, vector<16x512xf32>
    %c0_2 = arith.constant 0 : index
    %c0_3 = arith.constant 0 : index
    %4 = vector.load %arg7[%c0_2, %c0_3] : memref<16x512xf32, #tpu.memory_space<vmem>>, vector<16x512xf32>
    %5 = arith.addf %4, %3 : vector<16x512xf32>
    %c0_4 = arith.constant 0 : index
    %c0_5 = arith.constant 0 : index
    %6 = vector.load %arg7[%c0_4, %c0_5] : memref<16x512xf32, #tpu.memory_space<vmem>>, vector<16x512xf32>
    tpu.vector_store %arg7[%c0_4, %c0_5], %5 {strides = array<i32>} : memref<16x512xf32, #tpu.memory_space<vmem>>, vector<16x512xf32>,
    %c0_6 = arith.constant 0 : index
    %c0_7 = arith.constant 0 : index
    %7 = vector.load %arg8[%c0_6, %c0_7] : memref<16x512xf32, #tpu.memory_space<vmem>>, vector<16x512xf32>
    %8 = arith.mulf %3, %3 : vector<16x512xf32>
    %9 = arith.addf %7, %8 : vector<16x512xf32>
    %c0_8 = arith.constant 0 : index
    %c0_9 = arith.constant 0 : index
    %10 = vector.load %arg8[%c0_8, %c0_9] : memref<16x512xf32, #tpu.memory_space<vmem>>, vector<16x512xf32>
    tpu.vector_store %arg8[%c0_8, %c0_9], %9 {strides = array<i32>} : memref<16x512xf32, #tpu.memory_space<vmem>>, vector<16x512xf32>,
    %c0_10 = arith.constant 0 : index
    %c0_11 = arith.constant 0 : index
    %11 = vector.load %arg2[%c0_10, %c0_11] : memref<16x512xf32, #tpu.memory_space<vmem>>, vector<16x512xf32>
    %c0_12 = arith.constant 0 : index
    %c0_13 = arith.constant 0 : index
    %12 = vector.load %arg7[%c0_12, %c0_13] : memref<16x512xf32, #tpu.memory_space<vmem>>, vector<16x512xf32>
    %13 = arith.addf %12, %11 : vector<16x512xf32>
    %c0_14 = arith.constant 0 : index
    %c0_15 = arith.constant 0 : index
    %14 = vector.load %arg7[%c0_14, %c0_15] : memref<16x512xf32, #tpu.memory_space<vmem>>, vector<16x512xf32>
    tpu.vector_store %arg7[%c0_14, %c0_15], %13 {strides = array<i32>} : memref<16x512xf32, #tpu.memory_space<vmem>>, vector<16x512xf32>,
    %c0_16 = arith.constant 0 : index
    %c0_17 = arith.constant 0 : index
    %15 = vector.load %arg8[%c0_16, %c0_17] : memref<16x512xf32, #tpu.memory_space<vmem>>, vector<16x512xf32>
    %16 = arith.mulf %11, %11 : vector<16x512xf32>
    %17 = arith.addf %15, %16 : vector<16x512xf32>
    %c0_18 = arith.constant 0 : index
    %c0_19 = arith.constant 0 : index
    %18 = vector.load %arg8[%c0_18, %c0_19] : memref<16x512xf32, #tpu.memory_space<vmem>>, vector<16x512xf32>
    tpu.vector_store %arg8[%c0_18, %c0_19], %17 {strides = array<i32>} : memref<16x512xf32, #tpu.memory_space<vmem>>, vector<16x512xf32>,
    %c0_20 = arith.constant 0 : index
    %c0_21 = arith.constant 0 : index
    %19 = vector.load %arg3[%c0_20, %c0_21] : memref<16x512xf32, #tpu.memory_space<vmem>>, vector<16x512xf32>
    %c0_22 = arith.constant 0 : index
    %c0_23 = arith.constant 0 : index
    %20 = vector.load %arg7[%c0_22, %c0_23] : memref<16x512xf32, #tpu.memory_space<vmem>>, vector<16x512xf32>
    %21 = arith.addf %20, %19 : vector<16x512xf32>
    %c0_24 = arith.constant 0 : index
    %c0_25 = arith.constant 0 : index
    %22 = vector.load %arg7[%c0_24, %c0_25] : memref<16x512xf32, #tpu.memory_space<vmem>>, vector<16x512xf32>
    tpu.vector_store %arg7[%c0_24, %c0_25], %21 {strides = array<i32>} : memref<16x512xf32, #tpu.memory_space<vmem>>, vector<16x512xf32>,
    %c0_26 = arith.constant 0 : index
    %c0_27 = arith.constant 0 : index
    %23 = vector.load %arg8[%c0_26, %c0_27] : memref<16x512xf32, #tpu.memory_space<vmem>>, vector<16x512xf32>
    %24 = arith.mulf %19, %19 : vector<16x512xf32>
    %25 = arith.addf %23, %24 : vector<16x512xf32>
    %c0_28 = arith.constant 0 : index
    %c0_29 = arith.constant 0 : index
    %26 = vector.load %arg8[%c0_28, %c0_29] : memref<16x512xf32, #tpu.memory_space<vmem>>, vector<16x512xf32>
    tpu.vector_store %arg8[%c0_28, %c0_29], %25 {strides = array<i32>} : memref<16x512xf32, #tpu.memory_space<vmem>>, vector<16x512xf32>,
    %c0_30 = arith.constant 0 : index
    %c0_31 = arith.constant 0 : index
    %27 = vector.load %arg4[%c0_30, %c0_31] : memref<16x512xf32, #tpu.memory_space<vmem>>, vector<16x512xf32>
    %c0_32 = arith.constant 0 : index
    %c0_33 = arith.constant 0 : index
    %28 = vector.load %arg7[%c0_32, %c0_33] : memref<16x512xf32, #tpu.memory_space<vmem>>, vector<16x512xf32>
    %29 = arith.addf %28, %27 : vector<16x512xf32>
    %c0_34 = arith.constant 0 : index
    %c0_35 = arith.constant 0 : index
    %30 = vector.load %arg7[%c0_34, %c0_35] : memref<16x512xf32, #tpu.memory_space<vmem>>, vector<16x512xf32>
    tpu.vector_store %arg7[%c0_34, %c0_35], %29 {strides = array<i32>} : memref<16x512xf32, #tpu.memory_space<vmem>>, vector<16x512xf32>,
    %c0_36 = arith.constant 0 : index
    %c0_37 = arith.constant 0 : index
    %31 = vector.load %arg8[%c0_36, %c0_37] : memref<16x512xf32, #tpu.memory_space<vmem>>, vector<16x512xf32>
    %32 = arith.mulf %27, %27 : vector<16x512xf32>
    %33 = arith.addf %31, %32 : vector<16x512xf32>
    %c0_38 = arith.constant 0 : index
    %c0_39 = arith.constant 0 : index
    %34 = vector.load %arg8[%c0_38, %c0_39] : memref<16x512xf32, #tpu.memory_space<vmem>>, vector<16x512xf32>
    tpu.vector_store %arg8[%c0_38, %c0_39], %33 {strides = array<i32>} : memref<16x512xf32, #tpu.memory_space<vmem>>, vector<16x512xf32>,
    %c0_i32_40 = arith.constant 0 : i32
    %35 = arith.cmpi eq, %arg0, %c0_i32_40 : i32
    %36 = arith.extui %35 : i1 to i32
    %c0_i32_41 = arith.constant 0 : i32
    %37 = arith.cmpi ne, %36, %c0_i32_41 : i32
    scf.if %37 {
      %c0_42 = arith.constant 0 : index
      %c0_43 = arith.constant 0 : index
      %38 = vector.load %arg7[%c0_42, %c0_43] : memref<16x512xf32, #tpu.memory_space<vmem>>, vector<16x512xf32>
      %cst = arith.constant dense<0.000000e+00> : vector<16xf32>
      %39 = vector.multi_reduction <add>, %38, %cst [1] : vector<16x512xf32> to vector<16xf32>
      %40 = vector.shape_cast %39 : vector<16xf32> to vector<16x1xf32>
      %c0_44 = arith.constant 0 : index
      %c0_45 = arith.constant 0 : index
      %41 = vector.load %arg5[%c0_44, %c0_45] : memref<16x1xf32, #tpu.memory_space<vmem>>, vector<16x1xf32>
      tpu.vector_store %arg5[%c0_44, %c0_45], %40 {strides = array<i32>} : memref<16x1xf32, #tpu.memory_space<vmem>>, vector<16x1xf32>,
      %c0_46 = arith.constant 0 : index
      %c0_47 = arith.constant 0 : index
      %42 = vector.load %arg8[%c0_46, %c0_47] : memref<16x512xf32, #tpu.memory_space<vmem>>, vector<16x512xf32>
      %cst_48 = arith.constant dense<0.000000e+00> : vector<16xf32>
      %43 = vector.multi_reduction <add>, %42, %cst_48 [1] : vector<16x512xf32> to vector<16xf32>
      %44 = vector.shape_cast %43 : vector<16xf32> to vector<16x1xf32>
      %c0_49 = arith.constant 0 : index
      %c0_50 = arith.constant 0 : index
      %45 = vector.load %arg6[%c0_49, %c0_50] : memref<16x1xf32, #tpu.memory_space<vmem>>, vector<16x1xf32>
      tpu.vector_store %arg6[%c0_49, %c0_50], %44 {strides = array<i32>} : memref<16x1xf32, #tpu.memory_space<vmem>>, vector<16x1xf32>,
    } else {
    }
    return
  }
  func.func @transform_0(%arg0: i32) -> (i32, i32) {
    %c0_i32 = arith.constant 0 : i32
    %c0_i32_0 = arith.constant 0 : i32
    return %c0_i32, %arg0 : i32, i32
  }
  func.func @transform_1(%arg0: i32) -> (i32, i32) {
    %c0_i32 = arith.constant 0 : i32
    %c0_i32_0 = arith.constant 0 : i32
    return %c0_i32, %arg0 : i32, i32
  }
  func.func @transform_2(%arg0: i32) -> (i32, i32) {
    %c0_i32 = arith.constant 0 : i32
    %c0_i32_0 = arith.constant 0 : i32
    return %c0_i32, %arg0 : i32, i32
  }
  func.func @transform_3(%arg0: i32) -> (i32, i32) {
    %c0_i32 = arith.constant 0 : i32
    %c0_i32_0 = arith.constant 0 : i32
    return %c0_i32, %arg0 : i32, i32
  }
  func.func @transform_4(%arg0: i32) -> (i32, i32) {
    %c0_i32 = arith.constant 0 : i32
    %c0_i32_0 = arith.constant 0 : i32
    %c0_i32_1 = arith.constant 0 : i32
    return %c0_i32, %c0_i32_0 : i32, i32
  }
  func.func @transform_5(%arg0: i32) -> (i32, i32) {
    %c0_i32 = arith.constant 0 : i32
    %c0_i32_0 = arith.constant 0 : i32
    %c0_i32_1 = arith.constant 0 : i32
    return %c0_i32, %c0_i32_0 : i32, i32
  }
}

module attributes {stable_mosaic.version = 11 : i64} {
  func.func @_mm_kernel(%arg0: i32, %arg1: i32, %arg2: i32, %arg3: memref<8x64xbf16, #tpu.memory_space<vmem>>, %arg4: memref<64x1024xbf16, #tpu.memory_space<vmem>>, %arg5: memref<8x1024xf32, #tpu.memory_space<vmem>>, %arg6: memref<8x1024xf32, #tpu.memory_space<vmem>>) attributes {dimension_semantics = [#tpu.dimension_semantics<parallel>, #tpu.dimension_semantics<parallel>, #tpu.dimension_semantics<arbitrary>], iteration_bounds = array<i64: 1, 2, 1>, scalar_prefetch = 0 : i64, scratch_operands = 1 : i64, tpu.core_type = #tpu.core_type<tc>, window_params = [{transform_indices = @transform_0, window_bounds = array<i64: 8, 64>}, {transform_indices = @transform_1, window_bounds = array<i64: 64, 1024>}, {transform_indices = @transform_2, window_bounds = array<i64: 8, 1024>}]} {
    %c0_i32 = arith.constant 0 : i32
    %0 = arith.cmpi eq, %arg2, %c0_i32 : i32
    %1 = arith.extui %0 : i1 to i32
    %c0_i32_0 = arith.constant 0 : i32
    %2 = arith.cmpi ne, %1, %c0_i32_0 : i32
    scf.if %2 {
      %cst_10 = arith.constant 0.000000e+00 : f32
      %12 = vector.broadcast %cst_10 : f32 to vector<8x1024xf32>
      %c0_11 = arith.constant 0 : index
      %c0_12 = arith.constant 0 : index
      %13 = vector.load %arg6[%c0_11, %c0_12] : memref<8x1024xf32, #tpu.memory_space<vmem>>, vector<8x1024xf32>
      tpu.vector_store %arg6[%c0_11, %c0_12], %12 {strides = array<i32>} : memref<8x1024xf32, #tpu.memory_space<vmem>>, vector<8x1024xf32>,
    } else {
    }
    %c0 = arith.constant 0 : index
    %c0_1 = arith.constant 0 : index
    %3 = vector.load %arg6[%c0, %c0_1] : memref<8x1024xf32, #tpu.memory_space<vmem>>, vector<8x1024xf32>
    %c0_2 = arith.constant 0 : index
    %c0_3 = arith.constant 0 : index
    %4 = vector.load %arg3[%c0_2, %c0_3] : memref<8x64xbf16, #tpu.memory_space<vmem>>, vector<8x64xbf16>
    %c0_4 = arith.constant 0 : index
    %c0_5 = arith.constant 0 : index
    %5 = vector.load %arg4[%c0_4, %c0_5] : memref<64x1024xbf16, #tpu.memory_space<vmem>>, vector<64x1024xbf16>
    %cst = arith.constant dense<0.000000e+00> : vector<8x1024xf32>
    %6 = tpu.matmul %4, %5, %cst {dimension_numbers = #tpu.dot_dimension_numbers<[1], [0], [0], [1], [0, 0, 1, 1], [], []>} : vector<8x64xbf16>, vector<64x1024xbf16>, vector<8x1024xf32> -> vector<8x1024xf32>
    %7 = arith.addf %3, %6 : vector<8x1024xf32>
    %c0_6 = arith.constant 0 : index
    %c0_7 = arith.constant 0 : index
    %8 = vector.load %arg6[%c0_6, %c0_7] : memref<8x1024xf32, #tpu.memory_space<vmem>>, vector<8x1024xf32>
    tpu.vector_store %arg6[%c0_6, %c0_7], %7 {strides = array<i32>} : memref<8x1024xf32, #tpu.memory_space<vmem>>, vector<8x1024xf32>,
    %c0_i32_8 = arith.constant 0 : i32
    %9 = arith.cmpi eq, %arg2, %c0_i32_8 : i32
    %10 = arith.extui %9 : i1 to i32
    %c0_i32_9 = arith.constant 0 : i32
    %11 = arith.cmpi ne, %10, %c0_i32_9 : i32
    scf.if %11 {
      %c0_10 = arith.constant 0 : index
      %c0_11 = arith.constant 0 : index
      %12 = vector.load %arg6[%c0_10, %c0_11] : memref<8x1024xf32, #tpu.memory_space<vmem>>, vector<8x1024xf32>
      %c0_12 = arith.constant 0 : index
      %c0_13 = arith.constant 0 : index
      %13 = vector.load %arg5[%c0_12, %c0_13] : memref<8x1024xf32, #tpu.memory_space<vmem>>, vector<8x1024xf32>
      tpu.vector_store %arg5[%c0_12, %c0_13], %12 {strides = array<i32>} : memref<8x1024xf32, #tpu.memory_space<vmem>>, vector<8x1024xf32>,
    } else {
    }
    return
  }
  func.func @transform_0(%arg0: i32, %arg1: i32, %arg2: i32) -> (i32, i32) {
    %c0_i32 = arith.constant 0 : i32
    return %arg0, %arg2 : i32, i32
  }
  func.func @transform_1(%arg0: i32, %arg1: i32, %arg2: i32) -> (i32, i32) {
    %c0_i32 = arith.constant 0 : i32
    return %arg2, %arg1 : i32, i32
  }
  func.func @transform_2(%arg0: i32, %arg1: i32, %arg2: i32) -> (i32, i32) {
    %c0_i32 = arith.constant 0 : i32
    return %arg0, %arg1 : i32, i32
  }
}

module attributes {stable_mosaic.version = 11 : i64} {
  func.func @_bn_stats_kernel(%arg0: i32, %arg1: memref<8x2048xf32, #tpu.memory_space<vmem>>, %arg2: memref<8x2048xf32, #tpu.memory_space<vmem>>, %arg3: memref<8x2048xf32, #tpu.memory_space<vmem>>, %arg4: memref<8x2048xf32, #tpu.memory_space<vmem>>, %arg5: memref<8x1xf32, #tpu.memory_space<vmem>>, %arg6: memref<8x1xf32, #tpu.memory_space<vmem>>, %arg7: memref<8x2048xf32, #tpu.memory_space<vmem>>, %arg8: memref<8x2048xf32, #tpu.memory_space<vmem>>) attributes {dimension_semantics = [#tpu.dimension_semantics<arbitrary>], iteration_bounds = array<i64: 1>, scalar_prefetch = 0 : i64, scratch_operands = 2 : i64, tpu.core_type = #tpu.core_type<tc>, window_params = [{transform_indices = @transform_0, window_bounds = array<i64: 8, 2048>}, {transform_indices = @transform_1, window_bounds = array<i64: 8, 2048>}, {transform_indices = @transform_2, window_bounds = array<i64: 8, 2048>}, {transform_indices = @transform_3, window_bounds = array<i64: 8, 2048>}, {pipeline_mode = #tpu.pipeline_mode<synchronous>, transform_indices = @transform_4, window_bounds = array<i64: 8, 1>}, {pipeline_mode = #tpu.pipeline_mode<synchronous>, transform_indices = @transform_5, window_bounds = array<i64: 8, 1>}]} {
    %c0_i32 = arith.constant 0 : i32
    %0 = arith.cmpi eq, %arg0, %c0_i32 : i32
    %1 = arith.extui %0 : i1 to i32
    %c0_i32_0 = arith.constant 0 : i32
    %2 = arith.cmpi ne, %1, %c0_i32_0 : i32
    scf.if %2 {
      %cst = arith.constant 0.000000e+00 : f32
      %38 = vector.broadcast %cst : f32 to vector<8x2048xf32>
      %c0_42 = arith.constant 0 : index
      %c0_43 = arith.constant 0 : index
      %39 = vector.load %arg7[%c0_42, %c0_43] : memref<8x2048xf32, #tpu.memory_space<vmem>>, vector<8x2048xf32>
      tpu.vector_store %arg7[%c0_42, %c0_43], %38 {strides = array<i32>} : memref<8x2048xf32, #tpu.memory_space<vmem>>, vector<8x2048xf32>,
      %cst_44 = arith.constant 0.000000e+00 : f32
      %40 = vector.broadcast %cst_44 : f32 to vector<8x2048xf32>
      %c0_45 = arith.constant 0 : index
      %c0_46 = arith.constant 0 : index
      %41 = vector.load %arg8[%c0_45, %c0_46] : memref<8x2048xf32, #tpu.memory_space<vmem>>, vector<8x2048xf32>
      tpu.vector_store %arg8[%c0_45, %c0_46], %40 {strides = array<i32>} : memref<8x2048xf32, #tpu.memory_space<vmem>>, vector<8x2048xf32>,
    } else {
    }
    %c0 = arith.constant 0 : index
    %c0_1 = arith.constant 0 : index
    %3 = vector.load %arg1[%c0, %c0_1] : memref<8x2048xf32, #tpu.memory_space<vmem>>, vector<8x2048xf32>
    %c0_2 = arith.constant 0 : index
    %c0_3 = arith.constant 0 : index
    %4 = vector.load %arg7[%c0_2, %c0_3] : memref<8x2048xf32, #tpu.memory_space<vmem>>, vector<8x2048xf32>
    %5 = arith.addf %4, %3 : vector<8x2048xf32>
    %c0_4 = arith.constant 0 : index
    %c0_5 = arith.constant 0 : index
    %6 = vector.load %arg7[%c0_4, %c0_5] : memref<8x2048xf32, #tpu.memory_space<vmem>>, vector<8x2048xf32>
    tpu.vector_store %arg7[%c0_4, %c0_5], %5 {strides = array<i32>} : memref<8x2048xf32, #tpu.memory_space<vmem>>, vector<8x2048xf32>,
    %c0_6 = arith.constant 0 : index
    %c0_7 = arith.constant 0 : index
    %7 = vector.load %arg8[%c0_6, %c0_7] : memref<8x2048xf32, #tpu.memory_space<vmem>>, vector<8x2048xf32>
    %8 = arith.mulf %3, %3 : vector<8x2048xf32>
    %9 = arith.addf %7, %8 : vector<8x2048xf32>
    %c0_8 = arith.constant 0 : index
    %c0_9 = arith.constant 0 : index
    %10 = vector.load %arg8[%c0_8, %c0_9] : memref<8x2048xf32, #tpu.memory_space<vmem>>, vector<8x2048xf32>
    tpu.vector_store %arg8[%c0_8, %c0_9], %9 {strides = array<i32>} : memref<8x2048xf32, #tpu.memory_space<vmem>>, vector<8x2048xf32>,
    %c0_10 = arith.constant 0 : index
    %c0_11 = arith.constant 0 : index
    %11 = vector.load %arg2[%c0_10, %c0_11] : memref<8x2048xf32, #tpu.memory_space<vmem>>, vector<8x2048xf32>
    %c0_12 = arith.constant 0 : index
    %c0_13 = arith.constant 0 : index
    %12 = vector.load %arg7[%c0_12, %c0_13] : memref<8x2048xf32, #tpu.memory_space<vmem>>, vector<8x2048xf32>
    %13 = arith.addf %12, %11 : vector<8x2048xf32>
    %c0_14 = arith.constant 0 : index
    %c0_15 = arith.constant 0 : index
    %14 = vector.load %arg7[%c0_14, %c0_15] : memref<8x2048xf32, #tpu.memory_space<vmem>>, vector<8x2048xf32>
    tpu.vector_store %arg7[%c0_14, %c0_15], %13 {strides = array<i32>} : memref<8x2048xf32, #tpu.memory_space<vmem>>, vector<8x2048xf32>,
    %c0_16 = arith.constant 0 : index
    %c0_17 = arith.constant 0 : index
    %15 = vector.load %arg8[%c0_16, %c0_17] : memref<8x2048xf32, #tpu.memory_space<vmem>>, vector<8x2048xf32>
    %16 = arith.mulf %11, %11 : vector<8x2048xf32>
    %17 = arith.addf %15, %16 : vector<8x2048xf32>
    %c0_18 = arith.constant 0 : index
    %c0_19 = arith.constant 0 : index
    %18 = vector.load %arg8[%c0_18, %c0_19] : memref<8x2048xf32, #tpu.memory_space<vmem>>, vector<8x2048xf32>
    tpu.vector_store %arg8[%c0_18, %c0_19], %17 {strides = array<i32>} : memref<8x2048xf32, #tpu.memory_space<vmem>>, vector<8x2048xf32>,
    %c0_20 = arith.constant 0 : index
    %c0_21 = arith.constant 0 : index
    %19 = vector.load %arg3[%c0_20, %c0_21] : memref<8x2048xf32, #tpu.memory_space<vmem>>, vector<8x2048xf32>
    %c0_22 = arith.constant 0 : index
    %c0_23 = arith.constant 0 : index
    %20 = vector.load %arg7[%c0_22, %c0_23] : memref<8x2048xf32, #tpu.memory_space<vmem>>, vector<8x2048xf32>
    %21 = arith.addf %20, %19 : vector<8x2048xf32>
    %c0_24 = arith.constant 0 : index
    %c0_25 = arith.constant 0 : index
    %22 = vector.load %arg7[%c0_24, %c0_25] : memref<8x2048xf32, #tpu.memory_space<vmem>>, vector<8x2048xf32>
    tpu.vector_store %arg7[%c0_24, %c0_25], %21 {strides = array<i32>} : memref<8x2048xf32, #tpu.memory_space<vmem>>, vector<8x2048xf32>,
    %c0_26 = arith.constant 0 : index
    %c0_27 = arith.constant 0 : index
    %23 = vector.load %arg8[%c0_26, %c0_27] : memref<8x2048xf32, #tpu.memory_space<vmem>>, vector<8x2048xf32>
    %24 = arith.mulf %19, %19 : vector<8x2048xf32>
    %25 = arith.addf %23, %24 : vector<8x2048xf32>
    %c0_28 = arith.constant 0 : index
    %c0_29 = arith.constant 0 : index
    %26 = vector.load %arg8[%c0_28, %c0_29] : memref<8x2048xf32, #tpu.memory_space<vmem>>, vector<8x2048xf32>
    tpu.vector_store %arg8[%c0_28, %c0_29], %25 {strides = array<i32>} : memref<8x2048xf32, #tpu.memory_space<vmem>>, vector<8x2048xf32>,
    %c0_30 = arith.constant 0 : index
    %c0_31 = arith.constant 0 : index
    %27 = vector.load %arg4[%c0_30, %c0_31] : memref<8x2048xf32, #tpu.memory_space<vmem>>, vector<8x2048xf32>
    %c0_32 = arith.constant 0 : index
    %c0_33 = arith.constant 0 : index
    %28 = vector.load %arg7[%c0_32, %c0_33] : memref<8x2048xf32, #tpu.memory_space<vmem>>, vector<8x2048xf32>
    %29 = arith.addf %28, %27 : vector<8x2048xf32>
    %c0_34 = arith.constant 0 : index
    %c0_35 = arith.constant 0 : index
    %30 = vector.load %arg7[%c0_34, %c0_35] : memref<8x2048xf32, #tpu.memory_space<vmem>>, vector<8x2048xf32>
    tpu.vector_store %arg7[%c0_34, %c0_35], %29 {strides = array<i32>} : memref<8x2048xf32, #tpu.memory_space<vmem>>, vector<8x2048xf32>,
    %c0_36 = arith.constant 0 : index
    %c0_37 = arith.constant 0 : index
    %31 = vector.load %arg8[%c0_36, %c0_37] : memref<8x2048xf32, #tpu.memory_space<vmem>>, vector<8x2048xf32>
    %32 = arith.mulf %27, %27 : vector<8x2048xf32>
    %33 = arith.addf %31, %32 : vector<8x2048xf32>
    %c0_38 = arith.constant 0 : index
    %c0_39 = arith.constant 0 : index
    %34 = vector.load %arg8[%c0_38, %c0_39] : memref<8x2048xf32, #tpu.memory_space<vmem>>, vector<8x2048xf32>
    tpu.vector_store %arg8[%c0_38, %c0_39], %33 {strides = array<i32>} : memref<8x2048xf32, #tpu.memory_space<vmem>>, vector<8x2048xf32>,
    %c0_i32_40 = arith.constant 0 : i32
    %35 = arith.cmpi eq, %arg0, %c0_i32_40 : i32
    %36 = arith.extui %35 : i1 to i32
    %c0_i32_41 = arith.constant 0 : i32
    %37 = arith.cmpi ne, %36, %c0_i32_41 : i32
    scf.if %37 {
      %c0_42 = arith.constant 0 : index
      %c0_43 = arith.constant 0 : index
      %38 = vector.load %arg7[%c0_42, %c0_43] : memref<8x2048xf32, #tpu.memory_space<vmem>>, vector<8x2048xf32>
      %cst = arith.constant dense<0.000000e+00> : vector<8xf32>
      %39 = vector.multi_reduction <add>, %38, %cst [1] : vector<8x2048xf32> to vector<8xf32>
      %40 = vector.shape_cast %39 : vector<8xf32> to vector<8x1xf32>
      %c0_44 = arith.constant 0 : index
      %c0_45 = arith.constant 0 : index
      %41 = vector.load %arg5[%c0_44, %c0_45] : memref<8x1xf32, #tpu.memory_space<vmem>>, vector<8x1xf32>
      tpu.vector_store %arg5[%c0_44, %c0_45], %40 {strides = array<i32>} : memref<8x1xf32, #tpu.memory_space<vmem>>, vector<8x1xf32>,
      %c0_46 = arith.constant 0 : index
      %c0_47 = arith.constant 0 : index
      %42 = vector.load %arg8[%c0_46, %c0_47] : memref<8x2048xf32, #tpu.memory_space<vmem>>, vector<8x2048xf32>
      %cst_48 = arith.constant dense<0.000000e+00> : vector<8xf32>
      %43 = vector.multi_reduction <add>, %42, %cst_48 [1] : vector<8x2048xf32> to vector<8xf32>
      %44 = vector.shape_cast %43 : vector<8xf32> to vector<8x1xf32>
      %c0_49 = arith.constant 0 : index
      %c0_50 = arith.constant 0 : index
      %45 = vector.load %arg6[%c0_49, %c0_50] : memref<8x1xf32, #tpu.memory_space<vmem>>, vector<8x1xf32>
      tpu.vector_store %arg6[%c0_49, %c0_50], %44 {strides = array<i32>} : memref<8x1xf32, #tpu.memory_space<vmem>>, vector<8x1xf32>,
    } else {
    }
    return
  }
  func.func @transform_0(%arg0: i32) -> (i32, i32) {
    %c0_i32 = arith.constant 0 : i32
    %c0_i32_0 = arith.constant 0 : i32
    return %c0_i32, %arg0 : i32, i32
  }
  func.func @transform_1(%arg0: i32) -> (i32, i32) {
    %c0_i32 = arith.constant 0 : i32
    %c0_i32_0 = arith.constant 0 : i32
    return %c0_i32, %arg0 : i32, i32
  }
  func.func @transform_2(%arg0: i32) -> (i32, i32) {
    %c0_i32 = arith.constant 0 : i32
    %c0_i32_0 = arith.constant 0 : i32
    return %c0_i32, %arg0 : i32, i32
  }
  func.func @transform_3(%arg0: i32) -> (i32, i32) {
    %c0_i32 = arith.constant 0 : i32
    %c0_i32_0 = arith.constant 0 : i32
    return %c0_i32, %arg0 : i32, i32
  }
  func.func @transform_4(%arg0: i32) -> (i32, i32) {
    %c0_i32 = arith.constant 0 : i32
    %c0_i32_0 = arith.constant 0 : i32
    %c0_i32_1 = arith.constant 0 : i32
    return %c0_i32, %c0_i32_0 : i32, i32
  }
  func.func @transform_5(%arg0: i32) -> (i32, i32) {
    %c0_i32 = arith.constant 0 : i32
    %c0_i32_0 = arith.constant 0 : i32
    %c0_i32_1 = arith.constant 0 : i32
    return %c0_i32, %c0_i32_0 : i32, i32
  }
}

module attributes {stable_mosaic.version = 11 : i64} {
  func.func @_mm_kernel(%arg0: i32, %arg1: i32, %arg2: i32, %arg3: memref<3x32xbf16, #tpu.memory_space<vmem>>, %arg4: memref<32x2048xbf16, #tpu.memory_space<vmem>>, %arg5: memref<3x1xf32, #tpu.memory_space<vmem>>, %arg6: memref<3x2048xf32, #tpu.memory_space<vmem>>, %arg7: memref<3x2048xf32, #tpu.memory_space<vmem>>) attributes {dimension_semantics = [#tpu.dimension_semantics<parallel>, #tpu.dimension_semantics<parallel>, #tpu.dimension_semantics<arbitrary>], iteration_bounds = array<i64: 1, 4, 1>, scalar_prefetch = 0 : i64, scratch_operands = 1 : i64, tpu.core_type = #tpu.core_type<tc>, window_params = [{transform_indices = @transform_0, window_bounds = array<i64: 3, 32>}, {transform_indices = @transform_1, window_bounds = array<i64: 32, 2048>}, {transform_indices = @transform_2, window_bounds = array<i64: 3, 1>}, {transform_indices = @transform_3, window_bounds = array<i64: 3, 2048>}]} {
    %c0_i32 = arith.constant 0 : i32
    %0 = arith.cmpi eq, %arg2, %c0_i32 : i32
    %1 = arith.extui %0 : i1 to i32
    %c0_i32_0 = arith.constant 0 : i32
    %2 = arith.cmpi ne, %1, %c0_i32_0 : i32
    scf.if %2 {
      %cst_10 = arith.constant 0.000000e+00 : f32
      %12 = vector.broadcast %cst_10 : f32 to vector<3x2048xf32>
      %c0_11 = arith.constant 0 : index
      %c0_12 = arith.constant 0 : index
      %13 = vector.load %arg7[%c0_11, %c0_12] : memref<3x2048xf32, #tpu.memory_space<vmem>>, vector<3x2048xf32>
      tpu.vector_store %arg7[%c0_11, %c0_12], %12 {strides = array<i32>} : memref<3x2048xf32, #tpu.memory_space<vmem>>, vector<3x2048xf32>,
    } else {
    }
    %c0 = arith.constant 0 : index
    %c0_1 = arith.constant 0 : index
    %3 = vector.load %arg7[%c0, %c0_1] : memref<3x2048xf32, #tpu.memory_space<vmem>>, vector<3x2048xf32>
    %c0_2 = arith.constant 0 : index
    %c0_3 = arith.constant 0 : index
    %4 = vector.load %arg3[%c0_2, %c0_3] : memref<3x32xbf16, #tpu.memory_space<vmem>>, vector<3x32xbf16>
    %c0_4 = arith.constant 0 : index
    %c0_5 = arith.constant 0 : index
    %5 = vector.load %arg4[%c0_4, %c0_5] : memref<32x2048xbf16, #tpu.memory_space<vmem>>, vector<32x2048xbf16>
    %cst = arith.constant dense<0.000000e+00> : vector<3x2048xf32>
    %6 = tpu.matmul %4, %5, %cst {dimension_numbers = #tpu.dot_dimension_numbers<[1], [0], [0], [1], [0, 0, 1, 1], [], []>} : vector<3x32xbf16>, vector<32x2048xbf16>, vector<3x2048xf32> -> vector<3x2048xf32>
    %7 = arith.addf %3, %6 : vector<3x2048xf32>
    %c0_6 = arith.constant 0 : index
    %c0_7 = arith.constant 0 : index
    %8 = vector.load %arg7[%c0_6, %c0_7] : memref<3x2048xf32, #tpu.memory_space<vmem>>, vector<3x2048xf32>
    tpu.vector_store %arg7[%c0_6, %c0_7], %7 {strides = array<i32>} : memref<3x2048xf32, #tpu.memory_space<vmem>>, vector<3x2048xf32>,
    %c0_i32_8 = arith.constant 0 : i32
    %9 = arith.cmpi eq, %arg2, %c0_i32_8 : i32
    %10 = arith.extui %9 : i1 to i32
    %c0_i32_9 = arith.constant 0 : i32
    %11 = arith.cmpi ne, %10, %c0_i32_9 : i32
    scf.if %11 {
      %c0_10 = arith.constant 0 : index
      %c0_11 = arith.constant 0 : index
      %12 = vector.load %arg7[%c0_10, %c0_11] : memref<3x2048xf32, #tpu.memory_space<vmem>>, vector<3x2048xf32>
      %c0_12 = arith.constant 0 : index
      %c0_13 = arith.constant 0 : index
      %13 = vector.load %arg5[%c0_12, %c0_13] : memref<3x1xf32, #tpu.memory_space<vmem>>, vector<3x1xf32>
      %14 = vector.broadcast %13 : vector<3x1xf32> to vector<3x2048xf32>
      %15 = arith.addf %12, %14 : vector<3x2048xf32>
      %16 = math.tanh %15 : vector<3x2048xf32>
      %c0_14 = arith.constant 0 : index
      %c0_15 = arith.constant 0 : index
      %17 = vector.load %arg6[%c0_14, %c0_15] : memref<3x2048xf32, #tpu.memory_space<vmem>>, vector<3x2048xf32>
      tpu.vector_store %arg6[%c0_14, %c0_15], %16 {strides = array<i32>} : memref<3x2048xf32, #tpu.memory_space<vmem>>, vector<3x2048xf32>,
    } else {
    }
    return
  }
  func.func @transform_0(%arg0: i32, %arg1: i32, %arg2: i32) -> (i32, i32) {
    %c0_i32 = arith.constant 0 : i32
    return %arg0, %arg2 : i32, i32
  }
  func.func @transform_1(%arg0: i32, %arg1: i32, %arg2: i32) -> (i32, i32) {
    %c0_i32 = arith.constant 0 : i32
    return %arg2, %arg1 : i32, i32
  }
  func.func @transform_2(%arg0: i32, %arg1: i32, %arg2: i32) -> (i32, i32) {
    %c0_i32 = arith.constant 0 : i32
    %c0_i32_0 = arith.constant 0 : i32
    return %arg0, %c0_i32 : i32, i32
  }
  func.func @transform_3(%arg0: i32, %arg1: i32, %arg2: i32) -> (i32, i32) {
    %c0_i32 = arith.constant 0 : i32
    return %arg0, %arg1 : i32, i32
  }
}

</mosaic_0001>

<bundles_post_ra>
// kernel: decoder_forward.25
= control target key start
LH: loop header
LB: loop body
LE: loop exit
PB: predicated region body
PF: predicated region fallthrough
CT: control target
= control target key end

     0   :  { %8 = vsyncpa [#allocation4], 0  ;;  %s1376_s0 = inlined_call_operand.hbm [shape: f32[2,16], index: 0, kind: input, shape index: {}]   ;;  %s1377_s1 = inlined_call_operand.hbm [shape: f32[16,2048], index: 1, kind: input, shape index: {}]   ;;  %s1378_s2 = inlined_call_operand.hbm [shape: f32[1,2048], index: 2, kind: input, shape index: {}]   ;;  %s1379_s3 = inlined_call_operand.vmem [shape: f32[2,2048], index: 3, kind: output, shape index: {}]  }
   0x1   :  { %9 = vsyncpa [#allocation6], 0 }
   0x2   :  { %11 = vsyncpa [#allocation6 + $0x1], 0  ;;  %s1149_s12 = smov 0   ;;  %s1151_s13 = smov 0  }
   0x3   :  { %s1153_s14 = smov 0   ;;  %s1155_s15 = smov 0  }
   0x4   :  { %s1157_s16 = smov 0   ;;  %s1159_s17 = smov 0  }
   0x5 LB: > { %s32_s18 = sadd.s32 1, %s1115_s16  ;;  %s73_s19 = sadd.s32 1, %s1107_s14  ;;  %s1119_s17 = sphi %s1159_s17, %s17_s17   ;;  %s1115_s16 = sphi %s1157_s16, %s1402_s16   ;;  %s1111_s15 = sphi %s1155_s15, %s1401_s15   ;;  %s1107_s14 = sphi %s1153_s14, %s1400_s14   ;;  %s1103_s13 = sphi %s1151_s13, %s1399_s13   ;;  %s1099_s12 = sphi %s1149_s12, %s1398_s12  }
   0x6   : > { %p34_p0 = scmp.ge.s32.totalorder %s32_s18, 2  ;;  %p80_p1 = scmp.ne.s32.totalorder %s1107_s14, %s1103_s13 }
   0x7   : > { %p81_p2 = scmp.eq.s32.totalorder %s1119_s17, 0  ;;  %p921_p4 = scmp.lt.s32.totalorder %s1119_s17, 2 }
   0x8   : > { %s1404_s18 = smov (%p34_p0, %s32_s18), 0  ;;  %s178_s21 = sand.u32 1, %s1119_s17  }
   0x9   : > { %p82_p3 = por %p81_p2, %p80_p1  ;;  %s69_s20 = ssub.s32 %s1115_s16, %s1404_s18 }
   0xa   : > { %p71_p5 = scmp.eq.s32.totalorder %s69_s20, 0  ;;  %s180_s22 = sand.u32 1, %s1107_s14  }
   0xb   : > { %s883_s23 = sshll.u32 %s1115_s16, 10  ;;  %s865_s25 = sshll.u32 %s180_s22, 7 }
   0xc   : > { %s1193_s24 = scalar_select %p71_p5, %s1107_s14, %s73_s19  }
   0xd   : > { %s1200_s28 = scalar_lea.hbm %s1377_s1, %s883_s23  ;;  %p1202_p6 = pnand %p921_p4, %p82_p3 }
   0xe   : > { %s182_s30 = scalar_lea.vmem [#allocation5], %s865_s25  ;;  %s1208_s5 = scalar_lea.sflag [#allocation6], %s178_s21 }
   0xf   : > { %s1387_s29 = scalar_select %p1202_p6, 1, 0 }
  0x10   : > { %s192_s4 = sshll.u32 %s182_s30, 4  ;;  %s977_s6 = scalar_lea.hbm %s1200_s28, 2048  ;;  %s1206_s4 = int_to_ptr.vmem [resolvable:$true] %s192_s4 }
  0x11   : > { %p978_p7 = scmp.ne.s32.totalorder %s1200_s28, %s977_s6  ;;  %p1380_p8 = pneg %p1202_p6 }
  0x12   : > { %s982_s9 = scalar_lea.hbm %s1377_s1, 4096  ;;  %p983_p11 = scmp.lt.u32.totalorder %s1200_s28, %s1377_s1 }
  0x13   : > { %p980_p9 = pnand %p1380_p8, %p978_p7  ;;  %p984_p12 = scmp.lt.u32.totalorder %s982_s9, %s977_s6 }
  0x14   : > { %p986_p0 = scmp.lt.u32.totalorder %s977_s6, %s1200_s28 }
  0x15   : > { %p981_p10 = pneg %p980_p9  ;;  %p985_p13 = por %p984_p12, %p983_p11 }
  0x17   : > { %p987_p1 = por %p986_p0, %p985_p13 }
  0x19   : > { %p988_p2 = pnand %p987_p1, %p981_p10 }
  0x1b   : > { %991 = shalt.err (!%p988_p2)
}
  0x1c   : > { %s992_s19 = scalar_lea.vmem %s1206_s4, 2048  ;;  %s1121_s20 = smov [#allocation5]  }
  0x1d   : > { %p993_p3 = scmp.ne.s32.totalorder %s1206_s4, %s992_s19  ;;  %s997_s21 = sshll.u32 %s1121_s20, 4  ;;  %s998_s21 = int_to_ptr.vmem [resolvable:$false] %s997_s21 }
  0x1e   : > { %s999_s23 = scalar_lea.vmem %s998_s21, 4096  ;;  %p1000_p7 = scmp.lt.s32.totalorder %s1206_s4, %s998_s21 }
  0x1f   : > { %p995_p4 = pnand %p993_p3, %p1380_p8  ;;  %p1001_p9 = scmp.lt.s32.totalorder %s999_s23, %s992_s19 }
  0x21   : > { %p996_p5 = pneg %p995_p4  ;;  %p1002_p11 = por %p1001_p9, %p1000_p7 }
  0x23   : > { %p1003_p12 = pnand %p1002_p11, %p996_p5 }
  0x25   : > { %1006 = shalt.err (!%p1003_p12)
}
  0x26   : > { %s1122_s25 = smov 2048   ;;  %s1123_s26 = smov 1024  }
  0x27   : > { %s1124_s27 = smov 64   ;;  %s860_s30 = sadd.s32 4294967295, %s1119_s17  }
  0x28   : > { %916 = dma.hbm_to_vmem [thread:$0]  (!%p1202_p6), %s1200_s28, 2048, %s1206_s4, %s1208_s5, %s1122_s25, %s1123_s26, %s1124_s27  }
  0x29   : > { %p86_p10 = scmp.ne.s32.totalorder %s1103_s13, %s1099_s12  ;;  %p1241_p13 = scmp.eq.s32.totalorder %s860_s30, 0 }
  0x2a   : > { %p862_p0 = scmp.ge.s32.totalorder %s1119_s17, 1  ;;  %p151_p1 = scmp.lt.s32.totalorder %s1119_s17, 3 }
  0x2b   : > { %s1388_s6 = scalar_select %p1241_p13, 1, 0 }
  0x2c   : > { %p1249_p2 = por %p1241_p13, %p86_p10  ;;  %p1253_p3 = pnand %p862_p0, %p151_p1 }
  0x2d   : > { %s1125_s12 = smov [#allocation3]   ;;  %s868_s4 = sshll.u32 %s180_s22, 3 }
  0x2e   : > { %s1389_s7 = scalar_select %p1249_p2, 1, 0 }
  0x2f   : > { %s1390_s8 = scalar_select %p1253_p3, 1, 0 }
  0x30   : > { %s167_s28 = sshll.u32 %s1125_s12, 4  ;;  %p909_p4 = pneg %p1253_p3  ;;  %s168_s28 = int_to_ptr.vmem [resolvable:$true] %s167_s28 }
  0x31   : > { %s884_s9 = sshll.u32 %s1115_s16, 7  ;;  %s206_s10 = scalar_lea.vmem [#allocation7], %s868_s4 }
  0x32   : > { %s214_s11 = sshll.u32 %s206_s10, 4  ;;  %p1264_p5 = pnand %p909_p4, %p1241_p13  ;;  %s1273_s11 = int_to_ptr.vmem [resolvable:$true] %s214_s11 }
  0x33   : > { %s1271_s23 = scalar_lea.hbm %s1378_s2, %s884_s9  ;;  %s1007_s26 = scalar_lea.hbm %s1376_s0, 32 }
  0x34   : > { %p1008_p7 = scmp.ne.s32.totalorder %s1376_s0, %s1007_s26  ;;  %p1009_p9 = pneg %p1264_p5 }
  0x35   : > { %p1014_p10 = scmp.lt.u32.totalorder %s1007_s26, %s1376_s0 }
  0x36   : > { %p1010_p11 = pnand %p1009_p9, %p1008_p7 }
  0x38   : > { %p1011_p12 = pneg %p1010_p11 }
  0x3a   : > { %p1016_p0 = pnand %p1014_p10, %p1011_p12 }
  0x3c   : > { %1019 = shalt.err (!%p1016_p0)
}
  0x3d   : > { %s1020_s9 = scalar_lea.vmem %s168_s28, 32  ;;  %p1028_p2 = scmp.lt.s32.totalorder %s168_s28, %s168_s28 }
  0x3e   : > { %p1021_p1 = scmp.ne.s32.totalorder %s168_s28, %s1020_s9  ;;  %p1029_p13 = scmp.lt.s32.totalorder %s1020_s9, %s1020_s9 }
  0x40   : > { %p1023_p4 = pnand %p1021_p1, %p1009_p9  ;;  %p1030_p3 = por %p1029_p13, %p1028_p2 }
  0x42   : > { %p1024_p8 = pneg %p1023_p4 }
  0x44   : > { %p1031_p6 = pnand %p1030_p3, %p1024_p8 }
  0x46   : > { %1034 = shalt.err (!%p1031_p6)
}
  0x47   : > { %912 = dma.hbm_to_vmem [thread:$0]  (!%p1264_p5), %s1376_s0, 32, %s168_s28, [#allocation4]  }
  0x48   : > { %s1035_s22 = scalar_lea.hbm %s1271_s23, 128  ;;  %p1392_p9 = scmp.ne.s32.totalorder %s1387_s29, 0 }
  0x49   : > { %p1036_p7 = scmp.ne.s32.totalorder %s1271_s23, %s1035_s22  ;;  %s1040_s27 = scalar_lea.hbm %s1378_s2, 256 }
  0x4a   : > { %p1393_p11 = pneg %p1392_p9  ;;  %p1041_p6 = scmp.lt.u32.totalorder %s1271_s23, %s1378_s2 }
  0x4b   : > { %p1042_p8 = scmp.lt.u32.totalorder %s1040_s27, %s1035_s22  ;;  %p1044_p2 = scmp.lt.u32.totalorder %s1035_s22, %s1271_s23 }
  0x4c   : > { %p1038_p12 = pnand %p1036_p7, %p1393_p11 }
  0x4d   : > { %p1043_p13 = por %p1042_p8, %p1041_p6 }
  0x4e   : > { %p1039_p10 = pneg %p1038_p12 }
  0x4f   : > { %p1045_p3 = por %p1044_p2, %p1043_p13 }
  0x51   : > { %p1046_p0 = pnand %p1045_p3, %p1039_p10 }
  0x53   : > { %1049 = shalt.err (!%p1046_p0)
}
  0x54   : > { %s1050_s28 = scalar_lea.vmem %s1273_s11, 128  ;;  %p1394_p1 = pmov %p1393_p11 }
  0x55   : > { %p1051_p5 = scmp.ne.s32.totalorder %s1273_s11, %s1050_s28  ;;  %s1126_s4 = smov [#allocation7]  }
  0x56   : > { %s1055_s10 = sshll.u32 %s1126_s4, 4  ;;  %s1056_s10 = int_to_ptr.vmem [resolvable:$false] %s1055_s10 }
  0x57   : > { %p1053_p4 = pnand %p1051_p5, %p1394_p1  ;;  %s1057_s9 = scalar_lea.vmem %s1056_s10, 256 }
  0x58   : > { %p1058_p11 = scmp.lt.s32.totalorder %s1273_s11, %s1056_s10  ;;  %p1059_p12 = scmp.lt.s32.totalorder %s1057_s9, %s1050_s28 }
  0x59   : > { %p1054_p7 = pneg %p1053_p4 }
  0x5a   : > { %p1060_p6 = por %p1059_p12, %p1058_p11 }
  0x5c   : > { %p1061_p8 = pnand %p1060_p6, %p1054_p7 }
  0x5e   : > { %1064 = shalt.err (!%p1061_p8)
}
  0x5f   : > { %919 = dma.hbm_to_vmem [thread:$0]  (!%p1392_p9), %s1271_s23, 128, %s1273_s11, %s1208_s5  }
  0x60   : > { %p1395_p10 = scmp.ne.s32.totalorder %s1390_s8, 0 }
  0x61   : > { %p1396_p13 = scmp.ne.s32.totalorder (!%p1395_p10), %s1388_s6, 0 }
  0x62   : > { %223 = sbr.rel (%p1395_p10) target bundleno = 346 (0x15a), region = 32 }
  0x69   : > { %1090 = dma.done.wait (%p1396_p13), [#allocation4], 32  }
  0x6a   : > { %1092 = vsyncadd (%p1396_p13), [#allocation4], 4294967264  ;;  %s229_s20 = sand.u32 1, %s860_s30   ;;  %s231_s29 = sand.u32 1, %s1103_s13  }
  0x6b   : > { %s873_s21 = sshll.u32 %s231_s29, 7  ;;  %s230_s22 = scalar_lea.sflag [#allocation6], %s229_s20 }
  0x6c   : > { %s1326_s5 = scalar_lea.vmem [#allocation5], %s873_s21  ;;  %p1397_p9 = scmp.ne.s32.totalorder %s1389_s7, 0 }
  0x6e   : > { %1094 = dma.done.wait (%p1397_p9), %s230_s22, 2176  }
  0x6f   : > { %1096 = vsyncadd (%p1397_p9), %s230_s22, 4294965120  ;;  %v1127_v0 = vmov 0.0   ;;  %v297_v1 = vld [vmem:[%s1326_s5 + $0x8] sm:$0xff]  ;;  %v299_v3 = vld [vmem:[%s1326_s5 + $0x18] sm:$0xff]  ;;  %vm312_vm0 = vcmask 130048   ;;  %v613_v26 = vlaneseq  ;;  %s874_s30 = sshll.u32 %s231_s29, 3 }
  0x70   : > { %380 = vmatprep.mubr.f32.mxu0 %v1127_v0  ;;  %451 = vmatprep.mubr.f32.mxu1 %v1127_v0  ;;  %v305_v2 = vld [vmem:[%s1326_s5 + $0x48] sm:$0xff]  ;;  %v307_v5 = vld [vmem:[%s1326_s5 + $0x58] sm:$0xff]  ;;  %v296_v6 = vld [vmem:[%s1326_s5] sm:$0xff]  ;;  %v1128_v28 = vmov 1983009808   ;;  %s242_s6 = scalar_lea.vmem [#allocation7], %s874_s30 }
  0x71   : > { %v885_v4 = vpack.c.bf16 %v305_v2, %v297_v1  ;;  %v304_v7 = vld [vmem:[%s1326_s5 + $0x40] sm:$0xff]  ;;  %v889_v8 = vpack.c.bf16 %v307_v5, %v299_v3  ;;  %v298_v10 = vld [vmem:[%s1326_s5 + $0x10] sm:$0xff]  ;;  %v295_v12 = vld [vmem:[#allocation3] sm:$0x3]  ;;  %v614_v27 = vshrl.u32 %v613_v26, 7  ;;  %v611_v29 = vunpack.c.l.s4 %v1128_v28  ;;  %s875_s7 = sshll.u32 %s1111_s15, 3 }
  0x72   : > { %v887_v9 = vpack.c.bf16 %v304_v7, %v296_v6  ;;  %v306_v11 = vld [vmem:[%s1326_s5 + $0x50] sm:$0xff]  ;;  %v301_v14 = vld [vmem:[%s1326_s5 + $0x28] sm:$0xff]  ;;  %v303_v16 = vld [vmem:[%s1326_s5 + $0x38] sm:$0xff]  ;;  %p280_p2 = scmp.lt.s32.totalorder %s875_s7, 15 }
  0x73   : > { %886 = vmatprep.subr.bf16.mxu0 %v885_v4  ;;  %v891_v13 = vpack.c.bf16 %v306_v11, %v298_v10  ;;  %v309_v15 = vld [vmem:[%s1326_s5 + $0x68] sm:$0xff]  ;;  %890 = vmatprep.subr.bf16.mxu1 %v889_v8  ;;  %v311_v18 = vld [vmem:[%s1326_s5 + $0x78] sm:$0xff]  ;;  %v300_v19 = vld [vmem:[%s1326_s5 + $0x20] sm:$0xff]  ;;  %v657_v30 = vsub.s32 0, %v614_v27  ;;  %v661_v31 = vsub.s32 1, %v614_v27  ;;  %v665_v32 = vsub.s32 2, %v614_v27 }
  0x74   : > { %888 = vmatpush1.bf16.msra.mxu0 %v887_v9  ;;  %v893_v17 = vpack.c.bf16 %v309_v15, %v301_v14  ;;  %v308_v20 = vld [vmem:[%s1326_s5 + $0x60] sm:$0xff]  ;;  %v897_v21 = vpack.c.bf16 %v311_v18, %v303_v16  ;;  %v302_v23 = vld [vmem:[%s1326_s5 + $0x30] sm:$0xff]  ;;  %v669_v33 = vsub.s32 3, %v614_v27  ;;  %v612_v35 = vunpack.c.0.s8 %v611_v29  ;;  %s1406_s7 = smov (!%p280_p2, %s875_s7), 15 }
  0x75   : > { %892 = vmatpush1.bf16.msra.mxu1 %v891_v13  ;;  %v895_v22 = vpack.c.bf16 %v308_v20, %v300_v19  ;;  %v310_v24 = vld [vmem:[%s1326_s5 + $0x70] sm:$0xff]  ;;  %v653_v34 = vld [vmem:[%s242_s6] sm:$0xff]  ;;  %v673_v40 = vsub.s32 4, %v614_v27  ;;  %v677_v41 = vsub.s32 5, %v614_v27  ;;  %v681_v42 = vsub.s32 6, %v614_v27  ;;  %s876_s15 = sshll.u32 %s1406_s7, 1 }
  0x76   : > { %894 = vmatprep.subr.bf16.mxu0 %v893_v17  ;;  %v899_v25 = vpack.c.bf16 %v310_v24, %v302_v23  ;;  %898 = vmatprep.subr.bf16.mxu1 %v897_v21  ;;  %v658_v36 = vrot.slane %v653_v34, %v657_v30  ;;  %v662_v37 = vrot.slane %v653_v34, %v661_v31  ;;  %v685_v43 = vsub.s32 7, %v614_v27  ;;  %s285_s23 = scalar_lea.vmem %s1379_s3, %s876_s15 }
  0x77   : > { %877 = vmatmul.mubr.msk.f32.vlgmr.msra.gmra.mrb[0].mxu0 %vm312_vm0, %v295_v12  ;;  %v666_v38 = vrot.slane %v653_v34, %v665_v32  ;;  %v670_v39 = vrot.slane %v653_v34, %v669_v33  ;;  %v615_v44 = vsub.s32 %v612_v35, %v614_v27  ;;  %v674_v47 = vrot.slane %v653_v34, %v673_v40 }
  0x78   : > { %878 = vmatmul.mubr.msk.f32.vlgmr.msra.gmra.mrb[0].mxu1 %vm312_vm0, %v295_v12  ;;  %896 = vmatpush1.bf16.msra.mxu0 %v895_v22  ;;  %v687_v45 = vcombine.low %v658_v36, %v662_v37  ;;  %v678_v48 = vrot.slane %v653_v34, %v677_v41  ;;  %v682_v49 = vrot.slane %v653_v34, %v681_v42 }
  0x79   : > { %900 = vmatpush1.bf16.msra.mxu1 %v899_v25  ;;  %522 = vmatprep.mubr.f32.mxu0 %v1127_v0  ;;  %v688_v46 = vcombine.low %v666_v38, %v670_v39  ;;  %v686_v50 = vrot.slane %v653_v34, %v685_v43 }
  0x7a   : > { %593 = vmatprep.mubr.f32.mxu1 %v1127_v0  ;;  %v695_v54 = vrot.slane %v687_v45, %v615_v44  ;;  %v704_v56 = vcombine.low %v674_v47, %v678_v48 }
  0x7b   : > { %879 = vmatmul.mubr.msk.f32.vlgmr.msra.gmra.mrb[2].mxu0 %vm312_vm0, %v295_v12  ;;  %v702_v55 = vrot.slane %v688_v46, %v615_v44  ;;  %v705_v57 = vcombine.low %v682_v49, %v686_v50 }
  0x7c   : > { %880 = vmatmul.mubr.msk.f32.vlgmr.msra.gmra.mrb[2].mxu1 %vm312_vm0, %v295_v12  ;;  %v712_v3 = vrot.slane %v704_v56, %v615_v44 }
  0x7d   : > { %v703_v0 = vcombine.low %v695_v54, %v702_v55  ;;  %v719_v4 = vrot.slane %v705_v57, %v615_v44 }
  0x7f   : > { %v720_v12 = vcombine.low %v712_v3, %v719_v4 }
 0x14a   : > { %v382_v51 = vpop.f32.mrb[0].mxu0 }
 0x14b   : > { %v453_v52 = vpop.f32.mrb[0].mxu1  ;;  %v384_v53 = vpop.f32.mrb[1].mxu0 }
 0x14c   : > { %v608_v58 = vcombine.low %v382_v51, %v384_v53  ;;  %v455_v59 = vpop.f32.mrb[1].mxu1 }
 0x14d   : > { %v609_v60 = vcombine.low %v453_v52, %v455_v59 }
 0x14e   : > { %v616_v61 = vrot.slane %v608_v58, %v615_v44  ;;  %v524_v62 = vpop.f32.mrb[2].mxu0 }
 0x14f   : > { %v623_v63 = vrot.slane %v609_v60, %v615_v44  ;;  %v595_v1 = vpop.f32.mrb[2].mxu1  ;;  %v526_v2 = vpop.f32.mrb[3].mxu0 }
 0x150   : > { %v625_v5 = vcombine.low %v524_v62, %v526_v2  ;;  %v597_v6 = vpop.f32.mrb[3].mxu1 }
 0x151   : > { %v624_v7 = vcombine.low %v616_v61, %v623_v63  ;;  %v626_v8 = vcombine.low %v595_v1, %v597_v6 }
 0x152   : > { %v633_v9 = vrot.slane %v625_v5, %v615_v44 }
 0x153   : > { %v723_v10 = vadd.f32 %v703_v0, %v624_v7  ;;  %v640_v11 = vrot.slane %v626_v8, %v615_v44 }
 0x155   : > { %725 = vst [vmem:[%s285_s23] sm:$0xff] %v723_v10  ;;  %v641_v13 = vcombine.low %v633_v9, %v640_v11 }
 0x157   : > { %v724_v14 = vadd.f32 %v720_v12, %v641_v13 }
 0x159   : > { %726 = vst [vmem:[%s285_s23 + $0x8] sm:$0xff] %v724_v14 }
 0x15a PF: > { %s17_s17 = sadd.s32 1, %s1119_s17   ;;  %s1398_s12 = smov %s1103_s13 }
 0x15b   : > { %p14_p3 = scmp.ge.s32.totalorder %s17_s17, 4   ;;  %s1399_s13 = smov %s1107_s14 }
 0x15c   : > { %s1400_s14 = smov %s1193_s24  ;;  %s1401_s15 = smov %s1115_s16 }
 0x15d   : > { %s1402_s16 = smov %s1404_s18  ;;  %16 = sbr.rel (!%p14_p3) target bundleno = 5 (0x5), region = 97 }
 0x164   :  { %757 = vsyncpa [#allocation4], 1 }
 0x165   :  { %759 = vsyncpa [#allocation4 + $0x1], 1 }
 0x166   :  { %760 = vsyncpa [#allocation6], 1 }
 0x167   :  { %762 = vsyncpa [#allocation6 + $0x1], 1 }

// kernel: decoder_forward.27
= control target key start
LH: loop header
LB: loop body
LE: loop exit
PB: predicated region body
PF: predicated region fallthrough
CT: control target
= control target key end

     0   :  { %vm16_vm0 = vcmask 261120   ;;  %v740_v48 = vmov 0.0   ;;  %s948_s1 = inlined_call_operand.vmem [shape: bf16[512,32], index: 1, kind: input, shape index: {}]   ;;  %s949_s0 = inlined_call_operand.vmem [shape: bf16[64,512], index: 0, kind: input, shape index: {}]   ;;  %s950_s2 = inlined_call_operand.vmem [shape: f32[64,32], index: 2, kind: output, shape index: {}]  }
   0x1   :  { %v684_v0 = vld [vmem:[%s948_s1 + $0x40] sm:$0xff]   ;;  %v688_v4 = vld [vmem:[%s948_s1 + $0x48] sm:$0xff]   ;;  %v692_v8 = vld [vmem:[%s948_s1 + $0x50] sm:$0xff]   ;;  %17 = vst.msk [vmem:[#allocation2] sm:$0xff] %vm16_vm0, %v740_v48 }
   0x2   :  { %v685_v1 = vld [vmem:[%s948_s1 + $0xc0] sm:$0xff]   ;;  %603 = vmatprep.subr.bf16.mxu0 %v684_v0  ;;  %v689_v5 = vld [vmem:[%s948_s1 + $0xc8] sm:$0xff]   ;;  %v693_v9 = vld [vmem:[%s948_s1 + $0xd0] sm:$0xff]   ;;  %18 = vst.msk [vmem:[#allocation2 + $0x8] sm:$0xff] %vm16_vm0, %v740_v48 }
   0x3   :  { %v686_v2 = vld [vmem:[%s948_s1] sm:$0xff]   ;;  %643 = vmatprep.subr.bf16.mxu1 %v685_v1  ;;  %v690_v6 = vld [vmem:[%s948_s1 + $0x8] sm:$0xff]   ;;  %v694_v10 = vld [vmem:[%s948_s1 + $0x10] sm:$0xff]   ;;  %19 = vst.msk [vmem:[#allocation2 + $0x10] sm:$0xff] %vm16_vm0, %v740_v48 }
   0x4   :  { %v687_v3 = vld [vmem:[%s948_s1 + $0x80] sm:$0xff]   ;;  %604 = vmatpush3.bf16.msra.mxu0 %v686_v2  ;;  %v691_v7 = vld [vmem:[%s948_s1 + $0x88] sm:$0xff]   ;;  %v695_v11 = vld [vmem:[%s948_s1 + $0x90] sm:$0xff]   ;;  %20 = vst.msk [vmem:[#allocation2 + $0x18] sm:$0xff] %vm16_vm0, %v740_v48 }
   0x5   :  { %644 = vmatpush3.bf16.msra.mxu1 %v687_v3  ;;  %605 = vmatprep.subr.bf16.mxu0 %v688_v4  ;;  %v696_v12 = vld [vmem:[%s948_s1 + $0x58] sm:$0xff]   ;;  %v700_v16 = vld [vmem:[%s948_s1 + $0x60] sm:$0xff]   ;;  %v704_v20 = vld [vmem:[%s948_s1 + $0x68] sm:$0xff]   ;;  %21 = vst.msk [vmem:[#allocation2 + $0x20] sm:$0xff] %vm16_vm0, %v740_v48 }
   0x6   :  { %645 = vmatprep.subr.bf16.mxu1 %v689_v5  ;;  %v697_v13 = vld [vmem:[%s948_s1 + $0xd8] sm:$0xff]   ;;  %v701_v17 = vld [vmem:[%s948_s1 + $0xe0] sm:$0xff]   ;;  %v705_v21 = vld [vmem:[%s948_s1 + $0xe8] sm:$0xff]   ;;  %22 = vst.msk [vmem:[#allocation2 + $0x28] sm:$0xff] %vm16_vm0, %v740_v48 }
   0x7   :  { %v698_v14 = vld [vmem:[%s948_s1 + $0x18] sm:$0xff]   ;;  %v702_v18 = vld [vmem:[%s948_s1 + $0x20] sm:$0xff]   ;;  %v706_v22 = vld [vmem:[%s948_s1 + $0x28] sm:$0xff]   ;;  %23 = vst.msk [vmem:[#allocation2 + $0x30] sm:$0xff] %vm16_vm0, %v740_v48 }
   0x8   :  { %606 = vmatpush3.bf16.msra.mxu0 %v690_v6  ;;  %v699_v15 = vld [vmem:[%s948_s1 + $0x98] sm:$0xff]   ;;  %v703_v19 = vld [vmem:[%s948_s1 + $0xa0] sm:$0xff]   ;;  %v707_v23 = vld [vmem:[%s948_s1 + $0xa8] sm:$0xff]   ;;  %24 = vst.msk [vmem:[#allocation2 + $0x38] sm:$0xff] %vm16_vm0, %v740_v48 }
   0x9   :  { %646 = vmatpush3.bf16.msra.mxu1 %v691_v7  ;;  %607 = vmatprep.subr.bf16.mxu0 %v692_v8  ;;  %v708_v24 = vld [vmem:[%s948_s1 + $0x70] sm:$0xff]   ;;  %v712_v28 = vld [vmem:[%s948_s1 + $0x78] sm:$0xff]   ;;  %v25_v58 = vld [vmem:[#allocation2] sm:$0xff] }
   0xa   :  { %647 = vmatprep.subr.bf16.mxu1 %v693_v9  ;;  %v709_v25 = vld [vmem:[%s948_s1 + $0xf0] sm:$0xff]   ;;  %v713_v29 = vld [vmem:[%s948_s1 + $0xf8] sm:$0xff]   ;;  %v26_v63 = vld [vmem:[#allocation2 + $0x8] sm:$0xff] }
   0xb   :  { %v710_v26 = vld [vmem:[%s948_s1 + $0x30] sm:$0xff]   ;;  %v714_v30 = vld [vmem:[%s948_s1 + $0x38] sm:$0xff]  }
   0xc   :  { %608 = vmatpush3.bf16.msra.mxu0 %v694_v10  ;;  %v711_v27 = vld [vmem:[%s948_s1 + $0xb0] sm:$0xff]   ;;  %v715_v31 = vld [vmem:[%s948_s1 + $0xb8] sm:$0xff]  }
   0xd   :  { %648 = vmatpush3.bf16.msra.mxu1 %v695_v11  ;;  %609 = vmatprep.subr.bf16.mxu0 %v696_v12  ;;  %v716_v32 = vld [vmem:[%s949_s0] ss:$16 sps:$4 sm:$0xff]   ;;  %v718_v33 = vld [vmem:[%s949_s0 + $0x4] ss:$16 sps:$4 sm:$0xff]   ;;  %v719_v34 = vld [vmem:[%s949_s0 + $0x8] ss:$16 sps:$4 sm:$0xff]  }
   0xe   :  { %649 = vmatprep.subr.bf16.mxu1 %v697_v13  ;;  %v721_v35 = vld [vmem:[%s949_s0 + $0xc] ss:$16 sps:$4 sm:$0xff]   ;;  %417 = vmatprep.mubr.bf16.mxu0 %v718_v33  ;;  %v722_v36 = vld [vmem:[%s949_s0 + $0x24] ss:$16 sps:$4 sm:$0xff]   ;;  %v726_v38 = vld [vmem:[%s949_s0 + $0x20] ss:$16 sps:$4 sm:$0xff]  }
   0xf   :  { %482 = vmatprep.mubr.bf16.mxu1 %v721_v35  ;;  %v724_v37 = vld [vmem:[%s949_s0 + $0x2c] ss:$16 sps:$4 sm:$0xff]   ;;  %v727_v39 = vld [vmem:[%s949_s0 + $0x28] ss:$16 sps:$4 sm:$0xff]   ;;  %v728_v40 = vld [vmem:[%s949_s0 + $0x44] ss:$16 sps:$4 sm:$0xff]  }
  0x10   :  { %610 = vmatpush3.bf16.msra.mxu0 %v698_v14  ;;  %v730_v41 = vld [vmem:[%s949_s0 + $0x4c] ss:$16 sps:$4 sm:$0xff]   ;;  %v732_v42 = vld [vmem:[%s949_s0 + $0x40] ss:$16 sps:$4 sm:$0xff]   ;;  %v733_v43 = vld [vmem:[%s949_s0 + $0x48] ss:$16 sps:$4 sm:$0xff]  }
  0x11   :  { %650 = vmatpush3.bf16.msra.mxu1 %v699_v15  ;;  %611 = vmatprep.subr.bf16.mxu0 %v700_v16  ;;  %v734_v44 = vld [vmem:[%s949_s0 + $0x64] ss:$16 sps:$4 sm:$0xff]   ;;  %v736_v45 = vld [vmem:[%s949_s0 + $0x6c] ss:$16 sps:$4 sm:$0xff]   ;;  %v738_v46 = vld [vmem:[%s949_s0 + $0x60] ss:$16 sps:$4 sm:$0xff]  }
  0x12   :  { %651 = vmatprep.subr.bf16.mxu1 %v701_v17  ;;  %v739_v47 = vld [vmem:[%s949_s0 + $0x68] ss:$16 sps:$4 sm:$0xff]   ;;  %v27_v12 = vld [vmem:[#allocation2 + $0x10] sm:$0xff] }
  0x13   :  { %v28_v17 = vld [vmem:[#allocation2 + $0x18] sm:$0xff] }
  0x14   :  { %612 = vmatpush3.bf16.msra.mxu0 %v702_v18 }
  0x15   :  { %652 = vmatpush3.bf16.msra.mxu1 %v703_v19  ;;  %613 = vmatprep.subr.bf16.mxu0 %v704_v20 }
  0x16   :  { %653 = vmatprep.subr.bf16.mxu1 %v705_v21 }
  0x18   :  { %614 = vmatpush3.bf16.msra.mxu0 %v706_v22 }
  0x19   :  { %654 = vmatpush3.bf16.msra.mxu1 %v707_v23  ;;  %615 = vmatprep.subr.bf16.mxu0 %v708_v24 }
  0x1a   :  { %655 = vmatprep.subr.bf16.mxu1 %v709_v25 }
  0x1c   :  { %616 = vmatpush3.bf16.msra.mxu0 %v710_v26 }
  0x1d   :  { %656 = vmatpush3.bf16.msra.mxu1 %v711_v27  ;;  %617 = vmatprep.subr.bf16.mxu0 %v712_v28 }
  0x1e   :  { %657 = vmatprep.subr.bf16.mxu1 %v713_v29 }
  0x20   :  { %618 = vmatpush3.bf16.msra.mxu0 %v714_v30 }
  0x21   :  { %658 = vmatpush3.bf16.msra.mxu1 %v715_v31 }
  0x23   :  { %418 = vmatmul.mubr.bf16.vlgmr.msra.gmra.mrb[0].mxu0 %v716_v32  ;;  %v29_v32 = vld [vmem:[#allocation2 + $0x20] sm:$0xff] }
  0x24   :  { %483 = vmatmul.mubr.bf16.vlgmr.msra.gmra.mrb[0].mxu1 %v719_v34  ;;  %425 = vmatprep.mubr.bf16.mxu0 %v722_v36 }
  0x25   :  { %490 = vmatprep.mubr.bf16.mxu1 %v724_v37  ;;  %v30_v37 = vld [vmem:[#allocation2 + $0x28] sm:$0xff] }
  0x2b   :  { %426 = vmatmul.mubr.bf16.gmra.mrb[4].mxu0 %v726_v38 }
  0x2c   :  { %491 = vmatmul.mubr.bf16.gmra.mrb[4].mxu1 %v727_v39  ;;  %433 = vmatprep.mubr.bf16.mxu0 %v728_v40 }
  0x2d   :  { %498 = vmatprep.mubr.bf16.mxu1 %v730_v41 }
  0x33   :  { %434 = vmatmul.mubr.bf16.gmra.mrb[8].mxu0 %v732_v42 }
  0x34   :  { %499 = vmatmul.mubr.bf16.gmra.mrb[8].mxu1 %v733_v43  ;;  %441 = vmatprep.mubr.bf16.mxu0 %v734_v44 }
  0x35   :  { %506 = vmatprep.mubr.bf16.mxu1 %v736_v45 }
  0x3b   :  { %442 = vmatmul.mubr.bf16.gmra.mrb[12].mxu0 %v738_v46 }
  0x3c   :  { %507 = vmatmul.mubr.bf16.gmra.mrb[12].mxu1 %v739_v47 }
  0xf6   :  { %v619_v49 = vpop.f32.mrb[0].mxu0 }
  0xf7   :  { %v659_v50 = vpop.f32.mrb[0].mxu1  ;;  %v620_v51 = vpop.f32.mrb[1].mxu0 }
  0xf8   :  { %v621_v52 = vadd.f32 %v620_v51, %v619_v49  ;;  %v660_v53 = vpop.f32.mrb[1].mxu1  ;;  %v622_v54 = vpop.f32.mrb[2].mxu0 }
  0xf9   :  { %v661_v55 = vadd.f32 %v660_v53, %v659_v50  ;;  %v662_v56 = vpop.f32.mrb[2].mxu1  ;;  %v623_v57 = vpop.f32.mrb[3].mxu0 }
  0xfa   :  { %v624_v59 = vadd.f32 %v623_v57, %v622_v54  ;;  %v663_v60 = vpop.f32.mrb[3].mxu1  ;;  %v32_v57 = vld [vmem:[#allocation2 + $0x38] sm:$0xff] }
  0xfb   :  { %v485_v61 = vadd.f32 %v661_v55, %v621_v52  ;;  %v664_v62 = vadd.f32 %v663_v60, %v662_v56  ;;  %v31_v52 = vld [vmem:[#allocation2 + $0x30] sm:$0xff] }
  0xfd   :  { %v515_v0 = vadd.f32 %v485_v61, %v25_v58  ;;  %v488_v1 = vadd.f32 %v664_v62, %v624_v59 }
  0xfe   :  { %v625_v2 = vpop.f32.mrb[4].mxu0 }
  0xff   :  { %524 = vst.msk [vmem:[#allocation2] sm:$0xff] %vm16_vm0, %v515_v0  ;;  %v516_v3 = vadd.f32 %v488_v1, %v26_v63  ;;  %v665_v4 = vpop.f32.mrb[4].mxu1  ;;  %v626_v5 = vpop.f32.mrb[5].mxu0 }
 0x100   :  { %v627_v6 = vadd.f32 %v626_v5, %v625_v2  ;;  %v666_v7 = vpop.f32.mrb[5].mxu1  ;;  %v628_v8 = vpop.f32.mrb[6].mxu0 }
 0x101   :  { %525 = vst.msk [vmem:[#allocation2 + $0x8] sm:$0xff] %vm16_vm0, %v516_v3  ;;  %v667_v9 = vadd.f32 %v666_v7, %v665_v4  ;;  %v668_v10 = vpop.f32.mrb[6].mxu1  ;;  %v629_v11 = vpop.f32.mrb[7].mxu0 }
 0x102   :  { %v630_v13 = vadd.f32 %v629_v11, %v628_v8  ;;  %v669_v14 = vpop.f32.mrb[7].mxu1 }
 0x103   :  { %v493_v15 = vadd.f32 %v667_v9, %v627_v6  ;;  %v670_v16 = vadd.f32 %v669_v14, %v668_v10 }
 0x105   :  { %v517_v18 = vadd.f32 %v493_v15, %v27_v12  ;;  %v496_v19 = vadd.f32 %v670_v16, %v630_v13 }
 0x106   :  { %v535_v20 = vld [vmem:[#allocation2] sm:$0xff]  ;;  %v631_v21 = vpop.f32.mrb[8].mxu0 }
 0x107   :  { %543 = vst.msk [vmem:[%s950_s2] sm:$0xff] %vm16_vm0, %v535_v20  ;;  %526 = vst.msk [vmem:[#allocation2 + $0x10] sm:$0xff] %vm16_vm0, %v517_v18  ;;  %v518_v22 = vadd.f32 %v496_v19, %v28_v17  ;;  %v671_v23 = vpop.f32.mrb[8].mxu1  ;;  %v632_v24 = vpop.f32.mrb[9].mxu0 }
 0x108   :  { %v536_v25 = vld [vmem:[#allocation2 + $0x8] sm:$0xff]  ;;  %v633_v26 = vadd.f32 %v632_v24, %v631_v21  ;;  %v672_v27 = vpop.f32.mrb[9].mxu1  ;;  %v634_v28 = vpop.f32.mrb[10].mxu0 }
 0x109   :  { %544 = vst.msk [vmem:[%s950_s2 + $0x8] sm:$0xff] %vm16_vm0, %v536_v25  ;;  %527 = vst.msk [vmem:[#allocation2 + $0x18] sm:$0xff] %vm16_vm0, %v518_v22  ;;  %v673_v29 = vadd.f32 %v672_v27, %v671_v23  ;;  %v674_v30 = vpop.f32.mrb[10].mxu1  ;;  %v635_v31 = vpop.f32.mrb[11].mxu0 }
 0x10a   :  { %v636_v33 = vadd.f32 %v635_v31, %v634_v28  ;;  %v675_v34 = vpop.f32.mrb[11].mxu1 }
 0x10b   :  { %v501_v35 = vadd.f32 %v673_v29, %v633_v26  ;;  %v676_v36 = vadd.f32 %v675_v34, %v674_v30 }
 0x10d   :  { %v519_v38 = vadd.f32 %v501_v35, %v29_v32  ;;  %v504_v39 = vadd.f32 %v676_v36, %v636_v33 }
 0x10e   :  { %v537_v40 = vld [vmem:[#allocation2 + $0x10] sm:$0xff]  ;;  %v637_v41 = vpop.f32.mrb[12].mxu0 }
 0x10f   :  { %545 = vst.msk [vmem:[%s950_s2 + $0x10] sm:$0xff] %vm16_vm0, %v537_v40  ;;  %528 = vst.msk [vmem:[#allocation2 + $0x20] sm:$0xff] %vm16_vm0, %v519_v38  ;;  %v520_v42 = vadd.f32 %v504_v39, %v30_v37  ;;  %v677_v43 = vpop.f32.mrb[12].mxu1  ;;  %v638_v44 = vpop.f32.mrb[13].mxu0 }
 0x110   :  { %v538_v45 = vld [vmem:[#allocation2 + $0x18] sm:$0xff]  ;;  %v639_v46 = vadd.f32 %v638_v44, %v637_v41  ;;  %v678_v47 = vpop.f32.mrb[13].mxu1  ;;  %v640_v48 = vpop.f32.mrb[14].mxu0 }
 0x111   :  { %546 = vst.msk [vmem:[%s950_s2 + $0x18] sm:$0xff] %vm16_vm0, %v538_v45  ;;  %529 = vst.msk [vmem:[#allocation2 + $0x28] sm:$0xff] %vm16_vm0, %v520_v42  ;;  %v679_v49 = vadd.f32 %v678_v47, %v677_v43  ;;  %v680_v50 = vpop.f32.mrb[14].mxu1  ;;  %v641_v51 = vpop.f32.mrb[15].mxu0 }
 0x112   :  { %v642_v53 = vadd.f32 %v641_v51, %v640_v48  ;;  %v681_v54 = vpop.f32.mrb[15].mxu1 }
 0x113   :  { %v509_v55 = vadd.f32 %v679_v49, %v639_v46  ;;  %v682_v56 = vadd.f32 %v681_v54, %v680_v50 }
 0x115   :  { %v521_v58 = vadd.f32 %v509_v55, %v31_v52  ;;  %v512_v59 = vadd.f32 %v682_v56, %v642_v53 }
 0x116   :  { %v539_v60 = vld [vmem:[#allocation2 + $0x20] sm:$0xff] }
 0x117   :  { %547 = vst.msk [vmem:[%s950_s2 + $0x20] sm:$0xff] %vm16_vm0, %v539_v60  ;;  %530 = vst.msk [vmem:[#allocation2 + $0x30] sm:$0xff] %vm16_vm0, %v521_v58  ;;  %v522_v61 = vadd.f32 %v512_v59, %v32_v57 }
 0x118   :  { %v540_v62 = vld [vmem:[#allocation2 + $0x28] sm:$0xff] }
 0x119   :  { %548 = vst.msk [vmem:[%s950_s2 + $0x28] sm:$0xff] %vm16_vm0, %v540_v62  ;;  %531 = vst.msk [vmem:[#allocation2 + $0x38] sm:$0xff] %vm16_vm0, %v522_v61 }
 0x11e   :  { %v541_v63 = vld [vmem:[#allocation2 + $0x30] sm:$0xff] }
 0x11f   :  { %549 = vst.msk [vmem:[%s950_s2 + $0x30] sm:$0xff] %vm16_vm0, %v541_v63 }
 0x120   :  { %v542_v0 = vld [vmem:[#allocation2 + $0x38] sm:$0xff] }
 0x121   :  { %550 = vst.msk [vmem:[%s950_s2 + $0x38] sm:$0xff] %vm16_vm0, %v542_v0 }

// kernel: decoder_forward.30
= control target key start
LH: loop header
LB: loop body
LE: loop exit
PB: predicated region body
PF: predicated region fallthrough
CT: control target
= control target key end

     0   :  { %vm23_vm0 = vcmask 261120   ;;  %v390_v0 = vmov 0.0   ;;  %vm332_vm1 = vcmask 7168   ;;  %s677_s0 = inlined_call_operand.vmem [shape: f32[64,32], index: 0, kind: input, shape index: {}]   ;;  %s678_s1 = inlined_call_operand.vmem [shape: f32[64,32], index: 1, kind: input, shape index: {}]   ;;  %s679_s2 = inlined_call_operand.vmem [shape: f32[64,32], index: 2, kind: input, shape index: {}]   ;;  %s680_s3 = inlined_call_operand.vmem [shape: f32[64,32], index: 3, kind: input, shape index: {}]   ;;  %s681_s4 = inlined_call_operand.vmem [shape: f32[64,1], index: 4, kind: output, shape index: {0}]   ;;  %s682_s5 = inlined_call_operand.vmem [shape: f32[64,1], index: 5, kind: output, shape index: {1}]  }
   0x1   :  { %26 = vst.msk [vmem:[#allocation2 + $0x10] sm:$0xff] %vm23_vm0, %v390_v0  ;;  %24 = vst.msk [vmem:[#allocation2] sm:$0xff] %vm23_vm0, %v390_v0  ;;  %v42_v1 = vld [vmem:[%s677_s0 + $0x10] sm:$0xff]  ;;  %v40_v2 = vld [vmem:[%s677_s0] sm:$0xff] }
   0x2   :  { %25 = vst.msk [vmem:[#allocation2 + $0x8] sm:$0xff] %vm23_vm0, %v390_v0  ;;  %27 = vst.msk [vmem:[#allocation2 + $0x18] sm:$0xff] %vm23_vm0, %v390_v0  ;;  %v43_v3 = vld [vmem:[%s677_s0 + $0x18] sm:$0xff]  ;;  %v41_v4 = vld [vmem:[%s677_s0 + $0x8] sm:$0xff]  ;;  %v81_v19 = vmul.f32 %v40_v2, %v40_v2  ;;  %v83_v23 = vmul.f32 %v42_v1, %v42_v1 }
   0x3   :  { %28 = vst.msk [vmem:[#allocation2 + $0x20] sm:$0xff] %vm23_vm0, %v390_v0  ;;  %29 = vst.msk [vmem:[#allocation2 + $0x28] sm:$0xff] %vm23_vm0, %v390_v0  ;;  %v45_v5 = vld [vmem:[%s677_s0 + $0x28] sm:$0xff]  ;;  %v44_v6 = vld [vmem:[%s677_s0 + $0x20] sm:$0xff]  ;;  %v82_v22 = vmul.f32 %v41_v4, %v41_v4  ;;  %v84_v26 = vmul.f32 %v43_v3, %v43_v3 }
   0x4   :  { %30 = vst.msk [vmem:[#allocation2 + $0x30] sm:$0xff] %vm23_vm0, %v390_v0  ;;  %31 = vst.msk [vmem:[#allocation2 + $0x38] sm:$0xff] %vm23_vm0, %v390_v0  ;;  %v47_v20 = vld [vmem:[%s677_s0 + $0x38] sm:$0xff]  ;;  %v46_v25 = vld [vmem:[%s677_s0 + $0x30] sm:$0xff]  ;;  %v86_v27 = vmul.f32 %v45_v5, %v45_v5  ;;  %v85_v29 = vmul.f32 %v44_v6, %v44_v6 }
   0x5   :  { %32 = vst.msk [vmem:[#allocation3] sm:$0xff] %vm23_vm0, %v390_v0  ;;  %33 = vst.msk [vmem:[#allocation3 + $0x8] sm:$0xff] %vm23_vm0, %v390_v0  ;;  %v88_v30 = vmul.f32 %v47_v20, %v47_v20  ;;  %v87_v31 = vmul.f32 %v46_v25, %v46_v25  ;;  %v107_v32 = vld [vmem:[%s678_s1 + $0x10] sm:$0xff]  ;;  %v105_v33 = vld [vmem:[%s678_s1] sm:$0xff] }
   0x6   :  { %34 = vst.msk [vmem:[#allocation3 + $0x10] sm:$0xff] %vm23_vm0, %v390_v0  ;;  %35 = vst.msk [vmem:[#allocation3 + $0x18] sm:$0xff] %vm23_vm0, %v390_v0  ;;  %v108_v34 = vld [vmem:[%s678_s1 + $0x18] sm:$0xff]  ;;  %v106_v38 = vld [vmem:[%s678_s1 + $0x8] sm:$0xff] }
   0x7   :  { %36 = vst.msk [vmem:[#allocation3 + $0x20] sm:$0xff] %vm23_vm0, %v390_v0  ;;  %37 = vst.msk [vmem:[#allocation3 + $0x28] sm:$0xff] %vm23_vm0, %v390_v0  ;;  %v110_v50 = vld [vmem:[%s678_s1 + $0x28] sm:$0xff]  ;;  %v109_v51 = vld [vmem:[%s678_s1 + $0x20] sm:$0xff] }
   0x8   :  { %38 = vst.msk [vmem:[#allocation3 + $0x30] sm:$0xff] %vm23_vm0, %v390_v0  ;;  %39 = vst.msk [vmem:[#allocation3 + $0x38] sm:$0xff] %vm23_vm0, %v390_v0  ;;  %v50_v7 = vld [vmem:[#allocation2 + $0x10] sm:$0xff]  ;;  %v48_v8 = vld [vmem:[#allocation2] sm:$0xff] }
   0x9   :  { %v51_v9 = vld [vmem:[#allocation2 + $0x18] sm:$0xff]  ;;  %v58_v10 = vadd.f32 %v50_v7, %v42_v1  ;;  %v56_v11 = vadd.f32 %v48_v8, %v40_v2  ;;  %v49_v13 = vld [vmem:[#allocation2 + $0x8] sm:$0xff]  ;;  %v146_v7 = vmul.f32 %v106_v38, %v106_v38  ;;  %v147_v8 = vmul.f32 %v107_v32, %v107_v32 }
   0xa   :  { %v59_v12 = vadd.f32 %v51_v9, %v43_v3  ;;  %v53_v14 = vld [vmem:[#allocation2 + $0x28] sm:$0xff]  ;;  %v52_v15 = vld [vmem:[#allocation2 + $0x20] sm:$0xff]  ;;  %v57_v16 = vadd.f32 %v49_v13, %v41_v4  ;;  %v112_v52 = vld [vmem:[%s678_s1 + $0x38] sm:$0xff]  ;;  %v145_v4 = vmul.f32 %v105_v33, %v105_v33  ;;  %v149_v13 = vmul.f32 %v109_v51, %v109_v51 }
   0xb   :  { %v61_v17 = vadd.f32 %v53_v14, %v45_v5  ;;  %v60_v18 = vadd.f32 %v52_v15, %v44_v6  ;;  %67 = vst.msk [vmem:[#allocation2 + $0x10] sm:$0xff] %vm23_vm0, %v58_v10  ;;  %65 = vst.msk [vmem:[#allocation2] sm:$0xff] %vm23_vm0, %v56_v11  ;;  %v55_v21 = vld [vmem:[#allocation2 + $0x38] sm:$0xff]  ;;  %v54_v28 = vld [vmem:[#allocation2 + $0x30] sm:$0xff]  ;;  %v148_v10 = vmul.f32 %v108_v34, %v108_v34 }
   0xc   :  { %68 = vst.msk [vmem:[#allocation2 + $0x18] sm:$0xff] %vm23_vm0, %v59_v12  ;;  %66 = vst.msk [vmem:[#allocation2 + $0x8] sm:$0xff] %vm23_vm0, %v57_v16  ;;  %v63_v24 = vadd.f32 %v55_v21, %v47_v20  ;;  %v62_v35 = vadd.f32 %v54_v28, %v46_v25  ;;  %v74_v36 = vld [vmem:[#allocation3 + $0x8] sm:$0xff]  ;;  %v73_v37 = vld [vmem:[#allocation3] sm:$0xff]  ;;  %v150_v11 = vmul.f32 %v110_v50, %v110_v50 }
   0xd   :  { %70 = vst.msk [vmem:[#allocation2 + $0x28] sm:$0xff] %vm23_vm0, %v61_v17  ;;  %69 = vst.msk [vmem:[#allocation2 + $0x20] sm:$0xff] %vm23_vm0, %v60_v18  ;;  %v90_v39 = vadd.f32 %v82_v22, %v74_v36  ;;  %v89_v40 = vadd.f32 %v81_v19, %v73_v37  ;;  %v76_v41 = vld [vmem:[#allocation3 + $0x18] sm:$0xff]  ;;  %v75_v42 = vld [vmem:[#allocation3 + $0x10] sm:$0xff]  ;;  %v152_v14 = vmul.f32 %v112_v52, %v112_v52 }
   0xe   :  { %72 = vst.msk [vmem:[#allocation2 + $0x38] sm:$0xff] %vm23_vm0, %v63_v24  ;;  %v78_v43 = vld [vmem:[#allocation3 + $0x28] sm:$0xff]  ;;  %71 = vst.msk [vmem:[#allocation2 + $0x30] sm:$0xff] %vm23_vm0, %v62_v35  ;;  %v92_v44 = vadd.f32 %v84_v26, %v76_v41  ;;  %v91_v45 = vadd.f32 %v83_v23, %v75_v42  ;;  %v77_v47 = vld [vmem:[#allocation3 + $0x20] sm:$0xff] }
   0xf   :  { %v94_v46 = vadd.f32 %v86_v27, %v78_v43  ;;  %v80_v48 = vld [vmem:[#allocation3 + $0x38] sm:$0xff]  ;;  %v79_v49 = vld [vmem:[#allocation3 + $0x30] sm:$0xff]  ;;  %98 = vst.msk [vmem:[#allocation3 + $0x8] sm:$0xff] %vm23_vm0, %v90_v39  ;;  %97 = vst.msk [vmem:[#allocation3] sm:$0xff] %vm23_vm0, %v89_v40  ;;  %v93_v53 = vadd.f32 %v85_v29, %v77_v47 }
  0x10   :  { %v96_v54 = vadd.f32 %v88_v30, %v80_v48  ;;  %v95_v55 = vadd.f32 %v87_v31, %v79_v49  ;;  %100 = vst.msk [vmem:[#allocation3 + $0x18] sm:$0xff] %vm23_vm0, %v92_v44  ;;  %99 = vst.msk [vmem:[#allocation3 + $0x10] sm:$0xff] %vm23_vm0, %v91_v45  ;;  %v111_v6 = vld [vmem:[%s678_s1 + $0x30] sm:$0xff]  ;;  %v169_v17 = vld [vmem:[%s679_s2] sm:$0xff] }
  0x11   :  { %102 = vst.msk [vmem:[#allocation3 + $0x28] sm:$0xff] %vm23_vm0, %v94_v46  ;;  %101 = vst.msk [vmem:[#allocation3 + $0x20] sm:$0xff] %vm23_vm0, %v93_v53  ;;  %v151_v15 = vmul.f32 %v111_v6, %v111_v6  ;;  %v171_v16 = vld [vmem:[%s679_s2 + $0x10] sm:$0xff]  ;;  %v172_v18 = vld [vmem:[%s679_s2 + $0x18] sm:$0xff] }
  0x12   :  { %v115_v56 = vld [vmem:[#allocation2 + $0x10] sm:$0xff]  ;;  %v113_v57 = vld [vmem:[#allocation2] sm:$0xff]  ;;  %104 = vst.msk [vmem:[#allocation3 + $0x38] sm:$0xff] %vm23_vm0, %v96_v54  ;;  %103 = vst.msk [vmem:[#allocation3 + $0x30] sm:$0xff] %vm23_vm0, %v95_v55 }
  0x13   :  { %v116_v58 = vld [vmem:[#allocation2 + $0x18] sm:$0xff]  ;;  %v123_v59 = vadd.f32 %v115_v56, %v107_v32  ;;  %v121_v60 = vadd.f32 %v113_v57, %v105_v33  ;;  %v114_v62 = vld [vmem:[#allocation2 + $0x8] sm:$0xff]  ;;  %v173_v35 = vld [vmem:[%s679_s2 + $0x20] sm:$0xff]  ;;  %v211_v56 = vmul.f32 %v171_v16, %v171_v16 }
  0x14   :  { %v124_v61 = vadd.f32 %v116_v58, %v108_v34  ;;  %v118_v63 = vld [vmem:[#allocation2 + $0x28] sm:$0xff]  ;;  %v117_v0 = vld [vmem:[#allocation2 + $0x20] sm:$0xff]  ;;  %v122_v1 = vadd.f32 %v114_v62, %v106_v38  ;;  %v176_v36 = vld [vmem:[%s679_s2 + $0x38] sm:$0xff]  ;;  %v212_v58 = vmul.f32 %v172_v18, %v172_v18 }
  0x15   :  { %v126_v2 = vadd.f32 %v118_v63, %v110_v50  ;;  %v125_v3 = vadd.f32 %v117_v0, %v109_v51  ;;  %131 = vst.msk [vmem:[#allocation2 + $0x10] sm:$0xff] %vm23_vm0, %v123_v59  ;;  %129 = vst.msk [vmem:[#allocation2] sm:$0xff] %vm23_vm0, %v121_v60  ;;  %v120_v5 = vld [vmem:[#allocation2 + $0x38] sm:$0xff]  ;;  %v119_v12 = vld [vmem:[#allocation2 + $0x30] sm:$0xff]  ;;  %v216_v62 = vmul.f32 %v176_v36, %v176_v36 }
  0x16   :  { %132 = vst.msk [vmem:[#allocation2 + $0x18] sm:$0xff] %vm23_vm0, %v124_v61  ;;  %130 = vst.msk [vmem:[#allocation2 + $0x8] sm:$0xff] %vm23_vm0, %v122_v1  ;;  %v128_v9 = vadd.f32 %v120_v5, %v112_v52  ;;  %v127_v19 = vadd.f32 %v119_v12, %v111_v6  ;;  %v138_v20 = vld [vmem:[#allocation3 + $0x8] sm:$0xff]  ;;  %v137_v21 = vld [vmem:[#allocation3] sm:$0xff]  ;;  %v209_v52 = vmul.f32 %v169_v17, %v169_v17 }
  0x17   :  { %134 = vst.msk [vmem:[#allocation2 + $0x28] sm:$0xff] %vm23_vm0, %v126_v2  ;;  %133 = vst.msk [vmem:[#allocation2 + $0x20] sm:$0xff] %vm23_vm0, %v125_v3  ;;  %v170_v22 = vld [vmem:[%s679_s2 + $0x8] sm:$0xff]  ;;  %v154_v23 = vadd.f32 %v146_v7, %v138_v20  ;;  %v153_v24 = vadd.f32 %v145_v4, %v137_v21  ;;  %v140_v25 = vld [vmem:[#allocation3 + $0x18] sm:$0xff]  ;;  %v213_v61 = vmul.f32 %v173_v35, %v173_v35 }
  0x18   :  { %136 = vst.msk [vmem:[#allocation2 + $0x38] sm:$0xff] %vm23_vm0, %v128_v9  ;;  %v139_v26 = vld [vmem:[#allocation3 + $0x10] sm:$0xff]  ;;  %v142_v27 = vld [vmem:[#allocation3 + $0x28] sm:$0xff]  ;;  %135 = vst.msk [vmem:[#allocation2 + $0x30] sm:$0xff] %vm23_vm0, %v127_v19  ;;  %v156_v28 = vadd.f32 %v148_v10, %v140_v25  ;;  %v210_v55 = vmul.f32 %v170_v22, %v170_v22 }
  0x19   :  { %v155_v29 = vadd.f32 %v147_v8, %v139_v26  ;;  %v158_v30 = vadd.f32 %v150_v11, %v142_v27  ;;  %v141_v31 = vld [vmem:[#allocation3 + $0x20] sm:$0xff]  ;;  %v144_v32 = vld [vmem:[#allocation3 + $0x38] sm:$0xff]  ;;  %v143_v33 = vld [vmem:[#allocation3 + $0x30] sm:$0xff]  ;;  %162 = vst.msk [vmem:[#allocation3 + $0x8] sm:$0xff] %vm23_vm0, %v154_v23 }
  0x1a   :  { %v174_v34 = vld [vmem:[%s679_s2 + $0x28] sm:$0xff]  ;;  %161 = vst.msk [vmem:[#allocation3] sm:$0xff] %vm23_vm0, %v153_v24  ;;  %v157_v37 = vadd.f32 %v149_v13, %v141_v31  ;;  %v160_v38 = vadd.f32 %v152_v14, %v144_v32  ;;  %v159_v39 = vadd.f32 %v151_v15, %v143_v33  ;;  %164 = vst.msk [vmem:[#allocation3 + $0x18] sm:$0xff] %vm23_vm0, %v156_v28  ;;  %v175_v54 = vld [vmem:[%s679_s2 + $0x30] sm:$0xff] }
  0x1b   :  { %163 = vst.msk [vmem:[#allocation3 + $0x10] sm:$0xff] %vm23_vm0, %v155_v29  ;;  %166 = vst.msk [vmem:[#allocation3 + $0x28] sm:$0xff] %vm23_vm0, %v158_v30  ;;  %v214_v59 = vmul.f32 %v174_v34, %v174_v34  ;;  %v215_v63 = vmul.f32 %v175_v54, %v175_v54  ;;  %v235_v0 = vld [vmem:[%s680_s3 + $0x10] sm:$0xff]  ;;  %v233_v1 = vld [vmem:[%s680_s3] sm:$0xff] }
  0x1c   :  { %v179_v40 = vld [vmem:[#allocation2 + $0x10] sm:$0xff]  ;;  %v177_v41 = vld [vmem:[#allocation2] sm:$0xff]  ;;  %165 = vst.msk [vmem:[#allocation3 + $0x20] sm:$0xff] %vm23_vm0, %v157_v37  ;;  %168 = vst.msk [vmem:[#allocation3 + $0x38] sm:$0xff] %vm23_vm0, %v160_v38 }
  0x1d   :  { %v180_v42 = vld [vmem:[#allocation2 + $0x18] sm:$0xff]  ;;  %v187_v43 = vadd.f32 %v179_v40, %v171_v16  ;;  %v185_v44 = vadd.f32 %v177_v41, %v169_v17  ;;  %v178_v46 = vld [vmem:[#allocation2 + $0x8] sm:$0xff]  ;;  %167 = vst.msk [vmem:[#allocation3 + $0x30] sm:$0xff] %vm23_vm0, %v159_v39  ;;  %v237_v19 = vld [vmem:[%s680_s3 + $0x20] sm:$0xff]  ;;  %v275_v40 = vmul.f32 %v235_v0, %v235_v0 }
  0x1e   :  { %v188_v45 = vadd.f32 %v180_v42, %v172_v18  ;;  %v182_v47 = vld [vmem:[#allocation2 + $0x28] sm:$0xff]  ;;  %v181_v48 = vld [vmem:[#allocation2 + $0x20] sm:$0xff]  ;;  %v186_v49 = vadd.f32 %v178_v46, %v170_v22  ;;  %v236_v2 = vld [vmem:[%s680_s3 + $0x18] sm:$0xff] }
  0x1f   :  { %v190_v50 = vadd.f32 %v182_v47, %v174_v34  ;;  %v189_v51 = vadd.f32 %v181_v48, %v173_v35  ;;  %195 = vst.msk [vmem:[#allocation2 + $0x10] sm:$0xff] %vm23_vm0, %v187_v43  ;;  %193 = vst.msk [vmem:[#allocation2] sm:$0xff] %vm23_vm0, %v185_v44  ;;  %v184_v53 = vld [vmem:[#allocation2 + $0x38] sm:$0xff]  ;;  %v183_v60 = vld [vmem:[#allocation2 + $0x30] sm:$0xff]  ;;  %v276_v42 = vmul.f32 %v236_v2, %v236_v2 }
  0x20   :  { %196 = vst.msk [vmem:[#allocation2 + $0x18] sm:$0xff] %vm23_vm0, %v188_v45  ;;  %194 = vst.msk [vmem:[#allocation2 + $0x8] sm:$0xff] %vm23_vm0, %v186_v49  ;;  %v192_v57 = vadd.f32 %v184_v53, %v176_v36  ;;  %v191_v3 = vadd.f32 %v183_v60, %v175_v54  ;;  %v202_v4 = vld [vmem:[#allocation3 + $0x8] sm:$0xff]  ;;  %v240_v20 = vld [vmem:[%s680_s3 + $0x38] sm:$0xff]  ;;  %v273_v36 = vmul.f32 %v233_v1, %v233_v1 }
  0x21   :  { %198 = vst.msk [vmem:[#allocation2 + $0x28] sm:$0xff] %vm23_vm0, %v190_v50  ;;  %197 = vst.msk [vmem:[#allocation2 + $0x20] sm:$0xff] %vm23_vm0, %v189_v51  ;;  %v201_v5 = vld [vmem:[#allocation3] sm:$0xff]  ;;  %v234_v6 = vld [vmem:[%s680_s3 + $0x8] sm:$0xff]  ;;  %v218_v7 = vadd.f32 %v210_v55, %v202_v4  ;;  %v277_v45 = vmul.f32 %v237_v19, %v237_v19  ;;  %v280_v46 = vmul.f32 %v240_v20, %v240_v20 }
  0x22   :  { %200 = vst.msk [vmem:[#allocation2 + $0x38] sm:$0xff] %vm23_vm0, %v192_v57  ;;  %v217_v8 = vadd.f32 %v209_v52, %v201_v5  ;;  %v204_v9 = vld [vmem:[#allocation3 + $0x18] sm:$0xff]  ;;  %v203_v10 = vld [vmem:[#allocation3 + $0x10] sm:$0xff]  ;;  %v206_v11 = vld [vmem:[#allocation3 + $0x28] sm:$0xff]  ;;  %v274_v39 = vmul.f32 %v234_v6, %v234_v6 }
  0x23   :  { %199 = vst.msk [vmem:[#allocation2 + $0x30] sm:$0xff] %vm23_vm0, %v191_v3  ;;  %v220_v12 = vadd.f32 %v212_v58, %v204_v9  ;;  %v219_v13 = vadd.f32 %v211_v56, %v203_v10  ;;  %v222_v14 = vadd.f32 %v214_v59, %v206_v11  ;;  %v205_v15 = vld [vmem:[#allocation3 + $0x20] sm:$0xff]  ;;  %v208_v16 = vld [vmem:[#allocation3 + $0x38] sm:$0xff]  ;;  %v238_v18 = vld [vmem:[%s680_s3 + $0x28] sm:$0xff] }
  0x24   :  { %v207_v17 = vld [vmem:[#allocation3 + $0x30] sm:$0xff]  ;;  %226 = vst.msk [vmem:[#allocation3 + $0x8] sm:$0xff] %vm23_vm0, %v218_v7  ;;  %225 = vst.msk [vmem:[#allocation3] sm:$0xff] %vm23_vm0, %v217_v8  ;;  %v221_v21 = vadd.f32 %v213_v61, %v205_v15  ;;  %v224_v22 = vadd.f32 %v216_v62, %v208_v16  ;;  %v278_v43 = vmul.f32 %v238_v18, %v238_v18 }
  0x25   :  { %v223_v23 = vadd.f32 %v215_v63, %v207_v17  ;;  %228 = vst.msk [vmem:[#allocation3 + $0x18] sm:$0xff] %vm23_vm0, %v220_v12  ;;  %227 = vst.msk [vmem:[#allocation3 + $0x10] sm:$0xff] %vm23_vm0, %v219_v13  ;;  %v239_v38 = vld [vmem:[%s680_s3 + $0x30] sm:$0xff] }
  0x26   :  { %v243_v24 = vld [vmem:[#allocation2 + $0x10] sm:$0xff]  ;;  %v241_v25 = vld [vmem:[#allocation2] sm:$0xff]  ;;  %230 = vst.msk [vmem:[#allocation3 + $0x28] sm:$0xff] %vm23_vm0, %v222_v14  ;;  %229 = vst.msk [vmem:[#allocation3 + $0x20] sm:$0xff] %vm23_vm0, %v221_v21  ;;  %v279_v47 = vmul.f32 %v239_v38, %v239_v38 }
  0x27   :  { %v244_v26 = vld [vmem:[#allocation2 + $0x18] sm:$0xff]  ;;  %v251_v27 = vadd.f32 %v243_v24, %v235_v0  ;;  %v249_v28 = vadd.f32 %v241_v25, %v233_v1  ;;  %v242_v30 = vld [vmem:[#allocation2 + $0x8] sm:$0xff]  ;;  %232 = vst.msk [vmem:[#allocation3 + $0x38] sm:$0xff] %vm23_vm0, %v224_v22  ;;  %231 = vst.msk [vmem:[#allocation3 + $0x30] sm:$0xff] %vm23_vm0, %v223_v23 }
  0x28   :  { %v252_v29 = vadd.f32 %v244_v26, %v236_v2  ;;  %v246_v31 = vld [vmem:[#allocation2 + $0x28] sm:$0xff]  ;;  %v245_v32 = vld [vmem:[#allocation2 + $0x20] sm:$0xff]  ;;  %v250_v33 = vadd.f32 %v242_v30, %v234_v6 }
  0x29   :  { %v254_v34 = vadd.f32 %v246_v31, %v238_v18  ;;  %v253_v35 = vadd.f32 %v245_v32, %v237_v19  ;;  %259 = vst.msk [vmem:[#allocation2 + $0x10] sm:$0xff] %vm23_vm0, %v251_v27  ;;  %257 = vst.msk [vmem:[#allocation2] sm:$0xff] %vm23_vm0, %v249_v28  ;;  %v248_v37 = vld [vmem:[#allocation2 + $0x38] sm:$0xff] }
  0x2a   :  { %260 = vst.msk [vmem:[#allocation2 + $0x18] sm:$0xff] %vm23_vm0, %v252_v29  ;;  %258 = vst.msk [vmem:[#allocation2 + $0x8] sm:$0xff] %vm23_vm0, %v250_v33  ;;  %v256_v41 = vadd.f32 %v248_v37, %v240_v20  ;;  %v247_v44 = vld [vmem:[#allocation2 + $0x30] sm:$0xff] }
  0x2b   :  { %262 = vst.msk [vmem:[#allocation2 + $0x28] sm:$0xff] %vm23_vm0, %v254_v34  ;;  %261 = vst.msk [vmem:[#allocation2 + $0x20] sm:$0xff] %vm23_vm0, %v253_v35  ;;  %v255_v48 = vadd.f32 %v247_v44, %v239_v38  ;;  %v266_v49 = vld [vmem:[#allocation3 + $0x8] sm:$0xff]  ;;  %v265_v50 = vld [vmem:[#allocation3] sm:$0xff] }
  0x2c   :  { %264 = vst.msk [vmem:[#allocation2 + $0x38] sm:$0xff] %vm23_vm0, %v256_v41  ;;  %v282_v51 = vadd.f32 %v274_v39, %v266_v49  ;;  %v281_v52 = vadd.f32 %v273_v36, %v265_v50  ;;  %v268_v53 = vld [vmem:[#allocation3 + $0x18] sm:$0xff]  ;;  %v267_v54 = vld [vmem:[#allocation3 + $0x10] sm:$0xff] }
  0x2d   :  { %v270_v55 = vld [vmem:[#allocation3 + $0x28] sm:$0xff]  ;;  %263 = vst.msk [vmem:[#allocation2 + $0x30] sm:$0xff] %vm23_vm0, %v255_v48  ;;  %v284_v56 = vadd.f32 %v276_v42, %v268_v53  ;;  %v283_v57 = vadd.f32 %v275_v40, %v267_v54  ;;  %v269_v59 = vld [vmem:[#allocation3 + $0x20] sm:$0xff] }
  0x2e   :  { %v286_v58 = vadd.f32 %v278_v43, %v270_v55  ;;  %v272_v60 = vld [vmem:[#allocation3 + $0x38] sm:$0xff]  ;;  %v271_v61 = vld [vmem:[#allocation3 + $0x30] sm:$0xff]  ;;  %290 = vst.msk [vmem:[#allocation3 + $0x8] sm:$0xff] %vm23_vm0, %v282_v51  ;;  %289 = vst.msk [vmem:[#allocation3] sm:$0xff] %vm23_vm0, %v281_v52  ;;  %v285_v62 = vadd.f32 %v277_v45, %v269_v59 }
  0x2f   :  { %v288_v63 = vadd.f32 %v280_v46, %v272_v60  ;;  %v287_v0 = vadd.f32 %v279_v47, %v271_v61  ;;  %292 = vst.msk [vmem:[#allocation3 + $0x18] sm:$0xff] %vm23_vm0, %v284_v56  ;;  %291 = vst.msk [vmem:[#allocation3 + $0x10] sm:$0xff] %vm23_vm0, %v283_v57 }
  0x30   :  { %v302_v1 = vld [vmem:[#allocation2 + $0x10] sm:$0xff]  ;;  %v300_v2 = vld [vmem:[#allocation2] sm:$0xff]  ;;  %294 = vst.msk [vmem:[#allocation3 + $0x28] sm:$0xff] %vm23_vm0, %v286_v58  ;;  %293 = vst.msk [vmem:[#allocation3 + $0x20] sm:$0xff] %vm23_vm0, %v285_v62 }
  0x31   :  { %v303_v3 = vld [vmem:[#allocation2 + $0x18] sm:$0xff]  ;;  %v314_v4 = vsel %vm23_vm0, %v302_v1, 0.0  ;;  %v308_v5 = vsel %vm23_vm0, %v300_v2, 0.0  ;;  %v301_v6 = vld [vmem:[#allocation2 + $0x8] sm:$0xff]  ;;  %296 = vst.msk [vmem:[#allocation3 + $0x38] sm:$0xff] %vm23_vm0, %v288_v63  ;;  %295 = vst.msk [vmem:[#allocation3 + $0x30] sm:$0xff] %vm23_vm0, %v287_v0 }
  0x32   :  { %315 = vadd.xlane.f32.xlu1 %v314_v4  ;;  %309 = vadd.xlane.f32.xlu0 %v308_v5  ;;  %v317_v7 = vsel %vm23_vm0, %v303_v3, 0.0  ;;  %v311_v8 = vsel %vm23_vm0, %v301_v6, 0.0  ;;  %v305_v9 = vld [vmem:[#allocation2 + $0x28] sm:$0xff]  ;;  %v304_v10 = vld [vmem:[#allocation2 + $0x20] sm:$0xff] }
  0x33   :  { %v323_v11 = vsel %vm23_vm0, %v305_v9, 0.0  ;;  %v320_v12 = vsel %vm23_vm0, %v304_v10, 0.0  ;;  %v307_v13 = vld [vmem:[#allocation2 + $0x38] sm:$0xff] }
  0x34   :  { %v306_v14 = vld [vmem:[#allocation2 + $0x30] sm:$0xff]  ;;  %v329_v15 = vsel %vm23_vm0, %v307_v13, 0.0 }
  0x35   :  { %v326_v16 = vsel %vm23_vm0, %v306_v14, 0.0  ;;  %v342_v17 = vld [vmem:[#allocation3 + $0x8] sm:$0xff]  ;;  %v341_v18 = vld [vmem:[#allocation3] sm:$0xff] }
  0x36   :  { %318 = vadd.xlane.f32.xlu1 %v317_v7  ;;  %312 = vadd.xlane.f32.xlu0 %v311_v8  ;;  %v352_v19 = vsel %vm23_vm0, %v342_v17, 0.0  ;;  %v349_v20 = vsel %vm23_vm0, %v341_v18, 0.0  ;;  %v344_v21 = vld [vmem:[#allocation3 + $0x18] sm:$0xff]  ;;  %v343_v22 = vld [vmem:[#allocation3 + $0x10] sm:$0xff] }
  0x37   :  { %v358_v23 = vsel %vm23_vm0, %v344_v21, 0.0  ;;  %v355_v24 = vsel %vm23_vm0, %v343_v22, 0.0  ;;  %v346_v25 = vld [vmem:[#allocation3 + $0x28] sm:$0xff]  ;;  %v345_v26 = vld [vmem:[#allocation3 + $0x20] sm:$0xff] }
  0x38   :  { %v364_v27 = vsel %vm23_vm0, %v346_v25, 0.0  ;;  %v361_v28 = vsel %vm23_vm0, %v345_v26, 0.0  ;;  %v348_v29 = vld [vmem:[#allocation3 + $0x38] sm:$0xff]  ;;  %v347_v30 = vld [vmem:[#allocation3 + $0x30] sm:$0xff] }
  0x39   :  { %v370_v31 = vsel %vm23_vm0, %v348_v29, 0.0  ;;  %v367_v32 = vsel %vm23_vm0, %v347_v30, 0.0 }
  0x3a   :  { %324 = vadd.xlane.f32.xlu1 %v323_v11  ;;  %321 = vadd.xlane.f32.xlu0 %v320_v12 }
  0x3e   :  { %330 = vadd.xlane.f32.xlu1 %v329_v15  ;;  %327 = vadd.xlane.f32.xlu0 %v326_v16 }
  0x42   :  { %353 = vadd.xlane.f32.xlu1 %v352_v19  ;;  %350 = vadd.xlane.f32.xlu0 %v349_v20 }
  0x46   :  { %359 = vadd.xlane.f32.xlu1 %v358_v23  ;;  %356 = vadd.xlane.f32.xlu0 %v355_v24 }
  0x4a   :  { %365 = vadd.xlane.f32.xlu1 %v364_v27  ;;  %362 = vadd.xlane.f32.xlu0 %v361_v28 }
  0x4e   :  { %371 = vadd.xlane.f32.xlu1 %v370_v31  ;;  %368 = vadd.xlane.f32.xlu0 %v367_v32 }
  0xbf   :  { %v316_v33 = vpop.xlane.xlu1 %315  ;;  %v310_v34 = vpop.xlane.xlu0 %309 }
  0xc0   :  { %335 = vst.msk [vmem:[%s681_s4 + $0x10] sm:$0xff] %vm332_vm1, %v316_v33  ;;  %333 = vst.msk [vmem:[%s681_s4] sm:$0xff] %vm332_vm1, %v310_v34 }
  0xc3   :  { %v319_v35 = vpop.xlane.xlu1 %318  ;;  %v313_v36 = vpop.xlane.xlu0 %312 }
  0xc4   :  { %336 = vst.msk [vmem:[%s681_s4 + $0x18] sm:$0xff] %vm332_vm1, %v319_v35  ;;  %334 = vst.msk [vmem:[%s681_s4 + $0x8] sm:$0xff] %vm332_vm1, %v313_v36 }
  0xc7   :  { %v325_v37 = vpop.xlane.xlu1 %324  ;;  %v322_v38 = vpop.xlane.xlu0 %321 }
  0xc8   :  { %338 = vst.msk [vmem:[%s681_s4 + $0x28] sm:$0xff] %vm332_vm1, %v325_v37  ;;  %337 = vst.msk [vmem:[%s681_s4 + $0x20] sm:$0xff] %vm332_vm1, %v322_v38 }
  0xcb   :  { %v331_v39 = vpop.xlane.xlu1 %330  ;;  %v328_v40 = vpop.xlane.xlu0 %327 }
  0xcc   :  { %340 = vst.msk [vmem:[%s681_s4 + $0x38] sm:$0xff] %vm332_vm1, %v331_v39  ;;  %339 = vst.msk [vmem:[%s681_s4 + $0x30] sm:$0xff] %vm332_vm1, %v328_v40 }
  0xcf   :  { %v354_v41 = vpop.xlane.xlu1 %353  ;;  %v351_v42 = vpop.xlane.xlu0 %350 }
  0xd0   :  { %374 = vst.msk [vmem:[%s682_s5 + $0x8] sm:$0xff] %vm332_vm1, %v354_v41  ;;  %373 = vst.msk [vmem:[%s682_s5] sm:$0xff] %vm332_vm1, %v351_v42 }
  0xd3   :  { %v360_v43 = vpop.xlane.xlu1 %359  ;;  %v357_v44 = vpop.xlane.xlu0 %356 }
  0xd4   :  { %376 = vst.msk [vmem:[%s682_s5 + $0x18] sm:$0xff] %vm332_vm1, %v360_v43  ;;  %375 = vst.msk [vmem:[%s682_s5 + $0x10] sm:$0xff] %vm332_vm1, %v357_v44 }
  0xd7   :  { %v366_v45 = vpop.xlane.xlu1 %365  ;;  %v363_v46 = vpop.xlane.xlu0 %362 }
  0xd8   :  { %378 = vst.msk [vmem:[%s682_s5 + $0x28] sm:$0xff] %vm332_vm1, %v366_v45  ;;  %377 = vst.msk [vmem:[%s682_s5 + $0x20] sm:$0xff] %vm332_vm1, %v363_v46 }
  0xdb   :  { %v372_v47 = vpop.xlane.xlu1 %371  ;;  %v369_v48 = vpop.xlane.xlu0 %368 }
  0xdc   :  { %380 = vst.msk [vmem:[%s682_s5 + $0x38] sm:$0xff] %vm332_vm1, %v372_v47  ;;  %379 = vst.msk [vmem:[%s682_s5 + $0x30] sm:$0xff] %vm332_vm1, %v369_v48 }

// kernel: decoder_forward.31
= control target key start
LH: loop header
LB: loop body
LE: loop exit
PB: predicated region body
PF: predicated region fallthrough
CT: control target
= control target key end

     0   :  { %s421_s1 = inlined_call_operand.vmem [shape: bf16[256,128], index: 1, kind: input, shape index: {}]   ;;  %s422_s0 = inlined_call_operand.vmem [shape: bf16[32,256], index: 0, kind: input, shape index: {}]   ;;  %s423_s2 = inlined_call_operand.vmem [shape: f32[32,128], index: 2, kind: output, shape index: {}]  }
   0x1   :  { %v312_v0 = vld [vmem:[%s421_s1 + $0x40] sm:$0xff]   ;;  %v314_v2 = vld [vmem:[%s421_s1 + $0x48] sm:$0xff]   ;;  %v316_v4 = vld [vmem:[%s421_s1 + $0x50] sm:$0xff]  }
   0x2   :  { %v313_v1 = vld [vmem:[%s421_s1] sm:$0xff]   ;;  %268 = vmatprep.subr.bf16.mxu0 %v312_v0  ;;  %296 = vmatprep.subr.bf16.mxu1 %v312_v0  ;;  %v315_v3 = vld [vmem:[%s421_s1 + $0x8] sm:$0xff]   ;;  %v317_v5 = vld [vmem:[%s421_s1 + $0x10] sm:$0xff]  }
   0x3   :  { %269 = vmatpush3.bf16.msra.mxu0 %v313_v1  ;;  %304 = vmatpush3.bf16.msra.mxu1 %v313_v1  ;;  %v318_v6 = vld [vmem:[%s421_s1 + $0x58] sm:$0xff]   ;;  %v320_v8 = vld [vmem:[%s421_s1 + $0x60] sm:$0xff]   ;;  %v322_v10 = vld [vmem:[%s421_s1 + $0x68] sm:$0xff]  }
   0x4   :  { %270 = vmatprep.subr.bf16.mxu0 %v314_v2  ;;  %297 = vmatprep.subr.bf16.mxu1 %v314_v2  ;;  %v319_v7 = vld [vmem:[%s421_s1 + $0x18] sm:$0xff]   ;;  %v321_v9 = vld [vmem:[%s421_s1 + $0x20] sm:$0xff]   ;;  %v323_v13 = vld [vmem:[%s421_s1 + $0x28] sm:$0xff]  }
   0x5   :  { %v330_v11 = vld [vmem:[%s422_s0 + $0x4] ss:$8 sps:$4 sm:$0xff]   ;;  %v333_v12 = vld [vmem:[%s422_s0 + $0x14] ss:$8 sps:$4 sm:$0xff]   ;;  %v328_v18 = vld [vmem:[%s422_s0] ss:$8 sps:$4 sm:$0xff]  }
   0x6   :  { %v324_v14 = vld [vmem:[%s421_s1 + $0x70] sm:$0xff]   ;;  %208 = vmatprep.mubr.bf16.mxu0 %v330_v11  ;;  %216 = vmatprep.mubr.bf16.mxu1 %v333_v12  ;;  %v326_v16 = vld [vmem:[%s421_s1 + $0x78] sm:$0xff]  }
   0x7   :  { %271 = vmatpush3.bf16.msra.mxu0 %v315_v3  ;;  %305 = vmatpush3.bf16.msra.mxu1 %v315_v3  ;;  %v325_v15 = vld [vmem:[%s421_s1 + $0x30] sm:$0xff]   ;;  %v327_v17 = vld [vmem:[%s421_s1 + $0x38] sm:$0xff]  }
   0x8   :  { %272 = vmatprep.subr.bf16.mxu0 %v316_v4  ;;  %298 = vmatprep.subr.bf16.mxu1 %v316_v4  ;;  %v331_v19 = vld [vmem:[%s422_s0 + $0x10] ss:$8 sps:$4 sm:$0xff]  }
   0xb   :  { %273 = vmatpush3.bf16.msra.mxu0 %v317_v5  ;;  %306 = vmatpush3.bf16.msra.mxu1 %v317_v5 }
   0xc   :  { %274 = vmatprep.subr.bf16.mxu0 %v318_v6  ;;  %299 = vmatprep.subr.bf16.mxu1 %v318_v6 }
   0xf   :  { %275 = vmatpush3.bf16.msra.mxu0 %v319_v7  ;;  %307 = vmatpush3.bf16.msra.mxu1 %v319_v7 }
  0x10   :  { %276 = vmatprep.subr.bf16.mxu0 %v320_v8  ;;  %300 = vmatprep.subr.bf16.mxu1 %v320_v8 }
  0x13   :  { %277 = vmatpush3.bf16.msra.mxu0 %v321_v9  ;;  %308 = vmatpush3.bf16.msra.mxu1 %v321_v9 }
  0x14   :  { %278 = vmatprep.subr.bf16.mxu0 %v322_v10  ;;  %301 = vmatprep.subr.bf16.mxu1 %v322_v10 }
  0x17   :  { %279 = vmatpush3.bf16.msra.mxu0 %v323_v13  ;;  %309 = vmatpush3.bf16.msra.mxu1 %v323_v13 }
  0x18   :  { %280 = vmatprep.subr.bf16.mxu0 %v324_v14  ;;  %302 = vmatprep.subr.bf16.mxu1 %v324_v14 }
  0x1b   :  { %281 = vmatpush3.bf16.msra.mxu0 %v325_v15  ;;  %310 = vmatpush3.bf16.msra.mxu1 %v325_v15 }
  0x1c   :  { %282 = vmatprep.subr.bf16.mxu0 %v326_v16  ;;  %303 = vmatprep.subr.bf16.mxu1 %v326_v16 }
  0x1f   :  { %283 = vmatpush3.bf16.msra.mxu0 %v327_v17  ;;  %311 = vmatpush3.bf16.msra.mxu1 %v327_v17 }
  0x22   :  { %209 = vmatmul.mubr.bf16.vlgmr.msra.gmra.mrb[0].mxu0 %v328_v18  ;;  %217 = vmatmul.mubr.bf16.vlgmr.msra.gmra.mrb[0].mxu1 %v331_v19 }
  0xf5   :  { %v284_v20 = vpop.f32.mrb[0].mxu0  ;;  %v290_v21 = vpop.f32.mrb[0].mxu1 }
  0xf6   :  { %v285_v22 = vpop.f32.mrb[1].mxu0  ;;  %v291_v23 = vpop.f32.mrb[1].mxu1 }
  0xf7   :  { %v286_v24 = vadd.f32 %v285_v22, %v284_v20  ;;  %v292_v25 = vadd.f32 %v291_v23, %v290_v21  ;;  %v287_v26 = vpop.f32.mrb[2].mxu0  ;;  %v293_v27 = vpop.f32.mrb[2].mxu1 }
  0xf8   :  { %v288_v28 = vpop.f32.mrb[3].mxu0  ;;  %v294_v29 = vpop.f32.mrb[3].mxu1 }
  0xf9   :  { %240 = vst [vmem:[%s423_s2] sm:$0xff] %v286_v24  ;;  %242 = vst [vmem:[%s423_s2 + $0x10] sm:$0xff] %v292_v25  ;;  %v289_v30 = vadd.f32 %v288_v28, %v287_v26  ;;  %v295_v31 = vadd.f32 %v294_v29, %v293_v27 }
  0xfb   :  { %241 = vst [vmem:[%s423_s2 + $0x8] sm:$0xff] %v289_v30  ;;  %243 = vst [vmem:[%s423_s2 + $0x18] sm:$0xff] %v295_v31 }

// kernel: decoder_forward.35
= control target key start
LH: loop header
LB: loop body
LE: loop exit
PB: predicated region body
PF: predicated region fallthrough
CT: control target
= control target key end

     0   :  { %vm174_vm0 = vcmask 7168   ;;  %s313_s0 = inlined_call_operand.vmem [shape: f32[32,128], index: 0, kind: input, shape index: {}]   ;;  %s314_s1 = inlined_call_operand.vmem [shape: f32[32,128], index: 1, kind: input, shape index: {}]   ;;  %s315_s2 = inlined_call_operand.vmem [shape: f32[32,128], index: 2, kind: input, shape index: {}]   ;;  %s316_s3 = inlined_call_operand.vmem [shape: f32[32,128], index: 3, kind: input, shape index: {}]   ;;  %s317_s4 = inlined_call_operand.vmem [shape: f32[32,1], index: 4, kind: output, shape index: {0}]   ;;  %s318_s5 = inlined_call_operand.vmem [shape: f32[32,1], index: 5, kind: output, shape index: {1}]  }
   0x1   :  { %v33_v0 = vld [vmem:[%s313_s0 + $0x10] sm:$0xff]  ;;  %v31_v5 = vld [vmem:[%s313_s0] sm:$0xff]  ;;  %v34_v13 = vld [vmem:[%s313_s0 + $0x18] sm:$0xff] }
   0x2   :  { %v65_v1 = vld [vmem:[%s314_s1 + $0x10] sm:$0xff]  ;;  %v63_v6 = vld [vmem:[%s314_s1] sm:$0xff]  ;;  %v51_v12 = vmul.f32 %v31_v5, %v31_v5  ;;  %v53_v15 = vmul.f32 %v33_v0, %v33_v0  ;;  %v66_v18 = vld [vmem:[%s314_s1 + $0x18] sm:$0xff]  ;;  %v54_v20 = vmul.f32 %v34_v13, %v34_v13 }
   0x3   :  { %v97_v2 = vld [vmem:[%s315_s2 + $0x10] sm:$0xff]  ;;  %v73_v3 = vadd.f32 %v65_v1, %v33_v0  ;;  %v85_v4 = vmul.f32 %v65_v1, %v65_v1  ;;  %v71_v9 = vadd.f32 %v63_v6, %v31_v5  ;;  %v83_v10 = vmul.f32 %v63_v6, %v63_v6  ;;  %v95_v11 = vld [vmem:[%s315_s2] sm:$0xff]  ;;  %v98_v19 = vld [vmem:[%s315_s2 + $0x18] sm:$0xff] }
   0x4   :  { %v117_v7 = vmul.f32 %v97_v2, %v97_v2  ;;  %v129_v8 = vld [vmem:[%s316_s3 + $0x10] sm:$0xff]  ;;  %v115_v16 = vmul.f32 %v95_v11, %v95_v11  ;;  %v127_v17 = vld [vmem:[%s316_s3] sm:$0xff]  ;;  %v74_v22 = vadd.f32 %v66_v18, %v34_v13  ;;  %v32_v23 = vld [vmem:[%s313_s0 + $0x8] sm:$0xff]  ;;  %v86_v27 = vmul.f32 %v66_v18, %v66_v18 }
   0x5   :  { %v105_v14 = vadd.f32 %v97_v2, %v73_v3  ;;  %v103_v21 = vadd.f32 %v95_v11, %v71_v9  ;;  %v64_v24 = vld [vmem:[%s314_s1 + $0x8] sm:$0xff]  ;;  %v87_v26 = vadd.f32 %v83_v10, %v51_v12  ;;  %v130_v29 = vld [vmem:[%s316_s3 + $0x18] sm:$0xff]  ;;  %v52_v31 = vmul.f32 %v32_v23, %v32_v23 }
   0x6   :  { %v96_v25 = vld [vmem:[%s315_s2 + $0x8] sm:$0xff]  ;;  %v72_v30 = vadd.f32 %v64_v24, %v32_v23  ;;  %v84_v32 = vmul.f32 %v64_v24, %v64_v24  ;;  %v147_v34 = vmul.f32 %v127_v17, %v127_v17  ;;  %v106_v35 = vadd.f32 %v98_v19, %v74_v22 }
   0x7   :  { %v137_v28 = vadd.f32 %v129_v8, %v105_v14  ;;  %v135_v33 = vadd.f32 %v127_v17, %v103_v21  ;;  %v128_v36 = vld [vmem:[%s316_s3 + $0x8] sm:$0xff]  ;;  %v116_v37 = vmul.f32 %v96_v25, %v96_v25  ;;  %v90_v41 = vadd.f32 %v86_v27, %v54_v20 }
   0x8   :  { %v104_v38 = vadd.f32 %v96_v25, %v72_v30  ;;  %v88_v39 = vadd.f32 %v84_v32, %v52_v31  ;;  %v148_v40 = vmul.f32 %v128_v36, %v128_v36  ;;  %v138_v42 = vadd.f32 %v130_v29, %v106_v35 }
   0x9   :  { %170 = vadd.xlane.f32.xlu1 %v137_v28  ;;  %166 = vadd.xlane.f32.xlu0 %v135_v33  ;;  %v119_v43 = vadd.f32 %v115_v16, %v87_v26  ;;  %v118_v44 = vmul.f32 %v98_v19, %v98_v19  ;;  %v89_v45 = vadd.f32 %v85_v4, %v53_v15 }
   0xa   :  { %v136_v46 = vadd.f32 %v128_v36, %v104_v38  ;;  %v120_v47 = vadd.f32 %v116_v37, %v88_v39  ;;  %v150_v50 = vmul.f32 %v130_v29, %v130_v29  ;;  %v149_v51 = vmul.f32 %v129_v8, %v129_v8 }
   0xb   :  { %v122_v49 = vadd.f32 %v118_v44, %v90_v41  ;;  %v151_v52 = vadd.f32 %v147_v34, %v119_v43  ;;  %v121_v53 = vadd.f32 %v117_v7, %v89_v45 }
   0xc   :  { %v152_v48 = vadd.f32 %v148_v40, %v120_v47 }
   0xd   :  { %172 = vadd.xlane.f32.xlu1 %v138_v42  ;;  %168 = vadd.xlane.f32.xlu0 %v136_v46  ;;  %v154_v54 = vadd.f32 %v150_v50, %v122_v49  ;;  %v153_v55 = vadd.f32 %v149_v51, %v121_v53 }
  0x11   :  { %185 = vadd.xlane.f32.xlu1 %v152_v48  ;;  %183 = vadd.xlane.f32.xlu0 %v151_v52 }
  0x15   :  { %189 = vadd.xlane.f32.xlu1 %v154_v54  ;;  %187 = vadd.xlane.f32.xlu0 %v153_v55 }
  0x96   :  { %v171_v56 = vpop.xlane.xlu1 %170  ;;  %v167_v57 = vpop.xlane.xlu0 %166 }
  0x97   :  { %177 = vst.msk [vmem:[%s317_s4 + $0x10] sm:$0xff] %vm174_vm0, %v171_v56  ;;  %175 = vst.msk [vmem:[%s317_s4] sm:$0xff] %vm174_vm0, %v167_v57 }
  0x9a   :  { %v173_v58 = vpop.xlane.xlu1 %172  ;;  %v169_v59 = vpop.xlane.xlu0 %168 }
  0x9b   :  { %178 = vst.msk [vmem:[%s317_s4 + $0x18] sm:$0xff] %vm174_vm0, %v173_v58  ;;  %176 = vst.msk [vmem:[%s317_s4 + $0x8] sm:$0xff] %vm174_vm0, %v169_v59 }
  0x9e   :  { %v186_v60 = vpop.xlane.xlu1 %185  ;;  %v184_v61 = vpop.xlane.xlu0 %183 }
  0x9f   :  { %192 = vst.msk [vmem:[%s318_s5 + $0x8] sm:$0xff] %vm174_vm0, %v186_v60  ;;  %191 = vst.msk [vmem:[%s318_s5] sm:$0xff] %vm174_vm0, %v184_v61 }
  0xa2   :  { %v190_v62 = vpop.xlane.xlu1 %189  ;;  %v188_v63 = vpop.xlane.xlu0 %187 }
  0xa3   :  { %194 = vst.msk [vmem:[%s318_s5 + $0x18] sm:$0xff] %vm174_vm0, %v190_v62  ;;  %193 = vst.msk [vmem:[%s318_s5 + $0x10] sm:$0xff] %vm174_vm0, %v188_v63 }

// kernel: decoder_forward.36
= control target key start
LH: loop header
LB: loop body
LE: loop exit
PB: predicated region body
PF: predicated region fallthrough
CT: control target
= control target key end

     0   :  { %s760_s9 = smov 0   ;;  %s762_s10 = smov 0   ;;  %s857_s0 = inlined_call_operand.vmem [shape: bf16[16,128], index: 0, kind: input, shape index: {}]   ;;  %s858_s1 = inlined_call_operand.vmem [shape: bf16[128,512], index: 1, kind: input, shape index: {}]   ;;  %s859_s2 = inlined_call_operand.vmem [shape: f32[16,512], index: 2, kind: output, shape index: {}]  }
   0x1   :  { %s764_s11 = smov 0   ;;  %s766_s12 = smov 0  }
   0x2   :  { %s768_s13 = smov 0  }
   0x3 LB: > { %s27_s14 = sadd.s32 1, %s738_s12  ;;  %s603_s15 = sadd.s32 4294967295, %s742_s13   ;;  %s742_s13 = sphi %s768_s13, %s12_s13   ;;  %s738_s12 = sphi %s766_s12, %s864_s12   ;;  %s734_s11 = sphi %s764_s11, %s863_s11   ;;  %s730_s10 = sphi %s762_s10, %s862_s10   ;;  %s726_s9 = sphi %s760_s9, %s861_s9  }
   0x4   : > { %p29_p0 = scmp.ge.s32.totalorder %s27_s14, 2  ;;  %p75_p1 = scmp.ne.s32.totalorder %s730_s10, %s726_s9 }
   0x5   : > { %p76_p2 = scmp.eq.s32.totalorder %s742_s13, 0  ;;  %p107_p4 = scmp.eq.s32.totalorder %s603_s15, 1 }
   0x6   : > { %s866_s14 = smov (%p29_p0, %s27_s14), 0  ;;  %s68_s17 = sadd.s32 1, %s730_s10 }
   0x7   : > { %p77_p3 = por %p76_p2, %p75_p1  ;;  %s64_s16 = ssub.s32 %s738_s12, %s866_s14 }
   0x8   : > { %p66_p5 = scmp.eq.s32.totalorder %s64_s16, 0  ;;  %p795_p6 = por %p107_p4, %p75_p1 }
   0x9   : > { %p607_p7 = scmp.ge.s32.totalorder %s742_s13, 2 }
   0xa   : > { %s800_s19 = scalar_select %p66_p5, %s730_s10, %s68_s17  }
   0xb   : > { %141 = sbr.rel (%p607_p7) target bundleno = 30 (0x1e), region = 20 }
  0x12   : > { %144 = sbr.rel (!%p77_p3) target bundleno = 30 (0x1e), region = 24  ;;  %s146_s20 = sand.u32 (%p77_p3), 1, %s730_s10  }
  0x13   : > { %s636_s21 = sshll.u32 (%p77_p3), %s738_s12, 3  ;;  %s608_s22 = sshll.u32 (%p77_p3), %s146_s20, 7 }
  0x14   : > { %s808_s25 = scalar_lea.vmem (%p77_p3), %s858_s1, %s636_s21  ;;  %s148_s26 = scalar_lea.vmem (%p77_p3), [#allocation3], %s608_s22 }
  0x15   : > { %v212_v0 = vld [vmem:[%s808_s25] sm:$0xff] (%p77_p3)  ;;  %v214_v1 = vld [vmem:[%s808_s25 + $0x10] sm:$0xff] (%p77_p3) }
  0x16   : > { %v216_v2 = vld [vmem:[%s808_s25 + $0x20] sm:$0xff] (%p77_p3)  ;;  %213 = vst [vmem:[%s148_s26] sm:$0xff] (%p77_p3), %v212_v0  ;;  %215 = vst [vmem:[%s148_s26 + $0x8] sm:$0xff] (%p77_p3), %v214_v1  ;;  %v218_v3 = vld [vmem:[%s808_s25 + $0x30] sm:$0xff] (%p77_p3) }
  0x17   : > { %217 = vst [vmem:[%s148_s26 + $0x10] sm:$0xff] (%p77_p3), %v216_v2  ;;  %v220_v4 = vld [vmem:[%s808_s25 + $0x40] sm:$0xff] (%p77_p3)  ;;  %v222_v5 = vld [vmem:[%s808_s25 + $0x50] sm:$0xff] (%p77_p3)  ;;  %219 = vst [vmem:[%s148_s26 + $0x18] sm:$0xff] (%p77_p3), %v218_v3 }
  0x18   : > { %221 = vst [vmem:[%s148_s26 + $0x20] sm:$0xff] (%p77_p3), %v220_v4  ;;  %223 = vst [vmem:[%s148_s26 + $0x28] sm:$0xff] (%p77_p3), %v222_v5  ;;  %v224_v6 = vld [vmem:[%s808_s25 + $0x60] sm:$0xff] (%p77_p3)  ;;  %v226_v7 = vld [vmem:[%s808_s25 + $0x70] sm:$0xff] (%p77_p3) }
  0x19   : > { %v228_v8 = vld [vmem:[%s808_s25 + $0x80] sm:$0xff]  ;;  %225 = vst [vmem:[%s148_s26 + $0x30] sm:$0xff] %v224_v6  ;;  %227 = vst [vmem:[%s148_s26 + $0x38] sm:$0xff] %v226_v7  ;;  %v230_v9 = vld [vmem:[%s808_s25 + $0x90] sm:$0xff] }
  0x1a   : > { %229 = vst [vmem:[%s148_s26 + $0x40] sm:$0xff] %v228_v8  ;;  %v232_v10 = vld [vmem:[%s808_s25 + $0xa0] sm:$0xff]  ;;  %v234_v11 = vld [vmem:[%s808_s25 + $0xb0] sm:$0xff]  ;;  %231 = vst [vmem:[%s148_s26 + $0x48] sm:$0xff] %v230_v9 }
  0x1b   : > { %233 = vst [vmem:[%s148_s26 + $0x50] sm:$0xff] %v232_v10  ;;  %235 = vst [vmem:[%s148_s26 + $0x58] sm:$0xff] %v234_v11  ;;  %v236_v12 = vld [vmem:[%s808_s25 + $0xc0] sm:$0xff]  ;;  %v238_v13 = vld [vmem:[%s808_s25 + $0xd0] sm:$0xff] }
  0x1c   : > { %v240_v14 = vld [vmem:[%s808_s25 + $0xe0] sm:$0xff]  ;;  %237 = vst [vmem:[%s148_s26 + $0x60] sm:$0xff] %v236_v12  ;;  %239 = vst [vmem:[%s148_s26 + $0x68] sm:$0xff] %v238_v13  ;;  %v242_v15 = vld [vmem:[%s808_s25 + $0xf0] sm:$0xff] }
  0x1d   : > { %241 = vst [vmem:[%s148_s26 + $0x70] sm:$0xff] %v240_v14  ;;  %243 = vst [vmem:[%s148_s26 + $0x78] sm:$0xff] %v242_v15 }
  0x1e PF: > { %p611_p8 = scmp.ge.s32.totalorder %s742_s13, 1  ;;  %p248_p9 = scmp.lt.s32.totalorder %s742_s13, 3 }
  0x20   : > { %p249_p10 = pnand %p611_p8, %p248_p9 }
  0x21   : > { %s255_s27 = sand.u32 (!%p249_p10), 1, %s726_s9   ;;  %v744_v16 = vmov (!%p249_p10), 0   ;;  %v703_v33 = vld [vmem:[%s857_s0] sm:$0xff] (!%p249_p10)  }
  0x22   : > { %252 = sbr.rel (%p249_p10) target bundleno = 293 (0x125), region = 62  ;;  %s612_s28 = sshll.u32 (!%p249_p10), %s255_s27, 7  ;;  %445 = vmatprep.mubr.bf16.mxu0 (!%p249_p10), %v744_v16 }
  0x23   : > { %s257_s29 = scalar_lea.vmem (!%p249_p10), [#allocation3], %s612_s28  ;;  %s613_s4 = sshll.u32 (!%p249_p10), %s255_s27, 5 }
  0x24   : > { %v679_v17 = vld [vmem:[%s257_s29 + $0x4] ss:$8 sps:$4 sm:$0xff] (!%p249_p10)   ;;  %v681_v18 = vld [vmem:[%s257_s29] ss:$8 sps:$4 sm:$0xff] (!%p249_p10)   ;;  %v682_v19 = vld [vmem:[%s257_s29 + $0x14] ss:$8 sps:$4 sm:$0xff] (!%p249_p10)  }
  0x25   : > { %413 = vmatprep.subr.bf16.mxu0 (!%p249_p10), %v679_v17  ;;  %v684_v20 = vld [vmem:[%s257_s29 + $0x10] ss:$8 sps:$4 sm:$0xff] (!%p249_p10)   ;;  %v685_v21 = vld [vmem:[%s257_s29 + $0x24] ss:$8 sps:$4 sm:$0xff] (!%p249_p10)   ;;  %v687_v22 = vld [vmem:[%s257_s29 + $0x20] ss:$8 sps:$4 sm:$0xff] (!%p249_p10)  }
  0x26   : > { %414 = vmatpush1.bf16.msra.mxu0 (!%p249_p10), %v681_v18  ;;  %v688_v23 = vld [vmem:[%s257_s29 + $0x34] ss:$8 sps:$4 sm:$0xff] (!%p249_p10)   ;;  %v690_v24 = vld [vmem:[%s257_s29 + $0x30] ss:$8 sps:$4 sm:$0xff] (!%p249_p10)   ;;  %v691_v25 = vld [vmem:[%s257_s29 + $0x44] ss:$8 sps:$4 sm:$0xff] (!%p249_p10)  }
  0x27   : > { %415 = vmatprep.subr.bf16.mxu0 (!%p249_p10), %v682_v19  ;;  %v693_v26 = vld [vmem:[%s257_s29 + $0x40] ss:$8 sps:$4 sm:$0xff] (!%p249_p10)   ;;  %v694_v27 = vld [vmem:[%s257_s29 + $0x54] ss:$8 sps:$4 sm:$0xff] (!%p249_p10)   ;;  %v696_v28 = vld [vmem:[%s257_s29 + $0x50] ss:$8 sps:$4 sm:$0xff] (!%p249_p10)  }
  0x28   : > { %v697_v29 = vld [vmem:[%s257_s29 + $0x64] ss:$8 sps:$4 sm:$0xff] (!%p249_p10)   ;;  %v699_v30 = vld [vmem:[%s257_s29 + $0x60] ss:$8 sps:$4 sm:$0xff] (!%p249_p10)   ;;  %v700_v31 = vld [vmem:[%s257_s29 + $0x74] ss:$8 sps:$4 sm:$0xff] (!%p249_p10)  }
  0x29   : > { %v702_v32 = vld [vmem:[%s257_s29 + $0x70] ss:$8 sps:$4 sm:$0xff]   ;;  %s282_s5 = scalar_lea.vmem [#allocation4], %s613_s4  ;;  %s637_s6 = sshll.u32 (%p795_p6), %s734_s11, 4 }
  0x2a   : > { %416 = vmatpush1.bf16.msra.mxu0 %v684_v20  ;;  %s487_s9 = scalar_lea.vmem (%p795_p6), %s859_s2, %s637_s6 }
  0x2b   : > { %417 = vmatprep.subr.bf16.mxu0 %v685_v21 }
  0x2e   : > { %418 = vmatpush1.bf16.msra.mxu0 %v687_v22 }
  0x2f   : > { %419 = vmatprep.subr.bf16.mxu0 %v688_v23 }
  0x32   : > { %420 = vmatpush1.bf16.msra.mxu0 %v690_v24 }
  0x33   : > { %421 = vmatprep.subr.bf16.mxu0 %v691_v25 }
  0x36   : > { %422 = vmatpush1.bf16.msra.mxu0 %v693_v26 }
  0x37   : > { %423 = vmatprep.subr.bf16.mxu0 %v694_v27 }
  0x3a   : > { %424 = vmatpush1.bf16.msra.mxu0 %v696_v28 }
  0x3b   : > { %425 = vmatprep.subr.bf16.mxu0 %v697_v29 }
  0x3e   : > { %426 = vmatpush1.bf16.msra.mxu0 %v699_v30 }
  0x3f   : > { %427 = vmatprep.subr.bf16.mxu0 %v700_v31 }
  0x42   : > { %428 = vmatpush1.bf16.msra.mxu0 %v702_v32 }
  0x45   : > { %446 = vmatmul.mubr.bf16.vlgmr.msra.gmra.mrb[0].mxu0 %v703_v33 }
 0x116   : > { %481 = sbr.rel (!%p795_p6) target bundleno = 293 (0x125), region = 78 }
 0x118   : > { %v447_v34 = vpop.f32.mrb[0].mxu0 }
 0x119   : > { %471 = vst [vmem:[%s282_s5] sm:$0xff] %v447_v34  ;;  %v449_v35 = vpop.f32.mrb[1].mxu0 }
 0x11a   : > { %472 = vst [vmem:[%s282_s5 + $0x8] sm:$0xff] %v449_v35  ;;  %v451_v36 = vpop.f32.mrb[2].mxu0 }
 0x11b   : > { %473 = vst [vmem:[%s282_s5 + $0x10] sm:$0xff] %v451_v36  ;;  %v453_v37 = vpop.f32.mrb[3].mxu0 }
 0x11c   : > { %474 = vst [vmem:[%s282_s5 + $0x18] sm:$0xff] %v453_v37 }
 0x120   : > { %v500_v38 = vld [vmem:[%s282_s5] sm:$0xff] }
 0x121   : > { %v502_v39 = vld [vmem:[%s282_s5 + $0x8] sm:$0xff]  ;;  %501 = vst [vmem:[%s487_s9] sm:$0xff] %v500_v38 }
 0x122   : > { %v504_v40 = vld [vmem:[%s282_s5 + $0x10] sm:$0xff]  ;;  %503 = vst [vmem:[%s487_s9 + $0x8] sm:$0xff] %v502_v39 }
 0x123   : > { %v506_v41 = vld [vmem:[%s282_s5 + $0x18] sm:$0xff]  ;;  %505 = vst [vmem:[%s487_s9 + $0x20] sm:$0xff] %v504_v40 }
 0x124   : > { %507 = vst [vmem:[%s487_s9 + $0x28] sm:$0xff] %v506_v41 }
 0x125 PF: > { %s12_s13 = sadd.s32 1, %s742_s13   ;;  %s861_s9 = smov %s730_s10 }
 0x126   : > { %p9_p11 = scmp.ge.s32.totalorder %s12_s13, 4   ;;  %s862_s10 = smov %s800_s19 }
 0x127   : > { %s863_s11 = smov %s738_s12  ;;  %s864_s12 = smov %s866_s14 }
 0x128   :  { %11 = sbr.rel (!%p9_p11) target bundleno = 3 (0x3), region = 135 }

// kernel: decoder_forward.40
= control target key start
LH: loop header
LB: loop body
LE: loop exit
PB: predicated region body
PF: predicated region fallthrough
CT: control target
= control target key end

     0   :  { %vm316_vm0 = vcmask 7168   ;;  %s485_s0 = inlined_call_operand.vmem [shape: f32[16,512], index: 0, kind: input, shape index: {}]   ;;  %s486_s1 = inlined_call_operand.vmem [shape: f32[16,512], index: 1, kind: input, shape index: {}]   ;;  %s487_s2 = inlined_call_operand.vmem [shape: f32[16,512], index: 2, kind: input, shape index: {}]   ;;  %s488_s3 = inlined_call_operand.vmem [shape: f32[16,512], index: 3, kind: input, shape index: {}]   ;;  %s489_s4 = inlined_call_operand.vmem [shape: f32[16,1], index: 4, kind: output, shape index: {0}]   ;;  %s490_s5 = inlined_call_operand.vmem [shape: f32[16,1], index: 5, kind: output, shape index: {1}]  }
   0x1   :  { %v39_v0 = vld [vmem:[%s485_s0] sm:$0xff]  ;;  %v40_v1 = vld [vmem:[%s485_s0 + $0x8] sm:$0xff]  ;;  %v41_v2 = vld [vmem:[%s485_s0 + $0x10] sm:$0xff] }
   0x2   :  { %v42_v3 = vld [vmem:[%s485_s0 + $0x18] sm:$0xff]  ;;  %v103_v4 = vld [vmem:[%s486_s1] sm:$0xff]  ;;  %v104_v5 = vld [vmem:[%s486_s1 + $0x8] sm:$0xff]  ;;  %v79_v6 = vmul.f32 %v39_v0, %v39_v0  ;;  %v80_v7 = vmul.f32 %v40_v1, %v40_v1  ;;  %v81_v8 = vmul.f32 %v41_v2, %v41_v2 }
   0x3   :  { %v105_v9 = vld [vmem:[%s486_s1 + $0x10] sm:$0xff]  ;;  %v106_v10 = vld [vmem:[%s486_s1 + $0x18] sm:$0xff]  ;;  %v119_v11 = vadd.f32 %v103_v4, %v39_v0  ;;  %v120_v12 = vadd.f32 %v104_v5, %v40_v1  ;;  %v82_v13 = vmul.f32 %v42_v3, %v42_v3  ;;  %v143_v14 = vmul.f32 %v103_v4, %v103_v4  ;;  %v167_v17 = vld [vmem:[%s487_s2] sm:$0xff] }
   0x4   :  { %v121_v15 = vadd.f32 %v105_v9, %v41_v2  ;;  %v122_v16 = vadd.f32 %v106_v10, %v42_v3  ;;  %v168_v18 = vld [vmem:[%s487_s2 + $0x8] sm:$0xff]  ;;  %v144_v19 = vmul.f32 %v104_v5, %v104_v5  ;;  %v145_v20 = vmul.f32 %v105_v9, %v105_v9  ;;  %v169_v21 = vld [vmem:[%s487_s2 + $0x10] sm:$0xff]  ;;  %v170_v22 = vld [vmem:[%s487_s2 + $0x18] sm:$0xff] }
   0x5   :  { %v183_v23 = vadd.f32 %v167_v17, %v119_v11  ;;  %v184_v24 = vadd.f32 %v168_v18, %v120_v12  ;;  %v146_v25 = vmul.f32 %v106_v10, %v106_v10  ;;  %v151_v26 = vadd.f32 %v143_v14, %v79_v6  ;;  %v231_v29 = vld [vmem:[%s488_s3] sm:$0xff]  ;;  %v232_v30 = vld [vmem:[%s488_s3 + $0x8] sm:$0xff]  ;;  %v233_v33 = vld [vmem:[%s488_s3 + $0x10] sm:$0xff] }
   0x6   :  { %v185_v27 = vadd.f32 %v169_v21, %v121_v15  ;;  %v186_v28 = vadd.f32 %v170_v22, %v122_v16  ;;  %v152_v31 = vadd.f32 %v144_v19, %v80_v7  ;;  %v153_v32 = vadd.f32 %v145_v20, %v81_v8  ;;  %v234_v34 = vld [vmem:[%s488_s3 + $0x18] sm:$0xff]  ;;  %v43_v51 = vld [vmem:[%s485_s0 + $0x20] sm:$0xff]  ;;  %v44_v52 = vld [vmem:[%s485_s0 + $0x28] sm:$0xff] }
   0x7   :  { %v247_v35 = vadd.f32 %v231_v29, %v183_v23  ;;  %v248_v36 = vadd.f32 %v232_v30, %v184_v24  ;;  %v154_v37 = vadd.f32 %v146_v25, %v82_v13  ;;  %v207_v38 = vmul.f32 %v167_v17, %v167_v17  ;;  %v45_v57 = vld [vmem:[%s485_s0 + $0x30] sm:$0xff]  ;;  %v107_v58 = vld [vmem:[%s486_s1 + $0x20] sm:$0xff]  ;;  %v108_v59 = vld [vmem:[%s486_s1 + $0x28] sm:$0xff] }
   0x8   :  { %v249_v39 = vadd.f32 %v233_v33, %v185_v27  ;;  %v250_v40 = vadd.f32 %v234_v34, %v186_v28  ;;  %v208_v41 = vmul.f32 %v168_v18, %v168_v18  ;;  %v209_v42 = vmul.f32 %v169_v21, %v169_v21  ;;  %v46_v62 = vld [vmem:[%s485_s0 + $0x38] sm:$0xff]  ;;  %v109_v63 = vld [vmem:[%s486_s1 + $0x30] sm:$0xff]  ;;  %v171_v7 = vld [vmem:[%s487_s2 + $0x20] sm:$0xff] }
   0x9   :  { %v306_v43 = vadd.f32 %v248_v36, %v247_v35  ;;  %v210_v44 = vmul.f32 %v170_v22, %v170_v22  ;;  %v215_v45 = vadd.f32 %v207_v38, %v151_v26  ;;  %v271_v46 = vmul.f32 %v231_v29, %v231_v29  ;;  %v110_v0 = vld [vmem:[%s486_s1 + $0x38] sm:$0xff]  ;;  %v172_v8 = vld [vmem:[%s487_s2 + $0x28] sm:$0xff]  ;;  %v173_v10 = vld [vmem:[%s487_s2 + $0x30] sm:$0xff] }
   0xa   :  { %v216_v47 = vadd.f32 %v208_v41, %v152_v31  ;;  %v217_v48 = vadd.f32 %v209_v42, %v153_v32  ;;  %v272_v49 = vmul.f32 %v232_v30, %v232_v30  ;;  %v273_v50 = vmul.f32 %v233_v33, %v233_v33  ;;  %v174_v11 = vld [vmem:[%s487_s2 + $0x38] sm:$0xff]  ;;  %v235_v17 = vld [vmem:[%s488_s3 + $0x20] sm:$0xff]  ;;  %v236_v18 = vld [vmem:[%s488_s3 + $0x28] sm:$0xff] }
   0xb   :  { %v307_v53 = vadd.f32 %v306_v43, %v249_v39  ;;  %v218_v54 = vadd.f32 %v210_v44, %v154_v37  ;;  %v274_v55 = vmul.f32 %v234_v34, %v234_v34  ;;  %v279_v56 = vadd.f32 %v271_v46, %v215_v45  ;;  %v237_v22 = vld [vmem:[%s488_s3 + $0x30] sm:$0xff]  ;;  %v238_v23 = vld [vmem:[%s488_s3 + $0x38] sm:$0xff] }
   0xc   :  { %v280_v60 = vadd.f32 %v272_v49, %v216_v47  ;;  %v281_v61 = vadd.f32 %v273_v50, %v217_v48  ;;  %v123_v1 = vadd.f32 %v107_v58, %v43_v51  ;;  %v124_v2 = vadd.f32 %v108_v59, %v44_v52 }
   0xd   :  { %v308_v3 = vadd.f32 %v307_v53, %v250_v40  ;;  %v282_v4 = vadd.f32 %v274_v55, %v218_v54  ;;  %v125_v5 = vadd.f32 %v109_v63, %v45_v57  ;;  %v126_v6 = vadd.f32 %v110_v0, %v46_v62 }
   0xe   :  { %v327_v9 = vadd.f32 %v280_v60, %v279_v56  ;;  %v187_v12 = vadd.f32 %v171_v7, %v123_v1  ;;  %v188_v13 = vadd.f32 %v172_v8, %v124_v2  ;;  %v83_v14 = vmul.f32 %v43_v51, %v43_v51 }
   0xf   :  { %309 = vadd.xlane.f32.xlu0 %v308_v3  ;;  %v189_v15 = vadd.f32 %v173_v10, %v125_v5  ;;  %v190_v16 = vadd.f32 %v174_v11, %v126_v6  ;;  %v84_v19 = vmul.f32 %v44_v52, %v44_v52  ;;  %v85_v20 = vmul.f32 %v45_v57, %v45_v57 }
  0x10   :  { %v328_v21 = vadd.f32 %v327_v9, %v281_v61  ;;  %v251_v24 = vadd.f32 %v235_v17, %v187_v12  ;;  %v252_v25 = vadd.f32 %v236_v18, %v188_v13  ;;  %v86_v26 = vmul.f32 %v46_v62, %v46_v62 }
  0x11   :  { %v253_v27 = vadd.f32 %v237_v22, %v189_v15  ;;  %v254_v28 = vadd.f32 %v238_v23, %v190_v16  ;;  %v147_v29 = vmul.f32 %v107_v58, %v107_v58  ;;  %v148_v30 = vmul.f32 %v108_v59, %v108_v59 }
  0x12   :  { %v329_v31 = vadd.f32 %v328_v21, %v282_v4  ;;  %v311_v32 = vadd.f32 %v252_v25, %v251_v24  ;;  %v149_v33 = vmul.f32 %v109_v63, %v109_v63  ;;  %v150_v34 = vmul.f32 %v110_v0, %v110_v0 }
  0x13   :  { %v155_v35 = vadd.f32 %v147_v29, %v83_v14  ;;  %v156_v36 = vadd.f32 %v148_v30, %v84_v19  ;;  %v211_v37 = vmul.f32 %v171_v7, %v171_v7  ;;  %v212_v38 = vmul.f32 %v172_v8, %v172_v8 }
  0x14   :  { %330 = vadd.xlane.f32.xlu1 %v329_v31  ;;  %v312_v39 = vadd.f32 %v311_v32, %v253_v27  ;;  %v157_v40 = vadd.f32 %v149_v33, %v85_v20  ;;  %v158_v41 = vadd.f32 %v150_v34, %v86_v26  ;;  %v213_v42 = vmul.f32 %v173_v10, %v173_v10 }
  0x15   :  { %v214_v43 = vmul.f32 %v174_v11, %v174_v11  ;;  %v219_v44 = vadd.f32 %v211_v37, %v155_v35  ;;  %v220_v45 = vadd.f32 %v212_v38, %v156_v36  ;;  %v275_v46 = vmul.f32 %v235_v17, %v235_v17 }
  0x16   :  { %v313_v47 = vadd.f32 %v312_v39, %v254_v28  ;;  %v221_v48 = vadd.f32 %v213_v42, %v157_v40  ;;  %v276_v49 = vmul.f32 %v236_v18, %v236_v18  ;;  %v277_v50 = vmul.f32 %v237_v22, %v237_v22 }
  0x17   :  { %v222_v51 = vadd.f32 %v214_v43, %v158_v41  ;;  %v278_v52 = vmul.f32 %v238_v23, %v238_v23  ;;  %v283_v53 = vadd.f32 %v275_v46, %v219_v44 }
  0x18   :  { %314 = vadd.xlane.f32.xlu0 %v313_v47  ;;  %v284_v54 = vadd.f32 %v276_v49, %v220_v45  ;;  %v285_v55 = vadd.f32 %v277_v50, %v221_v48 }
  0x19   :  { %v286_v56 = vadd.f32 %v278_v52, %v222_v51 }
  0x1a   :  { %v332_v57 = vadd.f32 %v284_v54, %v283_v53 }
  0x1c   :  { %v333_v58 = vadd.f32 %v332_v57, %v285_v55 }
  0x1e   :  { %v334_v59 = vadd.f32 %v333_v58, %v286_v56 }
  0x20   :  { %335 = vadd.xlane.f32.xlu1 %v334_v59 }
  0x9c   :  { %v310_v60 = vpop.xlane.xlu0 %309 }
  0x9d   :  { %317 = vst.msk [vmem:[%s489_s4] sm:$0xff] %vm316_vm0, %v310_v60 }
  0xa1   :  { %v331_v61 = vpop.xlane.xlu1 %330 }
  0xa2   :  { %337 = vst.msk [vmem:[%s490_s5] sm:$0xff] %vm316_vm0, %v331_v61 }
  0xa5   :  { %v315_v62 = vpop.xlane.xlu0 %314 }
  0xa6   :  { %318 = vst.msk [vmem:[%s489_s4 + $0x8] sm:$0xff] %vm316_vm0, %v315_v62 }
  0xad   :  { %v336_v63 = vpop.xlane.xlu1 %335 }
  0xae   :  { %338 = vst.msk [vmem:[%s490_s5 + $0x8] sm:$0xff] %vm316_vm0, %v336_v63 }

// kernel: decoder_forward.41
= control target key start
LH: loop header
LB: loop body
LE: loop exit
PB: predicated region body
PF: predicated region fallthrough
CT: control target
= control target key end

     0   :  { %s967_s9 = smov 0   ;;  %s969_s10 = smov 0   ;;  %s1145_s0 = inlined_call_operand.vmem [shape: bf16[8,64], index: 0, kind: input, shape index: {}]   ;;  %s1146_s1 = inlined_call_operand.vmem [shape: bf16[64,2048], index: 1, kind: input, shape index: {}]   ;;  %s1147_s2 = inlined_call_operand.vmem [shape: f32[8,2048], index: 2, kind: output, shape index: {}]  }
   0x1   :  { %s971_s11 = smov 0   ;;  %s973_s12 = smov 0  }
   0x2   :  { %s975_s13 = smov 0  }
   0x3 LB: > { %s27_s14 = sadd.s32 1, %s945_s12  ;;  %p75_p1 = scmp.ne.s32.totalorder %s937_s10, %s933_s9  ;;  %s949_s13 = sphi %s975_s13, %s12_s13   ;;  %s945_s12 = sphi %s973_s12, %s1151_s12   ;;  %s941_s11 = sphi %s971_s11, %s1150_s11   ;;  %s937_s10 = sphi %s969_s10, %s1149_s10   ;;  %s933_s9 = sphi %s967_s9, %s1148_s9  }
   0x4   : > { %p29_p0 = scmp.ge.s32.totalorder %s27_s14, 2  ;;  %p76_p2 = scmp.eq.s32.totalorder %s949_s13, 0 }
   0x5   : > { %s68_s16 = sadd.s32 1, %s937_s10  ;;  %p823_p5 = scmp.ge.s32.totalorder %s949_s13, 2 }
   0x6   : > { %s1153_s14 = smov (%p29_p0, %s27_s14), 0  ;;  %p77_p3 = por %p76_p2, %p75_p1 }
   0x7   : > { %s64_s15 = ssub.s32 %s945_s12, %s1153_s14  ;;  %139 = sbr.rel (%p823_p5) target bundleno = 34 (0x22), region = 20 }
   0x8   : > { %p66_p4 = scmp.eq.s32.totalorder %s64_s15, 0 }
   0xa   : > { %s1002_s17 = scalar_select %p66_p4, %s937_s10, %s68_s16  }
   0xe   : > { %142 = sbr.rel (!%p77_p3) target bundleno = 34 (0x22), region = 24  ;;  %s144_s18 = sand.u32 (%p77_p3), 1, %s937_s10  }
   0xf   : > { %s869_s19 = sshll.u32 (%p77_p3), %s945_s12, 5  ;;  %s824_s20 = sshll.u32 (%p77_p3), %s144_s18, 8 }
  0x10   : > { %s1010_s23 = scalar_lea.vmem (%p77_p3), %s1146_s1, %s869_s19  ;;  %s1015_s24 = scalar_lea.vmem (%p77_p3), [#allocation3], %s824_s20 }
  0x11   : > { %v165_v0 = vld [vmem:[%s1010_s23] sm:$0xff] (%p77_p3)  ;;  %v167_v1 = vld [vmem:[%s1010_s23 + $0x8] sm:$0xff] (%p77_p3)  ;;  %v169_v2 = vld [vmem:[%s1010_s23 + $0x10] sm:$0xff] (%p77_p3) }
  0x12   : > { %166 = vst [vmem:[%s1015_s24] sm:$0xff] (%p77_p3), %v165_v0  ;;  %168 = vst [vmem:[%s1015_s24 + $0x8] sm:$0xff] (%p77_p3), %v167_v1  ;;  %v171_v3 = vld [vmem:[%s1010_s23 + $0x18] sm:$0xff] (%p77_p3)  ;;  %v173_v4 = vld [vmem:[%s1010_s23 + $0x40] sm:$0xff] (%p77_p3) }
  0x13   : > { %170 = vst [vmem:[%s1015_s24 + $0x10] sm:$0xff] (%p77_p3), %v169_v2  ;;  %v175_v5 = vld [vmem:[%s1010_s23 + $0x48] sm:$0xff] (%p77_p3)  ;;  %172 = vst [vmem:[%s1015_s24 + $0x18] sm:$0xff] (%p77_p3), %v171_v3  ;;  %v177_v6 = vld [vmem:[%s1010_s23 + $0x50] sm:$0xff] (%p77_p3) }
  0x14   : > { %174 = vst [vmem:[%s1015_s24 + $0x20] sm:$0xff] (%p77_p3), %v173_v4  ;;  %176 = vst [vmem:[%s1015_s24 + $0x28] sm:$0xff] (%p77_p3), %v175_v5  ;;  %v179_v7 = vld [vmem:[%s1010_s23 + $0x58] sm:$0xff] (%p77_p3)  ;;  %v181_v8 = vld [vmem:[%s1010_s23 + $0x80] sm:$0xff] (%p77_p3) }
  0x15   : > { %178 = vst [vmem:[%s1015_s24 + $0x30] sm:$0xff] %v177_v6  ;;  %180 = vst [vmem:[%s1015_s24 + $0x38] sm:$0xff] %v179_v7  ;;  %v183_v9 = vld [vmem:[%s1010_s23 + $0x88] sm:$0xff]  ;;  %v185_v10 = vld [vmem:[%s1010_s23 + $0x90] sm:$0xff] }
  0x16   : > { %182 = vst [vmem:[%s1015_s24 + $0x40] sm:$0xff] %v181_v8  ;;  %v187_v11 = vld [vmem:[%s1010_s23 + $0x98] sm:$0xff]  ;;  %184 = vst [vmem:[%s1015_s24 + $0x48] sm:$0xff] %v183_v9  ;;  %v189_v12 = vld [vmem:[%s1010_s23 + $0xc0] sm:$0xff] }
  0x17   : > { %186 = vst [vmem:[%s1015_s24 + $0x50] sm:$0xff] %v185_v10  ;;  %188 = vst [vmem:[%s1015_s24 + $0x58] sm:$0xff] %v187_v11  ;;  %v191_v13 = vld [vmem:[%s1010_s23 + $0xc8] sm:$0xff]  ;;  %v193_v14 = vld [vmem:[%s1010_s23 + $0xd0] sm:$0xff] }
  0x18   : > { %190 = vst [vmem:[%s1015_s24 + $0x60] sm:$0xff] %v189_v12  ;;  %192 = vst [vmem:[%s1015_s24 + $0x68] sm:$0xff] %v191_v13  ;;  %v195_v15 = vld [vmem:[%s1010_s23 + $0xd8] sm:$0xff]  ;;  %v197_v16 = vld [vmem:[%s1010_s23 + $0x100] sm:$0xff] }
  0x19   : > { %194 = vst [vmem:[%s1015_s24 + $0x70] sm:$0xff] %v193_v14  ;;  %v199_v17 = vld [vmem:[%s1010_s23 + $0x108] sm:$0xff]  ;;  %196 = vst [vmem:[%s1015_s24 + $0x78] sm:$0xff] %v195_v15  ;;  %v201_v18 = vld [vmem:[%s1010_s23 + $0x110] sm:$0xff] }
  0x1a   : > { %198 = vst [vmem:[%s1015_s24 + $0x80] sm:$0xff] %v197_v16  ;;  %200 = vst [vmem:[%s1015_s24 + $0x88] sm:$0xff] %v199_v17  ;;  %v203_v19 = vld [vmem:[%s1010_s23 + $0x118] sm:$0xff]  ;;  %v205_v20 = vld [vmem:[%s1010_s23 + $0x140] sm:$0xff] }
  0x1b   : > { %202 = vst [vmem:[%s1015_s24 + $0x90] sm:$0xff] %v201_v18  ;;  %204 = vst [vmem:[%s1015_s24 + $0x98] sm:$0xff] %v203_v19  ;;  %v207_v21 = vld [vmem:[%s1010_s23 + $0x148] sm:$0xff]  ;;  %v209_v22 = vld [vmem:[%s1010_s23 + $0x150] sm:$0xff] }
  0x1c   : > { %206 = vst [vmem:[%s1015_s24 + $0xa0] sm:$0xff] %v205_v20  ;;  %v211_v23 = vld [vmem:[%s1010_s23 + $0x158] sm:$0xff]  ;;  %208 = vst [vmem:[%s1015_s24 + $0xa8] sm:$0xff] %v207_v21  ;;  %v213_v24 = vld [vmem:[%s1010_s23 + $0x180] sm:$0xff] }
  0x1d   : > { %210 = vst [vmem:[%s1015_s24 + $0xb0] sm:$0xff] %v209_v22  ;;  %212 = vst [vmem:[%s1015_s24 + $0xb8] sm:$0xff] %v211_v23  ;;  %v215_v25 = vld [vmem:[%s1010_s23 + $0x188] sm:$0xff]  ;;  %v217_v26 = vld [vmem:[%s1010_s23 + $0x190] sm:$0xff] }
  0x1e   : > { %214 = vst [vmem:[%s1015_s24 + $0xc0] sm:$0xff] %v213_v24  ;;  %216 = vst [vmem:[%s1015_s24 + $0xc8] sm:$0xff] %v215_v25  ;;  %v219_v27 = vld [vmem:[%s1010_s23 + $0x198] sm:$0xff]  ;;  %v221_v28 = vld [vmem:[%s1010_s23 + $0x1c0] sm:$0xff] }
  0x1f   : > { %218 = vst [vmem:[%s1015_s24 + $0xd0] sm:$0xff] %v217_v26  ;;  %v223_v29 = vld [vmem:[%s1010_s23 + $0x1c8] sm:$0xff]  ;;  %220 = vst [vmem:[%s1015_s24 + $0xd8] sm:$0xff] %v219_v27  ;;  %v225_v30 = vld [vmem:[%s1010_s23 + $0x1d0] sm:$0xff] }
  0x20   : > { %222 = vst [vmem:[%s1015_s24 + $0xe0] sm:$0xff] %v221_v28  ;;  %224 = vst [vmem:[%s1015_s24 + $0xe8] sm:$0xff] %v223_v29  ;;  %v227_v31 = vld [vmem:[%s1010_s23 + $0x1d8] sm:$0xff] }
  0x21   : > { %226 = vst [vmem:[%s1015_s24 + $0xf0] sm:$0xff] %v225_v30  ;;  %228 = vst [vmem:[%s1015_s24 + $0xf8] sm:$0xff] %v227_v31 }
  0x22 PF: > { %p827_p6 = scmp.ge.s32.totalorder %s949_s13, 1  ;;  %p233_p7 = scmp.lt.s32.totalorder %s949_s13, 3 }
  0x24   : > { %p234_p8 = pnand %p827_p6, %p233_p7 }
  0x25   : > { %s240_s25 = sand.u32 (!%p234_p8), 1, %s933_s9   ;;  %v951_v32 = vmov (!%p234_p8), 0   ;;  %v312_v11 = vld [vmem:[%s1145_s0] sm:$0xf] (!%p234_p8)  ;;  %vm505_vm0 = vcmask (!%p234_p8), 523264   ;;  %s829_s30 = sshll.u32 (!%p234_p8), %s941_s11, 3 }
  0x26   : > { %237 = sbr.rel (%p234_p8) target bundleno = 291 (0x123), region = 47  ;;  %s828_s26 = sshll.u32 (!%p234_p8), %s240_s25, 8  ;;  %541 = vmatprep.mubr.bf16.mxu0 (!%p234_p8), %v951_v32  ;;  %582 = vmatprep.mubr.bf16.mxu1 (!%p234_p8), %v951_v32 }
  0x27   : > { %s1083_s27 = scalar_lea.vmem (!%p234_p8), [#allocation3], %s828_s26  ;;  %p284_p9 = scmp.lt.s32.totalorder (!%p234_p8), %s829_s30, 15 }
  0x28   : > { %v313_v33 = vld [vmem:[%s1083_s27] sm:$0xff] (!%p234_p8)  ;;  %v314_v35 = vld [vmem:[%s1083_s27 + $0x8] sm:$0xff] (!%p234_p8)  ;;  %v315_v63 = vld [vmem:[%s1083_s27 + $0x10] sm:$0xff] (!%p234_p8) }
  0x29   : > { %v317_v34 = vld [vmem:[%s1083_s27 + $0x20] sm:$0xff] (!%p234_p8)  ;;  %v318_v37 = vld [vmem:[%s1083_s27 + $0x28] sm:$0xff] (!%p234_p8)  ;;  %v319_v0 = vld [vmem:[%s1083_s27 + $0x30] sm:$0xff] (!%p234_p8) }
  0x2a   : > { %v832_v36 = vcombine.high (!%p234_p8), %v313_v33, %v317_v34  ;;  %v831_v38 = vcombine.low (!%p234_p8), %v313_v33, %v317_v34  ;;  %v321_v39 = vld [vmem:[%s1083_s27 + $0x40] sm:$0xff] (!%p234_p8)  ;;  %v834_v41 = vcombine.high (!%p234_p8), %v314_v35, %v318_v37  ;;  %v833_v42 = vcombine.low (!%p234_p8), %v314_v35, %v318_v37  ;;  %v322_v44 = vld [vmem:[%s1083_s27 + $0x48] sm:$0xff] (!%p234_p8)  ;;  %v316_v1 = vld [vmem:[%s1083_s27 + $0x18] sm:$0xff] (!%p234_p8) }
  0x2b   : > { %v325_v40 = vld [vmem:[%s1083_s27 + $0x60] sm:$0xff] (!%p234_p8)  ;;  %v326_v45 = vld [vmem:[%s1083_s27 + $0x68] sm:$0xff] (!%p234_p8)  ;;  %v320_v2 = vld [vmem:[%s1083_s27 + $0x38] sm:$0xff] (!%p234_p8)  ;;  %v836_v5 = vcombine.high (!%p234_p8), %v315_v63, %v319_v0  ;;  %v835_v12 = vcombine.low (!%p234_p8), %v315_v63, %v319_v0 }
  0x2c   : > { %v840_v43 = vcombine.high (!%p234_p8), %v321_v39, %v325_v40  ;;  %v329_v46 = vld [vmem:[%s1083_s27 + $0x80] sm:$0xff] (!%p234_p8)  ;;  %509 = vmatprep.subr.bf16.mxu0 (!%p234_p8), %v832_v36  ;;  %v842_v47 = vcombine.high (!%p234_p8), %v322_v44, %v326_v45  ;;  %v330_v49 = vld [vmem:[%s1083_s27 + $0x88] sm:$0xff] (!%p234_p8)  ;;  %550 = vmatprep.subr.bf16.mxu1 (!%p234_p8), %v834_v41  ;;  %v839_v51 = vcombine.low (!%p234_p8), %v321_v39, %v325_v40  ;;  %v323_v7 = vld [vmem:[%s1083_s27 + $0x50] sm:$0xff] (!%p234_p8) }
  0x2d   : > { %v333_v48 = vld [vmem:[%s1083_s27 + $0xa0] sm:$0xff]  ;;  %v334_v50 = vld [vmem:[%s1083_s27 + $0xa8] sm:$0xff]  ;;  %510 = vmatpush1.bf16.msra.mxu0 %v831_v38  ;;  %551 = vmatpush1.bf16.msra.mxu1 %v833_v42  ;;  %v841_v52 = vcombine.low %v322_v44, %v326_v45  ;;  %v838_v6 = vcombine.high %v316_v1, %v320_v2  ;;  %v327_v8 = vld [vmem:[%s1083_s27 + $0x70] sm:$0xff]  ;;  %v837_v13 = vcombine.low %v316_v1, %v320_v2  ;;  %s1155_s30 = smov (!%p284_p9, %s829_s30), 15 }
  0x2e   : > { %511 = vmatprep.subr.bf16.mxu0 %v840_v43  ;;  %v848_v53 = vcombine.high %v329_v46, %v333_v48  ;;  %552 = vmatprep.subr.bf16.mxu1 %v842_v47  ;;  %v850_v54 = vcombine.high %v330_v49, %v334_v50  ;;  %v337_v55 = vld [vmem:[%s1083_s27 + $0xc0] sm:$0xff]  ;;  %v338_v57 = vld [vmem:[%s1083_s27 + $0xc8] sm:$0xff]  ;;  %v847_v59 = vcombine.low %v329_v46, %v333_v48  ;;  %v324_v9 = vld [vmem:[%s1083_s27 + $0x58] sm:$0xff]  ;;  %s830_s3 = sshll.u32 %s1155_s30, 3 }
  0x2f   : > { %v341_v56 = vld [vmem:[%s1083_s27 + $0xe0] sm:$0xff]  ;;  %v342_v58 = vld [vmem:[%s1083_s27 + $0xe8] sm:$0xff]  ;;  %v849_v60 = vcombine.low %v330_v49, %v334_v50  ;;  %v328_v10 = vld [vmem:[%s1083_s27 + $0x78] sm:$0xff]  ;;  %v844_v14 = vcombine.high %v323_v7, %v327_v8  ;;  %v843_v20 = vcombine.low %v323_v7, %v327_v8  ;;  %s289_s6 = scalar_lea.vmem %s1147_s2, %s830_s3 }
  0x30   : > { %v856_v61 = vcombine.high %v337_v55, %v341_v56  ;;  %v858_v62 = vcombine.high %v338_v57, %v342_v58  ;;  %v855_v3 = vcombine.low %v337_v55, %v341_v56  ;;  %v857_v4 = vcombine.low %v338_v57, %v342_v58  ;;  %v331_v16 = vld [vmem:[%s1083_s27 + $0x90] sm:$0xff]  ;;  %v332_v18 = vld [vmem:[%s1083_s27 + $0x98] sm:$0xff] }
  0x31   : > { %512 = vmatpush1.bf16.msra.mxu0 %v839_v51  ;;  %553 = vmatpush1.bf16.msra.mxu1 %v841_v52  ;;  %v846_v15 = vcombine.high %v324_v9, %v328_v10  ;;  %v335_v17 = vld [vmem:[%s1083_s27 + $0xb0] sm:$0xff]  ;;  %v336_v19 = vld [vmem:[%s1083_s27 + $0xb8] sm:$0xff]  ;;  %v845_v21 = vcombine.low %v324_v9, %v328_v10 }
  0x32   : > { %513 = vmatprep.subr.bf16.mxu0 %v848_v53  ;;  %554 = vmatprep.subr.bf16.mxu1 %v850_v54  ;;  %v852_v22 = vcombine.high %v331_v16, %v335_v17  ;;  %v854_v23 = vcombine.high %v332_v18, %v336_v19  ;;  %v339_v24 = vld [vmem:[%s1083_s27 + $0xd0] sm:$0xff]  ;;  %v340_v26 = vld [vmem:[%s1083_s27 + $0xd8] sm:$0xff]  ;;  %v851_v28 = vcombine.low %v331_v16, %v335_v17 }
  0x33   : > { %v343_v25 = vld [vmem:[%s1083_s27 + $0xf0] sm:$0xff]  ;;  %v344_v27 = vld [vmem:[%s1083_s27 + $0xf8] sm:$0xff]  ;;  %v853_v29 = vcombine.low %v332_v18, %v336_v19 }
  0x34   : > { %v860_v30 = vcombine.high %v339_v24, %v343_v25  ;;  %v862_v31 = vcombine.high %v340_v26, %v344_v27  ;;  %v859_v33 = vcombine.low %v339_v24, %v343_v25  ;;  %v861_v34 = vcombine.low %v340_v26, %v344_v27 }
  0x35   : > { %514 = vmatpush1.bf16.msra.mxu0 %v847_v59  ;;  %555 = vmatpush1.bf16.msra.mxu1 %v849_v60 }
  0x36   : > { %515 = vmatprep.subr.bf16.mxu0 %v856_v61  ;;  %556 = vmatprep.subr.bf16.mxu1 %v858_v62 }
  0x39   : > { %516 = vmatpush1.bf16.msra.mxu0 %v855_v3  ;;  %557 = vmatpush1.bf16.msra.mxu1 %v857_v4 }
  0x3a   : > { %591 = vmatprep.subr.bf16.mxu0 %v836_v5  ;;  %632 = vmatprep.subr.bf16.mxu1 %v838_v6 }
  0x3c   : > { %863 = vmatmul.mubr.msk.bf16.vlgmr.msra.gmra.mrb[0].mxu0 %vm505_vm0, %v312_v11  ;;  %864 = vmatmul.mubr.msk.bf16.vlgmr.msra.gmra.mrb[0].mxu1 %vm505_vm0, %v312_v11 }
  0x3d   : > { %592 = vmatpush1.bf16.msra.mxu0 %v835_v12  ;;  %633 = vmatpush1.bf16.msra.mxu1 %v837_v13 }
  0x3e   : > { %593 = vmatprep.subr.bf16.mxu0 %v844_v14  ;;  %634 = vmatprep.subr.bf16.mxu1 %v846_v15 }
  0x3f   : > { %623 = vmatprep.mubr.bf16.mxu0 %v951_v32  ;;  %664 = vmatprep.mubr.bf16.mxu1 %v951_v32 }
  0x41   : > { %594 = vmatpush1.bf16.msra.mxu0 %v843_v20  ;;  %635 = vmatpush1.bf16.msra.mxu1 %v845_v21 }
  0x42   : > { %595 = vmatprep.subr.bf16.mxu0 %v852_v22  ;;  %636 = vmatprep.subr.bf16.mxu1 %v854_v23 }
  0x45   : > { %596 = vmatpush1.bf16.msra.mxu0 %v851_v28  ;;  %637 = vmatpush1.bf16.msra.mxu1 %v853_v29 }
  0x46   : > { %597 = vmatprep.subr.bf16.mxu0 %v860_v30  ;;  %638 = vmatprep.subr.bf16.mxu1 %v862_v31 }
  0x49   : > { %598 = vmatpush1.bf16.msra.mxu0 %v859_v33  ;;  %639 = vmatpush1.bf16.msra.mxu1 %v861_v34 }
  0x4c   : > { %865 = vmatmul.mubr.msk.bf16.vlgmr.msra.gmra.mrb[4].mxu0 %vm505_vm0, %v312_v11  ;;  %866 = vmatmul.mubr.msk.bf16.vlgmr.msra.gmra.mrb[4].mxu1 %vm505_vm0, %v312_v11 }
 0x10f   : > { %v543_v32 = vpop.f32.mrb[0].mxu0  ;;  %v584_v35 = vpop.f32.mrb[0].mxu1 }
 0x110   : > { %700 = vst [vmem:[%s289_s6] sm:$0xff] %v543_v32  ;;  %v545_v36 = vpop.f32.mrb[1].mxu0  ;;  %702 = vst [vmem:[%s289_s6 + $0x10] sm:$0xff] %v584_v35  ;;  %v586_v37 = vpop.f32.mrb[1].mxu1 }
 0x111   : > { %701 = vst [vmem:[%s289_s6 + $0x8] sm:$0xff] %v545_v36  ;;  %v547_v38 = vpop.f32.mrb[2].mxu0  ;;  %703 = vst [vmem:[%s289_s6 + $0x18] sm:$0xff] %v586_v37  ;;  %v588_v39 = vpop.f32.mrb[2].mxu1 }
 0x112   : > { %v548_v40 = vpop.f32.mrb[3].mxu0  ;;  %v589_v41 = vpop.f32.mrb[3].mxu1 }
 0x11f   : > { %v625_v42 = vpop.f32.mrb[4].mxu0  ;;  %v666_v43 = vpop.f32.mrb[4].mxu1 }
 0x120   : > { %704 = vst [vmem:[%s289_s6 + $0x20] sm:$0xff] %v625_v42  ;;  %v627_v44 = vpop.f32.mrb[5].mxu0  ;;  %706 = vst [vmem:[%s289_s6 + $0x30] sm:$0xff] %v666_v43  ;;  %v668_v45 = vpop.f32.mrb[5].mxu1 }
 0x121   : > { %705 = vst [vmem:[%s289_s6 + $0x28] sm:$0xff] %v627_v44  ;;  %v629_v46 = vpop.f32.mrb[6].mxu0  ;;  %707 = vst [vmem:[%s289_s6 + $0x38] sm:$0xff] %v668_v45  ;;  %v670_v47 = vpop.f32.mrb[6].mxu1 }
 0x122   : > { %v630_v48 = vpop.f32.mrb[7].mxu0  ;;  %v671_v49 = vpop.f32.mrb[7].mxu1 }
 0x123 PF: > { %s12_s13 = sadd.s32 1, %s949_s13   ;;  %s1148_s9 = smov %s937_s10 }
 0x124   : > { %p9_p10 = scmp.ge.s32.totalorder %s12_s13, 4   ;;  %s1149_s10 = smov %s1002_s17 }
 0x125   : > { %s1150_s11 = smov %s945_s12  ;;  %s1151_s12 = smov %s1153_s14 }
 0x126   :  { %11 = sbr.rel (!%p9_p10) target bundleno = 3 (0x3), region = 97 }

// kernel: decoder_forward.45
= control target key start
LH: loop header
LB: loop body
LE: loop exit
PB: predicated region body
PF: predicated region fallthrough
CT: control target
= control target key end

     0   :  { %vm603_vm0 = vcmask 7168   ;;  %s1197_s0 = inlined_call_operand.vmem [shape: f32[8,2048], index: 0, kind: input, shape index: {}]   ;;  %s1198_s1 = inlined_call_operand.vmem [shape: f32[8,2048], index: 1, kind: input, shape index: {}]   ;;  %s1199_s2 = inlined_call_operand.vmem [shape: f32[8,2048], index: 2, kind: input, shape index: {}]   ;;  %s1200_s3 = inlined_call_operand.vmem [shape: f32[8,2048], index: 3, kind: input, shape index: {}]   ;;  %s1201_s4 = inlined_call_operand.vmem [shape: f32[8,1], index: 4, kind: output, shape index: {0}]   ;;  %s1202_s5 = inlined_call_operand.vmem [shape: f32[8,1], index: 5, kind: output, shape index: {1}]  }
   0x1   :  { %v55_v0 = vld [vmem:[%s1197_s0] sm:$0xff]  ;;  %v683_v1 = vld [vmem:[%s1197_s0 + $0x8] sm:$0xff]  ;;  %v688_v2 = vld [vmem:[%s1197_s0 + $0x10] sm:$0xff] }
   0x2   :  { %v693_v3 = vld [vmem:[%s1198_s1] sm:$0xff]  ;;  %v698_v4 = vld [vmem:[%s1198_s1 + $0x8] sm:$0xff]  ;;  %v703_v5 = vld [vmem:[%s1198_s1 + $0x10] sm:$0xff]  ;;  %v135_v61 = vmul.f32 %v55_v0, %v55_v0 }
   0x3   :  { %v708_v6 = vld [vmem:[%s1197_s0 + $0x18] sm:$0xff]  ;;  %v215_v8 = vadd.f32 %v693_v3, %v55_v0  ;;  %v216_v9 = vadd.f32 %v698_v4, %v683_v1  ;;  %v217_v10 = vadd.f32 %v703_v5, %v688_v2  ;;  %v723_v11 = vld [vmem:[%s1197_s0 + $0x20] sm:$0xff]  ;;  %v740_v15 = vld [vmem:[%s1199_s2 + $0x8] sm:$0xff] }
   0x4   :  { %v713_v7 = vld [vmem:[%s1198_s1 + $0x18] sm:$0xff]  ;;  %v728_v12 = vld [vmem:[%s1198_s1 + $0x20] sm:$0xff]  ;;  %v745_v16 = vld [vmem:[%s1199_s2 + $0x10] sm:$0xff] }
   0x5   :  { %v733_v13 = vld [vmem:[%s1199_s2] sm:$0xff]  ;;  %v218_v14 = vadd.f32 %v713_v7, %v708_v6  ;;  %v750_v17 = vld [vmem:[%s1197_s0 + $0x28] sm:$0xff]  ;;  %v760_v19 = vld [vmem:[%s1199_s2 + $0x18] sm:$0xff]  ;;  %v219_v22 = vadd.f32 %v728_v12, %v723_v11  ;;  %v344_v24 = vadd.f32 %v740_v15, %v216_v9  ;;  %v345_v25 = vadd.f32 %v745_v16, %v217_v10 }
   0x6   :  { %v755_v18 = vld [vmem:[%s1198_s1 + $0x28] sm:$0xff]  ;;  %v765_v20 = vld [vmem:[%s1197_s0 + $0x30] sm:$0xff]  ;;  %v343_v23 = vadd.f32 %v733_v13, %v215_v8  ;;  %v780_v26 = vld [vmem:[%s1199_s2 + $0x20] sm:$0xff] }
   0x7   :  { %v770_v21 = vld [vmem:[%s1198_s1 + $0x30] sm:$0xff]  ;;  %v62_v27 = vld [vmem:[%s1197_s0 + $0x38] sm:$0xff]  ;;  %v220_v29 = vadd.f32 %v755_v18, %v750_v17  ;;  %v795_v30 = vld [vmem:[%s1199_s2 + $0x28] sm:$0xff]  ;;  %v346_v31 = vadd.f32 %v760_v19, %v218_v14  ;;  %v347_v37 = vadd.f32 %v780_v26, %v219_v22 }
   0x8   :  { %v788_v28 = vld [vmem:[%s1198_s1 + $0x38] sm:$0xff]  ;;  %v221_v32 = vadd.f32 %v770_v21, %v765_v20  ;;  %v803_v33 = vld [vmem:[%s1200_s3] sm:$0xff]  ;;  %v808_v34 = vld [vmem:[%s1200_s3 + $0x8] sm:$0xff] }
   0x9   :  { %v813_v35 = vld [vmem:[%s1200_s3 + $0x10] sm:$0xff]  ;;  %v63_v36 = vld [vmem:[%s1197_s0 + $0x40] sm:$0xff]  ;;  %v822_v38 = vld [vmem:[%s1200_s3 + $0x18] sm:$0xff]  ;;  %v471_v39 = vadd.f32 %v803_v33, %v343_v23  ;;  %v472_v40 = vadd.f32 %v808_v34, %v344_v24  ;;  %v222_v46 = vadd.f32 %v788_v28, %v62_v27  ;;  %v348_v47 = vadd.f32 %v795_v30, %v220_v29 }
   0xa   :  { %v473_v41 = vadd.f32 %v813_v35, %v345_v25  ;;  %v830_v42 = vld [vmem:[%s1198_s1 + $0x40] sm:$0xff]  ;;  %v835_v43 = vld [vmem:[%s1199_s2 + $0x30] sm:$0xff]  ;;  %v64_v45 = vld [vmem:[%s1197_s0 + $0x48] sm:$0xff]  ;;  %v474_v48 = vadd.f32 %v822_v38, %v346_v31  ;;  %v136_v23 = vmul.f32 %v683_v1, %v683_v1  ;;  %v911_v24 = vmul.f32 %v688_v2, %v688_v2 }
   0xb   :  { %v840_v44 = vld [vmem:[%s1200_s3 + $0x20] sm:$0xff]  ;;  %v586_v49 = vadd.f32 %v472_v40, %v471_v39  ;;  %v851_v50 = vld [vmem:[%s1198_s1 + $0x48] sm:$0xff]  ;;  %v856_v51 = vld [vmem:[%s1199_s2 + $0x38] sm:$0xff]  ;;  %v223_v54 = vadd.f32 %v830_v42, %v63_v36  ;;  %v349_v55 = vadd.f32 %v835_v43, %v221_v32  ;;  %v915_v25 = vmul.f32 %v708_v6, %v708_v6 }
   0xc   :  { %v861_v52 = vld [vmem:[%s1200_s3 + $0x28] sm:$0xff]  ;;  %v65_v53 = vld [vmem:[%s1197_s0 + $0x50] sm:$0xff]  ;;  %v475_v56 = vadd.f32 %v840_v44, %v347_v37  ;;  %v877_v59 = vld [vmem:[%s1199_s2 + $0x40] sm:$0xff]  ;;  %v224_v63 = vadd.f32 %v851_v50, %v64_v45  ;;  %v350_v8 = vadd.f32 %v856_v51, %v222_v46  ;;  %v919_v29 = vmul.f32 %v723_v11, %v723_v11 }
   0xd   :  { %v587_v57 = vadd.f32 %v586_v49, %v473_v41  ;;  %v872_v58 = vld [vmem:[%s1198_s1 + $0x50] sm:$0xff]  ;;  %v887_v62 = vld [vmem:[%s1197_s0 + $0x58] sm:$0xff]  ;;  %v476_v9 = vadd.f32 %v861_v52, %v348_v47  ;;  %v900_v0 = vld [vmem:[%s1199_s2 + $0x48] sm:$0xff]  ;;  %v351_v32 = vadd.f32 %v877_v59, %v223_v54  ;;  %v951_v41 = vmul.f32 %v750_v17, %v750_v17 }
   0xe   :  { %v882_v60 = vld [vmem:[%s1200_s3 + $0x30] sm:$0xff]  ;;  %v895_v14 = vld [vmem:[%s1198_s1 + $0x58] sm:$0xff]  ;;  %v924_v31 = vld [vmem:[%s1197_s0 + $0x60] sm:$0xff]  ;;  %v225_v2 = vadd.f32 %v872_v58, %v65_v53  ;;  %v955_v46 = vmul.f32 %v765_v20, %v765_v20  ;;  %v957_v47 = vmul.f32 %v62_v27, %v62_v27  ;;  %v352_v27 = vadd.f32 %v900_v0, %v224_v63 }
   0xf   :  { %1215 = vst [vmem:[#allocation4_spill] sm:$0xff] %v882_v60  ;;  %v588_v10 = vadd.f32 %v587_v57, %v474_v48  ;;  %1216 = vst [vmem:[#allocation5_spill] sm:$0xff] %v895_v14  ;;  %v905_v22 = vld [vmem:[%s1200_s3 + $0x38] sm:$0xff]  ;;  %v929_v1 = vld [vmem:[%s1198_s1 + $0x60] sm:$0xff]  ;;  %v477_v6 = vadd.f32 %v882_v60, %v349_v55  ;;  %v959_v48 = vmul.f32 %v63_v36, %v63_v36 }
  0x10   :  { %1217 = vst [vmem:[#allocation6_spill] sm:$0xff] %v905_v22  ;;  %1218 = vst [vmem:[#allocation7_spill] sm:$0xff] %v924_v31  ;;  %v937_v11 = vld [vmem:[%s1197_s0 + $0x68] sm:$0xff]  ;;  %v942_v39 = vld [vmem:[%s1199_s2 + $0x50] sm:$0xff]  ;;  %v226_v20 = vadd.f32 %v895_v14, %v887_v62  ;;  %v478_v36 = vadd.f32 %v905_v22, %v350_v8  ;;  %v992_v60 = vmul.f32 %v64_v45, %v64_v45 }
  0x11   :  { %1219 = vst [vmem:[#allocation8_spill] sm:$0xff] %v929_v1  ;;  %v589_v37 = vadd.f32 %v588_v10, %v475_v56  ;;  %1220 = vst [vmem:[#allocation9_spill] sm:$0xff] %v937_v11  ;;  %v947_v40 = vld [vmem:[%s1200_s3 + $0x40] sm:$0xff]  ;;  %v964_v49 = vld [vmem:[%s1197_s0 + $0x70] sm:$0xff]  ;;  %v227_v56 = vadd.f32 %v929_v1, %v924_v31  ;;  %v994_v14 = vmul.f32 %v65_v53, %v65_v53 }
  0x12   :  { %1221 = vst [vmem:[#allocation10_spill] sm:$0xff] %v947_v40  ;;  %1222 = vst [vmem:[#allocation11_spill] sm:$0xff] %v964_v49  ;;  %v969_v54 = vld [vmem:[%s1198_s1 + $0x68] sm:$0xff]  ;;  %v974_v17 = vld [vmem:[%s1198_s1 + $0x70] sm:$0xff]  ;;  %v263_v63 = vmul.f32 %v693_v3, %v693_v3  ;;  %v353_v53 = vadd.f32 %v942_v39, %v225_v2  ;;  %v265_v2 = vmul.f32 %v703_v5, %v703_v5 }
  0x13   :  { %1223 = vst [vmem:[#allocation12_spill] sm:$0xff] %v969_v54  ;;  %1224 = vst [vmem:[#allocation13_spill] sm:$0xff] %v974_v17  ;;  %v590_v55 = vadd.f32 %v589_v37, %v476_v9  ;;  %v985_v57 = vld [vmem:[%s1199_s2 + $0x58] sm:$0xff]  ;;  %v990_v10 = vld [vmem:[%s1200_s3 + $0x48] sm:$0xff]  ;;  %v479_v37 = vadd.f32 %v947_v40, %v351_v32  ;;  %v228_v1 = vadd.f32 %v969_v54, %v937_v11 }
  0x14   :  { %1225 = vst [vmem:[#allocation14_spill] sm:$0xff] %v994_v14  ;;  %v1001_v8 = vld [vmem:[%s1197_s0 + $0x78] sm:$0xff]  ;;  %v1011_v45 = vld [vmem:[%s1199_s2 + $0x60] sm:$0xff]  ;;  %v264_v14 = vmul.f32 %v698_v4, %v698_v4  ;;  %v229_v31 = vadd.f32 %v974_v17, %v964_v49  ;;  %v1024_v22 = vld [vmem:[%s1200_s3 + $0x50] sm:$0xff]  ;;  %v266_v32 = vmul.f32 %v713_v7, %v713_v7  ;;  %v480_v17 = vadd.f32 %v990_v10, %v352_v27 }
  0x15   :  { %1226 = vst [vmem:[#allocation15_spill] sm:$0xff] %v1001_v8  ;;  %v1006_v9 = vld [vmem:[%s1198_s1 + $0x78] sm:$0xff]  ;;  %v591_v3 = vadd.f32 %v590_v55, %v477_v6  ;;  %v1033_v4 = vld [vmem:[%s1199_s2 + $0x68] sm:$0xff]  ;;  %v1038_v6 = vld [vmem:[%s1199_s2 + $0x70] sm:$0xff]  ;;  %v354_v55 = vadd.f32 %v985_v57, %v226_v20  ;;  %v267_v5 = vmul.f32 %v728_v12, %v728_v12  ;;  %v355_v54 = vadd.f32 %v1011_v45, %v227_v56 }
  0x16   :  { %1227 = vst [vmem:[#allocation16_spill] sm:$0xff] %v1006_v9  ;;  %v230_v7 = vadd.f32 %v1006_v9, %v1001_v8  ;;  %v1050_v11 = vld [vmem:[%s1200_s3 + $0x58] sm:$0xff]  ;;  %v279_v40 = vadd.f32 %v263_v63, %v135_v61  ;;  %v391_v20 = vmul.f32 %v733_v13, %v733_v13  ;;  %v1057_v27 = vld [vmem:[%s1200_s3 + $0x60] sm:$0xff]  ;;  %v481_v12 = vadd.f32 %v1024_v22, %v353_v53 }
  0x17   :  { %v592_v49 = vadd.f32 %v591_v3, %v478_v36  ;;  %v280_v3 = vadd.f32 %v264_v14, %v136_v23  ;;  %v392_v56 = vmul.f32 %v740_v15, %v740_v15  ;;  %v356_v9 = vadd.f32 %v1033_v4, %v228_v1  ;;  %v1071_v63 = vld [vmem:[%s1199_s2 + $0x78] sm:$0xff]  ;;  %v1076_v14 = vld [vmem:[%s1200_s3 + $0x68] sm:$0xff] }
  0x18   :  { %v357_v8 = vadd.f32 %v1038_v6, %v229_v31  ;;  %v268_v61 = vmul.f32 %v755_v18, %v755_v18  ;;  %v269_v13 = vmul.f32 %v770_v21, %v770_v21  ;;  %v482_v15 = vadd.f32 %v1050_v11, %v354_v55 }
  0x19   :  { %v593_v36 = vadd.f32 %v592_v49, %v479_v37  ;;  %v281_v31 = vadd.f32 %v265_v2, %v911_v24  ;;  %v393_v18 = vmul.f32 %v745_v16, %v745_v16  ;;  %v483_v21 = vadd.f32 %v1057_v27, %v355_v54  ;;  %v1089_v37 = vld [vmem:[%s1200_s3 + $0x70] sm:$0xff]  ;;  %v1103_v2 = vld [vmem:[%s1200_s3 + $0x78] sm:$0xff] }
  0x1a   :  { %v282_v1 = vadd.f32 %v266_v32, %v915_v25  ;;  %v394_v49 = vmul.f32 %v760_v19, %v760_v19  ;;  %v407_v53 = vadd.f32 %v391_v20, %v279_v40  ;;  %v519_v24 = vmul.f32 %v803_v33, %v803_v33 }
  0x1b   :  { %v594_v23 = vadd.f32 %v593_v36, %v480_v17  ;;  %v408_v17 = vadd.f32 %v392_v56, %v280_v3  ;;  %v520_v16 = vmul.f32 %v808_v34, %v808_v34  ;;  %v358_v54 = vadd.f32 %v1071_v63, %v230_v7 }
  0x1c   :  { %v484_v25 = vadd.f32 %v1076_v14, %v356_v9  ;;  %v270_v19 = vmul.f32 %v788_v28, %v788_v28  ;;  %v283_v40 = vadd.f32 %v267_v5, %v919_v29  ;;  %v395_v33 = vmul.f32 %v780_v26, %v780_v26 }
  0x1d   :  { %v595_v55 = vadd.f32 %v594_v23, %v481_v12  ;;  %v409_v20 = vadd.f32 %v393_v18, %v281_v31  ;;  %v521_v34 = vmul.f32 %v813_v35, %v813_v35  ;;  %v485_v9 = vadd.f32 %v1089_v37, %v357_v8 }
  0x1e   :  { %v284_v7 = vadd.f32 %v268_v61, %v951_v41  ;;  %v396_v28 = vmul.f32 %v795_v30, %v795_v30  ;;  %v410_v29 = vadd.f32 %v394_v49, %v282_v1  ;;  %v522_v12 = vmul.f32 %v822_v38, %v822_v38  ;;  %v1228_v49 = vld [vmem:[#allocation4_spill] sm:$0xff] }
  0x1f   :  { %v596_v32 = vadd.f32 %v595_v55, %v482_v15  ;;  %v535_v36 = vadd.f32 %v519_v24, %v407_v53  ;;  %v536_v3 = vadd.f32 %v520_v16, %v408_v17  ;;  %v486_v26 = vadd.f32 %v1103_v2, %v358_v54  ;;  %v1229_v17 = vld [vmem:[#allocation5_spill] sm:$0xff]  ;;  %v1230_v16 = vld [vmem:[#allocation6_spill] sm:$0xff] }
  0x20   :  { %v271_v56 = vmul.f32 %v830_v42, %v830_v42  ;;  %v285_v35 = vadd.f32 %v269_v13, %v955_v46  ;;  %v397_v41 = vmul.f32 %v835_v43, %v835_v43  ;;  %v411_v61 = vadd.f32 %v395_v33, %v283_v40  ;;  %v1231_v40 = vld [vmem:[#allocation7_spill] sm:$0xff]  ;;  %v1232_v33 = vld [vmem:[#allocation8_spill] sm:$0xff] }
  0x21   :  { %v597_v5 = vadd.f32 %v596_v32, %v483_v21  ;;  %v523_v30 = vmul.f32 %v840_v44, %v840_v44  ;;  %v537_v15 = vadd.f32 %v521_v34, %v409_v20  ;;  %v272_v38 = vmul.f32 %v851_v50, %v851_v50  ;;  %v1233_v20 = vld [vmem:[#allocation14_spill] sm:$0xff] }
  0x22   :  { %v286_v23 = vadd.f32 %v270_v19, %v957_v47  ;;  %v398_v31 = vmul.f32 %v856_v51, %v856_v51  ;;  %v412_v42 = vadd.f32 %v396_v28, %v284_v7  ;;  %v524_v46 = vmul.f32 %v861_v52, %v861_v52 }
  0x23   :  { %v598_v8 = vadd.f32 %v597_v5, %v484_v25  ;;  %v538_v43 = vadd.f32 %v522_v12, %v410_v29  ;;  %v621_v13 = vadd.f32 %v536_v3, %v535_v36  ;;  %v273_v21 = vmul.f32 %v872_v58, %v872_v58  ;;  %v1235_v5 = vld [vmem:[#allocation9_spill] sm:$0xff]  ;;  %v1236_v36 = vld [vmem:[#allocation12_spill] sm:$0xff] }
  0x24   :  { %v287_v44 = vadd.f32 %v271_v56, %v959_v48  ;;  %v399_v50 = vmul.f32 %v877_v59, %v877_v59  ;;  %v413_v1 = vadd.f32 %v397_v41, %v285_v35  ;;  %v525_v51 = vmul.f32 %v1228_v49, %v1228_v49 }
  0x25   :  { %v599_v18 = vadd.f32 %v598_v8, %v485_v9  ;;  %v539_v53 = vadd.f32 %v523_v30, %v411_v61  ;;  %v622_v55 = vadd.f32 %v621_v13, %v537_v15  ;;  %v146_v52 = vmul.f32 %v887_v62, %v887_v62  ;;  %v1237_v61 = vld [vmem:[#allocation11_spill] sm:$0xff]  ;;  %v1238_v15 = vld [vmem:[#allocation13_spill] sm:$0xff]  ;;  %v1240_v13 = vld [vmem:[#allocation16_spill] sm:$0xff] }
  0x26   :  { %v274_v24 = vmul.f32 %v1229_v17, %v1229_v17  ;;  %v288_v58 = vadd.f32 %v272_v38, %v992_v60  ;;  %v400_v48 = vmul.f32 %v900_v0, %v900_v0  ;;  %v414_v59 = vadd.f32 %v398_v31, %v286_v23  ;;  %v1234_v0 = vld [vmem:[#allocation10_spill] sm:$0xff] }
  0x27   :  { %v600_v47 = vadd.f32 %v599_v18, %v486_v26  ;;  %v526_v54 = vmul.f32 %v1230_v16, %v1230_v16  ;;  %v540_v25 = vadd.f32 %v524_v46, %v412_v42  ;;  %v623_v19 = vadd.f32 %v622_v55, %v538_v43  ;;  %v1239_v43 = vld [vmem:[#allocation15_spill] sm:$0xff] }
  0x28   :  { %v147_v32 = vmul.f32 %v1231_v40, %v1231_v40  ;;  %v275_v62 = vmul.f32 %v1232_v33, %v1232_v33  ;;  %v289_v34 = vadd.f32 %v273_v21, %v1233_v20  ;;  %v401_v60 = vmul.f32 %v942_v39, %v942_v39 }
  0x29   :  { %601 = vadd.xlane.f32.xlu0 %v600_v47  ;;  %v415_v9 = vadd.f32 %v399_v50, %v287_v44  ;;  %v527_v7 = vmul.f32 %v1234_v0, %v1234_v0  ;;  %v541_v28 = vadd.f32 %v525_v51, %v413_v1  ;;  %v624_v29 = vadd.f32 %v623_v19, %v539_v53 }
  0x2a   :  { %v148_v12 = vmul.f32 %v1235_v5, %v1235_v5  ;;  %v276_v3 = vmul.f32 %v1236_v36, %v1236_v36  ;;  %v290_v26 = vadd.f32 %v274_v24, %v146_v52  ;;  %v402_v56 = vmul.f32 %v985_v57, %v985_v57 }
  0x2b   :  { %v416_v35 = vadd.f32 %v400_v48, %v288_v58  ;;  %v528_v39 = vmul.f32 %v990_v10, %v990_v10  ;;  %v542_v41 = vadd.f32 %v526_v54, %v414_v59  ;;  %v625_v8 = vadd.f32 %v624_v29, %v540_v25 }
  0x2c   :  { %v149_v30 = vmul.f32 %v1237_v61, %v1237_v61  ;;  %v277_v38 = vmul.f32 %v1238_v15, %v1238_v15  ;;  %v291_v23 = vadd.f32 %v275_v62, %v147_v32  ;;  %v403_v31 = vmul.f32 %v1011_v45, %v1011_v45 }
  0x2d   :  { %v417_v42 = vadd.f32 %v401_v60, %v289_v34  ;;  %v529_v57 = vmul.f32 %v1024_v22, %v1024_v22  ;;  %v543_v18 = vadd.f32 %v527_v7, %v415_v9  ;;  %v626_v46 = vadd.f32 %v625_v8, %v541_v28 }
  0x2e   :  { %v150_v10 = vmul.f32 %v1239_v43, %v1239_v43  ;;  %v278_v21 = vmul.f32 %v1240_v13, %v1240_v13  ;;  %v292_v44 = vadd.f32 %v276_v3, %v148_v12  ;;  %v404_v50 = vmul.f32 %v1033_v4, %v1033_v4 }
  0x2f   :  { %v418_v1 = vadd.f32 %v402_v56, %v290_v26  ;;  %v530_v45 = vmul.f32 %v1050_v11, %v1050_v11  ;;  %v544_v47 = vadd.f32 %v528_v39, %v416_v35  ;;  %v627_v49 = vadd.f32 %v626_v46, %v542_v41 }
  0x30   :  { %v293_v51 = vadd.f32 %v277_v38, %v149_v30  ;;  %v405_v22 = vmul.f32 %v1038_v6, %v1038_v6  ;;  %v419_v53 = vadd.f32 %v403_v31, %v291_v23  ;;  %v531_v55 = vmul.f32 %v1057_v27, %v1057_v27 }
  0x31   :  { %v545_v52 = vadd.f32 %v529_v57, %v417_v42  ;;  %v628_v17 = vadd.f32 %v627_v49, %v543_v18  ;;  %v294_v24 = vadd.f32 %v278_v21, %v150_v10  ;;  %v406_v4 = vmul.f32 %v1071_v63, %v1071_v63 }
  0x32   :  { %v420_v58 = vadd.f32 %v404_v50, %v292_v44  ;;  %v532_v11 = vmul.f32 %v1076_v14, %v1076_v14  ;;  %v546_v48 = vadd.f32 %v530_v45, %v418_v1  ;;  %v421_v16 = vadd.f32 %v405_v22, %v293_v51 }
  0x33   :  { %v629_v59 = vadd.f32 %v628_v17, %v544_v47  ;;  %v533_v6 = vmul.f32 %v1089_v37, %v1089_v37  ;;  %v547_v54 = vadd.f32 %v531_v55, %v419_v53  ;;  %v422_v19 = vadd.f32 %v406_v4, %v294_v24 }
  0x34   :  { %v534_v27 = vmul.f32 %v1103_v2, %v1103_v2  ;;  %v548_v40 = vadd.f32 %v532_v11, %v420_v58 }
  0x35   :  { %v630_v25 = vadd.f32 %v629_v59, %v545_v52  ;;  %v549_v33 = vadd.f32 %v533_v6, %v421_v16 }
  0x36   :  { %v550_v62 = vadd.f32 %v534_v27, %v422_v19 }
  0x37   :  { %v631_v32 = vadd.f32 %v630_v25, %v546_v48 }
  0x39   :  { %v632_v63 = vadd.f32 %v631_v32, %v547_v54 }
  0x3b   :  { %v633_v20 = vadd.f32 %v632_v63, %v548_v40 }
  0x3d   :  { %v634_v34 = vadd.f32 %v633_v20, %v549_v33 }
  0x3f   :  { %v635_v14 = vadd.f32 %v634_v34, %v550_v62 }
  0x41   :  { %636 = vadd.xlane.f32.xlu0 %v635_v14 }
  0xb6   :  { %v602_v60 = vpop.xlane.xlu0 %601 }
  0xb7   :  { %604 = vst.msk [vmem:[%s1201_s4] sm:$0xff] %vm603_vm0, %v602_v60 }
  0xce   :  { %v637_v37 = vpop.xlane.xlu0 %636 }
  0xcf   :  { %638 = vst.msk [vmem:[%s1202_s5] sm:$0xff] %vm603_vm0, %v637_v37 }

// kernel: decoder_forward.46
= control target key start
LH: loop header
LB: loop body
LE: loop exit
PB: predicated region body
PF: predicated region fallthrough
CT: control target
= control target key end

     0   :  { %s1282_s12 = smov 0   ;;  %s1284_s13 = smov 0   ;;  %s1502_s0 = inlined_call_operand.vmem [shape: bf16[3,32], index: 0, kind: input, shape index: {}]   ;;  %s1503_s1 = inlined_call_operand.vmem [shape: bf16[32,8192], index: 1, kind: input, shape index: {}]   ;;  %s1504_s2 = inlined_call_operand.vmem [shape: f32[3,1], index: 2, kind: input, shape index: {}]   ;;  %s1505_s3 = inlined_call_operand.vmem [shape: f32[3,8192], index: 3, kind: output, shape index: {}]  }
   0x1   :  { %s1286_s14 = smov 0   ;;  %s1288_s15 = smov 0  }
   0x2   :  { %s1290_s16 = smov 0  }
   0x3 LB: > { %s28_s17 = sadd.s32 1, %s1253_s15  ;;  %p76_p1 = scmp.ne.s32.totalorder %s1245_s13, %s1241_s12  ;;  %s1257_s16 = sphi %s1290_s16, %s13_s16   ;;  %s1253_s15 = sphi %s1288_s15, %s1509_s15   ;;  %s1249_s14 = sphi %s1286_s14, %s1508_s14   ;;  %s1245_s13 = sphi %s1284_s13, %s1507_s13   ;;  %s1241_s12 = sphi %s1282_s12, %s1506_s12  }
   0x4   : > { %p30_p0 = scmp.ge.s32.totalorder %s28_s17, 4  ;;  %p77_p2 = scmp.eq.s32.totalorder %s1257_s16, 0 }
   0x5   : > { %s69_s19 = sadd.s32 1, %s1245_s13  ;;  %p1108_p5 = scmp.ge.s32.totalorder %s1257_s16, 4 }
   0x6   : > { %s1511_s17 = smov (%p30_p0, %s28_s17), 0  ;;  %p78_p3 = por %p77_p2, %p76_p1 }
   0x7   : > { %s65_s18 = ssub.s32 %s1253_s15, %s1511_s17  ;;  %173 = sbr.rel (%p1108_p5) target bundleno = 34 (0x22), region = 24 }
   0x8   : > { %p67_p4 = scmp.eq.s32.totalorder %s65_s18, 0 }
   0xa   : > { %s1317_s20 = scalar_select %p67_p4, %s1245_s13, %s69_s19  }
   0xe   : > { %176 = sbr.rel (!%p78_p3) target bundleno = 34 (0x22), region = 28  ;;  %s178_s21 = sand.u32 (%p78_p3), 1, %s1245_s13  }
   0xf   : > { %s1158_s22 = sshll.u32 (%p78_p3), %s1253_s15, 6  ;;  %s1109_s23 = sshll.u32 (%p78_p3), %s178_s21, 8 }
  0x10   : > { %s1325_s26 = scalar_lea.vmem (%p78_p3), %s1503_s1, %s1158_s22  ;;  %s1330_s27 = scalar_lea.vmem (%p78_p3), [#allocation3], %s1109_s23 }
  0x11   : > { %v199_v0 = vld [vmem:[%s1325_s26] sm:$0xff] (%p78_p3)  ;;  %v201_v1 = vld [vmem:[%s1325_s26 + $0x8] sm:$0xff] (%p78_p3)  ;;  %v203_v2 = vld [vmem:[%s1325_s26 + $0x10] sm:$0xff] (%p78_p3) }
  0x12   : > { %200 = vst [vmem:[%s1330_s27] sm:$0xff] (%p78_p3), %v199_v0  ;;  %202 = vst [vmem:[%s1330_s27 + $0x8] sm:$0xff] (%p78_p3), %v201_v1  ;;  %v205_v3 = vld [vmem:[%s1325_s26 + $0x18] sm:$0xff] (%p78_p3)  ;;  %v207_v4 = vld [vmem:[%s1325_s26 + $0x20] sm:$0xff] (%p78_p3) }
  0x13   : > { %204 = vst [vmem:[%s1330_s27 + $0x10] sm:$0xff] (%p78_p3), %v203_v2  ;;  %v209_v5 = vld [vmem:[%s1325_s26 + $0x28] sm:$0xff] (%p78_p3)  ;;  %206 = vst [vmem:[%s1330_s27 + $0x18] sm:$0xff] (%p78_p3), %v205_v3  ;;  %v211_v6 = vld [vmem:[%s1325_s26 + $0x30] sm:$0xff] (%p78_p3) }
  0x14   : > { %208 = vst [vmem:[%s1330_s27 + $0x20] sm:$0xff] (%p78_p3), %v207_v4  ;;  %210 = vst [vmem:[%s1330_s27 + $0x28] sm:$0xff] (%p78_p3), %v209_v5  ;;  %v213_v7 = vld [vmem:[%s1325_s26 + $0x38] sm:$0xff] (%p78_p3)  ;;  %v215_v8 = vld [vmem:[%s1325_s26 + $0x100] sm:$0xff] (%p78_p3) }
  0x15   : > { %212 = vst [vmem:[%s1330_s27 + $0x30] sm:$0xff] %v211_v6  ;;  %214 = vst [vmem:[%s1330_s27 + $0x38] sm:$0xff] %v213_v7  ;;  %v217_v9 = vld [vmem:[%s1325_s26 + $0x108] sm:$0xff]  ;;  %v219_v10 = vld [vmem:[%s1325_s26 + $0x110] sm:$0xff] }
  0x16   : > { %216 = vst [vmem:[%s1330_s27 + $0x40] sm:$0xff] %v215_v8  ;;  %v221_v11 = vld [vmem:[%s1325_s26 + $0x118] sm:$0xff]  ;;  %218 = vst [vmem:[%s1330_s27 + $0x48] sm:$0xff] %v217_v9  ;;  %v223_v12 = vld [vmem:[%s1325_s26 + $0x120] sm:$0xff] }
  0x17   : > { %220 = vst [vmem:[%s1330_s27 + $0x50] sm:$0xff] %v219_v10  ;;  %222 = vst [vmem:[%s1330_s27 + $0x58] sm:$0xff] %v221_v11  ;;  %v225_v13 = vld [vmem:[%s1325_s26 + $0x128] sm:$0xff]  ;;  %v227_v14 = vld [vmem:[%s1325_s26 + $0x130] sm:$0xff] }
  0x18   : > { %224 = vst [vmem:[%s1330_s27 + $0x60] sm:$0xff] %v223_v12  ;;  %226 = vst [vmem:[%s1330_s27 + $0x68] sm:$0xff] %v225_v13  ;;  %v229_v15 = vld [vmem:[%s1325_s26 + $0x138] sm:$0xff]  ;;  %v231_v16 = vld [vmem:[%s1325_s26 + $0x200] sm:$0xff] }
  0x19   : > { %228 = vst [vmem:[%s1330_s27 + $0x70] sm:$0xff] %v227_v14  ;;  %v233_v17 = vld [vmem:[%s1325_s26 + $0x208] sm:$0xff]  ;;  %230 = vst [vmem:[%s1330_s27 + $0x78] sm:$0xff] %v229_v15  ;;  %v235_v18 = vld [vmem:[%s1325_s26 + $0x210] sm:$0xff] }
  0x1a   : > { %232 = vst [vmem:[%s1330_s27 + $0x80] sm:$0xff] %v231_v16  ;;  %234 = vst [vmem:[%s1330_s27 + $0x88] sm:$0xff] %v233_v17  ;;  %v237_v19 = vld [vmem:[%s1325_s26 + $0x218] sm:$0xff]  ;;  %v239_v20 = vld [vmem:[%s1325_s26 + $0x220] sm:$0xff] }
  0x1b   : > { %236 = vst [vmem:[%s1330_s27 + $0x90] sm:$0xff] %v235_v18  ;;  %238 = vst [vmem:[%s1330_s27 + $0x98] sm:$0xff] %v237_v19  ;;  %v241_v21 = vld [vmem:[%s1325_s26 + $0x228] sm:$0xff]  ;;  %v243_v22 = vld [vmem:[%s1325_s26 + $0x230] sm:$0xff] }
  0x1c   : > { %240 = vst [vmem:[%s1330_s27 + $0xa0] sm:$0xff] %v239_v20  ;;  %v245_v23 = vld [vmem:[%s1325_s26 + $0x238] sm:$0xff]  ;;  %242 = vst [vmem:[%s1330_s27 + $0xa8] sm:$0xff] %v241_v21  ;;  %v247_v24 = vld [vmem:[%s1325_s26 + $0x300] sm:$0xff] }
  0x1d   : > { %244 = vst [vmem:[%s1330_s27 + $0xb0] sm:$0xff] %v243_v22  ;;  %246 = vst [vmem:[%s1330_s27 + $0xb8] sm:$0xff] %v245_v23  ;;  %v249_v25 = vld [vmem:[%s1325_s26 + $0x308] sm:$0xff]  ;;  %v251_v26 = vld [vmem:[%s1325_s26 + $0x310] sm:$0xff] }
  0x1e   : > { %248 = vst [vmem:[%s1330_s27 + $0xc0] sm:$0xff] %v247_v24  ;;  %250 = vst [vmem:[%s1330_s27 + $0xc8] sm:$0xff] %v249_v25  ;;  %v253_v27 = vld [vmem:[%s1325_s26 + $0x318] sm:$0xff]  ;;  %v255_v28 = vld [vmem:[%s1325_s26 + $0x320] sm:$0xff] }
  0x1f   : > { %252 = vst [vmem:[%s1330_s27 + $0xd0] sm:$0xff] %v251_v26  ;;  %v257_v29 = vld [vmem:[%s1325_s26 + $0x328] sm:$0xff]  ;;  %254 = vst [vmem:[%s1330_s27 + $0xd8] sm:$0xff] %v253_v27  ;;  %v259_v30 = vld [vmem:[%s1325_s26 + $0x330] sm:$0xff] }
  0x20   : > { %256 = vst [vmem:[%s1330_s27 + $0xe0] sm:$0xff] %v255_v28  ;;  %258 = vst [vmem:[%s1330_s27 + $0xe8] sm:$0xff] %v257_v29  ;;  %v261_v31 = vld [vmem:[%s1325_s26 + $0x338] sm:$0xff] }
  0x21   : > { %260 = vst [vmem:[%s1330_s27 + $0xf0] sm:$0xff] %v259_v30  ;;  %262 = vst [vmem:[%s1330_s27 + $0xf8] sm:$0xff] %v261_v31 }
  0x22 PF: > { %p1112_p6 = scmp.ge.s32.totalorder %s1257_s16, 1  ;;  %p267_p7 = scmp.lt.s32.totalorder %s1257_s16, 5 }
  0x24   : > { %p268_p8 = pnand %p1112_p6, %p267_p7 }
  0x25   : > { %s274_s28 = sand.u32 (!%p268_p8), 1, %s1241_s12   ;;  %v1259_v32 = vmov (!%p268_p8), 0   ;;  %v940_v33 = vld [vmem:[%s1504_s2] sm:$0x7] (!%p268_p8)  ;;  %vm549_vm0 = vcmask (!%p268_p8), 261120   ;;  %s1114_s8 = sshll.u32 (!%p268_p8), %s1249_s14, 4 }
  0x26   : > { %271 = sbr.rel (%p268_p8) target bundleno = 316 (0x13c), region = 51  ;;  %s1113_s29 = sshll.u32 (!%p268_p8), %s274_s28, 8  ;;  %585 = vmatprep.mubr.bf16.mxu0 (!%p268_p8), %v1259_v32  ;;  %626 = vmatprep.mubr.bf16.mxu1 (!%p268_p8), %v1259_v32  ;;  %v1423_v60 = vld [vmem:[%s1502_s0] sm:$0x3] (!%p268_p8) }
  0x27   : > { %1202 = vset.pattern.permute.xlu0 (!%p268_p8), %v1259_v32  ;;  %s1402_s5 = scalar_lea.vmem (!%p268_p8), [#allocation3], %s1113_s29  ;;  %p328_p9 = scmp.lt.s32.totalorder (!%p268_p8), %s1114_s8, 63 }
  0x28   : > { %v357_v34 = vld [vmem:[%s1402_s5] sm:$0xff] (!%p268_p8)  ;;  %v358_v36 = vld [vmem:[%s1402_s5 + $0x8] sm:$0xff] (!%p268_p8)  ;;  %943 = vperm.xlu0 (!%p268_p8), %1202, %v940_v33   ;;  %v359_v47 = vld [vmem:[%s1402_s5 + $0x10] sm:$0xff] (!%p268_p8) }
  0x29   : > { %v365_v35 = vld [vmem:[%s1402_s5 + $0x40] sm:$0xff] (!%p268_p8)  ;;  %v366_v38 = vld [vmem:[%s1402_s5 + $0x48] sm:$0xff] (!%p268_p8)  ;;  %v367_v49 = vld [vmem:[%s1402_s5 + $0x50] sm:$0xff] (!%p268_p8) }
  0x2a   : > { %v1117_v37 = vcombine.high (!%p268_p8), %v357_v34, %v365_v35  ;;  %v1116_v39 = vcombine.low (!%p268_p8), %v357_v34, %v365_v35  ;;  %v373_v40 = vld [vmem:[%s1402_s5 + $0x80] sm:$0xff] (!%p268_p8)  ;;  %v1119_v42 = vcombine.high (!%p268_p8), %v358_v36, %v366_v38  ;;  %v1118_v43 = vcombine.low (!%p268_p8), %v358_v36, %v366_v38  ;;  %v374_v45 = vld [vmem:[%s1402_s5 + $0x88] sm:$0xff] (!%p268_p8)  ;;  %v360_v50 = vld [vmem:[%s1402_s5 + $0x18] sm:$0xff] (!%p268_p8) }
  0x2b   : > { %v381_v41 = vld [vmem:[%s1402_s5 + $0xc0] sm:$0xff] (!%p268_p8)  ;;  %v382_v46 = vld [vmem:[%s1402_s5 + $0xc8] sm:$0xff] (!%p268_p8)  ;;  %v368_v51 = vld [vmem:[%s1402_s5 + $0x58] sm:$0xff] (!%p268_p8)  ;;  %v1121_v54 = vcombine.high (!%p268_p8), %v359_v47, %v367_v49  ;;  %v1120_v61 = vcombine.low (!%p268_p8), %v359_v47, %v367_v49  ;;  %v1260_v36 = vmov (!%p268_p8), 0.0  }
  0x2c   : > { %v1133_v44 = vcombine.high (!%p268_p8), %v373_v40, %v381_v41  ;;  %553 = vmatprep.subr.bf16.mxu0 (!%p268_p8), %v1117_v37  ;;  %v1135_v48 = vcombine.high (!%p268_p8), %v374_v45, %v382_v46  ;;  %594 = vmatprep.subr.bf16.mxu1 (!%p268_p8), %v1119_v42  ;;  %v1132_v52 = vcombine.low (!%p268_p8), %v373_v40, %v381_v41  ;;  %v375_v56 = vld [vmem:[%s1402_s5 + $0x90] sm:$0xff] (!%p268_p8)  ;;  %v376_v58 = vld [vmem:[%s1402_s5 + $0x98] sm:$0xff] (!%p268_p8)  ;;  %v361_v1 = vld [vmem:[%s1402_s5 + $0x20] sm:$0xff] (!%p268_p8)  ;;  %v1261_v37 = vmov (!%p268_p8), 839922192  }
  0x2d   : > { %554 = vmatpush1.bf16.msra.mxu0 %v1116_v39  ;;  %595 = vmatpush1.bf16.msra.mxu1 %v1118_v43  ;;  %v1134_v53 = vcombine.low %v374_v45, %v382_v46  ;;  %v1123_v55 = vcombine.high %v360_v50, %v368_v51  ;;  %v383_v57 = vld [vmem:[%s1402_s5 + $0xd0] sm:$0xff]  ;;  %v384_v59 = vld [vmem:[%s1402_s5 + $0xd8] sm:$0xff]  ;;  %v1122_v62 = vcombine.low %v360_v50, %v368_v51  ;;  %v369_v2 = vld [vmem:[%s1402_s5 + $0x60] sm:$0xff]  ;;  %v946_v38 = vunpack.c.l.s4 %v1261_v37  ;;  %s1513_s8 = smov (!%p328_p9, %s1114_s8), 63 }
  0x2e   : > { %555 = vmatprep.subr.bf16.mxu0 %v1133_v44  ;;  %596 = vmatprep.subr.bf16.mxu1 %v1135_v48  ;;  %v1137_v63 = vcombine.high %v375_v56, %v383_v57  ;;  %v1139_v0 = vcombine.high %v376_v58, %v384_v59  ;;  %v362_v3 = vld [vmem:[%s1402_s5 + $0x28] sm:$0xff]  ;;  %v1136_v5 = vcombine.low %v375_v56, %v383_v57  ;;  %v377_v9 = vld [vmem:[%s1402_s5 + $0xa0] sm:$0xff]  ;;  %v363_v17 = vld [vmem:[%s1402_s5 + $0x30] sm:$0xff]  ;;  %s1115_s9 = sshll.u32 %s1513_s8, 2 }
  0x2f   : > { %v370_v4 = vld [vmem:[%s1402_s5 + $0x68] sm:$0xff]  ;;  %v1138_v6 = vcombine.low %v376_v58, %v384_v59  ;;  %v1125_v7 = vcombine.high %v361_v1, %v369_v2  ;;  %v385_v10 = vld [vmem:[%s1402_s5 + $0xe0] sm:$0xff]  ;;  %v1124_v13 = vcombine.low %v361_v1, %v369_v2  ;;  %v371_v18 = vld [vmem:[%s1402_s5 + $0x70] sm:$0xff]  ;;  %340 = vst [vmem:[#allocation2] sm:$0x77] %v1260_v36  ;;  %v947_v47 = vunpack.c.0.s8 %v946_v38  ;;  %s1473_s12 = scalar_lea.vmem %s1505_s3, %s1115_s9 }
  0x30   : > { %v1127_v8 = vcombine.high %v362_v3, %v370_v4  ;;  %v378_v11 = vld [vmem:[%s1402_s5 + $0xa8] sm:$0xff]  ;;  %v1126_v14 = vcombine.low %v362_v3, %v370_v4  ;;  %v1141_v15 = vcombine.high %v377_v9, %v385_v10  ;;  %v364_v19 = vld [vmem:[%s1402_s5 + $0x38] sm:$0xff]  ;;  %v1140_v21 = vcombine.low %v377_v9, %v385_v10  ;;  %v379_v25 = vld [vmem:[%s1402_s5 + $0xb0] sm:$0xff]  ;;  %341 = vst [vmem:[#allocation2 + $0x8] sm:$0x77] %v1260_v36 }
  0x31   : > { %556 = vmatpush1.bf16.msra.mxu0 %v1132_v52  ;;  %597 = vmatpush1.bf16.msra.mxu1 %v1134_v53  ;;  %v386_v12 = vld [vmem:[%s1402_s5 + $0xe8] sm:$0xff]  ;;  %v372_v20 = vld [vmem:[%s1402_s5 + $0x78] sm:$0xff]  ;;  %v1129_v23 = vcombine.high %v363_v17, %v371_v18  ;;  %v387_v26 = vld [vmem:[%s1402_s5 + $0xf0] sm:$0xff]  ;;  %v1128_v29 = vcombine.low %v363_v17, %v371_v18  ;;  %342 = vst [vmem:[#allocation2 + $0x10] sm:$0x77] %v1260_v36 }
  0x32   : > { %635 = vmatprep.subr.bf16.mxu0 %v1121_v54  ;;  %676 = vmatprep.subr.bf16.mxu1 %v1123_v55  ;;  %v1143_v16 = vcombine.high %v378_v11, %v386_v12  ;;  %v1142_v22 = vcombine.low %v378_v11, %v386_v12  ;;  %v1131_v24 = vcombine.high %v364_v19, %v372_v20  ;;  %v380_v27 = vld [vmem:[%s1402_s5 + $0xb8] sm:$0xff] }
  0x33   : > { %v388_v28 = vld [vmem:[%s1402_s5 + $0xf8] sm:$0xff]  ;;  %v1130_v30 = vcombine.low %v364_v19, %v372_v20  ;;  %v1145_v31 = vcombine.high %v379_v25, %v387_v26  ;;  %v1144_v34 = vcombine.low %v379_v25, %v387_v26  ;;  %343 = vst [vmem:[#allocation2 + $0x18] sm:$0x77] %v1260_v36  ;;  %344 = vst [vmem:[#allocation2 + $0x20] sm:$0x77] %v1260_v36 }
  0x34   : > { %1148 = vmatmul.mubr.msk.bf16.vlgmr.msra.gmra.mrb[0].mxu0 %vm549_vm0, %v1423_v60  ;;  %1149 = vmatmul.mubr.msk.bf16.vlgmr.msra.gmra.mrb[0].mxu1 %vm549_vm0, %v1423_v60  ;;  %v1147_v33 = vcombine.high %v380_v27, %v388_v28  ;;  %v1146_v35 = vcombine.low %v380_v27, %v388_v28  ;;  %345 = vst [vmem:[#allocation2 + $0x28] sm:$0x77] %v1260_v36  ;;  %346 = vst [vmem:[#allocation2 + $0x30] sm:$0x77] %v1260_v36 }
  0x35   : > { %636 = vmatpush1.bf16.msra.mxu0 %v1120_v61  ;;  %677 = vmatpush1.bf16.msra.mxu1 %v1122_v62  ;;  %347 = vst [vmem:[#allocation2 + $0x38] sm:$0x77] %v1260_v36 }
  0x36   : > { %637 = vmatprep.subr.bf16.mxu0 %v1137_v63  ;;  %678 = vmatprep.subr.bf16.mxu1 %v1139_v0  ;;  %v348_v41 = vld [vmem:[#allocation2] sm:$0x77] }
  0x37   : > { %667 = vmatprep.mubr.bf16.mxu0 %v1259_v32  ;;  %708 = vmatprep.mubr.bf16.mxu1 %v1259_v32  ;;  %v349_v44 = vld [vmem:[#allocation2 + $0x8] sm:$0x77] }
  0x38   : > { %v350_v59 = vld [vmem:[#allocation2 + $0x10] sm:$0x77] }
  0x39   : > { %638 = vmatpush1.bf16.msra.mxu0 %v1136_v5  ;;  %679 = vmatpush1.bf16.msra.mxu1 %v1138_v6 }
  0x3a   : > { %717 = vmatprep.subr.bf16.mxu0 %v1125_v7  ;;  %758 = vmatprep.subr.bf16.mxu1 %v1127_v8  ;;  %v351_v62 = vld [vmem:[#allocation2 + $0x18] sm:$0x77] }
  0x3b   : > { %v353_v17 = vld [vmem:[#allocation2 + $0x28] sm:$0x77] }
  0x3c   : > { %1150 = vmatmul.mubr.msk.bf16.vlgmr.msra.gmra.mrb[4].mxu0 %vm549_vm0, %v1423_v60  ;;  %1151 = vmatmul.mubr.msk.bf16.vlgmr.msra.gmra.mrb[4].mxu1 %vm549_vm0, %v1423_v60  ;;  %v355_v37 = vld [vmem:[#allocation2 + $0x38] sm:$0x77] }
  0x3d   : > { %718 = vmatpush1.bf16.msra.mxu0 %v1124_v13  ;;  %759 = vmatpush1.bf16.msra.mxu1 %v1126_v14  ;;  %v352_v14 = vld [vmem:[#allocation2 + $0x20] sm:$0x77] }
  0x3e   : > { %719 = vmatprep.subr.bf16.mxu0 %v1141_v15  ;;  %760 = vmatprep.subr.bf16.mxu1 %v1143_v16 }
  0x3f   : > { %749 = vmatprep.mubr.bf16.mxu0 %v1259_v32  ;;  %790 = vmatprep.mubr.bf16.mxu1 %v1259_v32 }
  0x41   : > { %720 = vmatpush1.bf16.msra.mxu0 %v1140_v21  ;;  %761 = vmatpush1.bf16.msra.mxu1 %v1142_v22 }
  0x42   : > { %799 = vmatprep.subr.bf16.mxu0 %v1129_v23  ;;  %840 = vmatprep.subr.bf16.mxu1 %v1131_v24 }
  0x44   : > { %1152 = vmatmul.mubr.msk.bf16.vlgmr.msra.gmra.mrb[8].mxu0 %vm549_vm0, %v1423_v60  ;;  %1153 = vmatmul.mubr.msk.bf16.vlgmr.msra.gmra.mrb[8].mxu1 %vm549_vm0, %v1423_v60 }
  0x45   : > { %800 = vmatpush1.bf16.msra.mxu0 %v1128_v29  ;;  %841 = vmatpush1.bf16.msra.mxu1 %v1130_v30 }
  0x46   : > { %801 = vmatprep.subr.bf16.mxu0 %v1145_v31  ;;  %842 = vmatprep.subr.bf16.mxu1 %v1147_v33  ;;  %v354_v33 = vld [vmem:[#allocation2 + $0x30] sm:$0x77] }
  0x47   : > { %831 = vmatprep.mubr.bf16.mxu0 %v1259_v32  ;;  %872 = vmatprep.mubr.bf16.mxu1 %v1259_v32  ;;  %v948_v32 = vlaneseq }
  0x49   : > { %802 = vmatpush1.bf16.msra.mxu0 %v1144_v34  ;;  %843 = vmatpush1.bf16.msra.mxu1 %v1146_v35  ;;  %v949_v48 = vshrl.u32 %v948_v32, 7 }
  0x4b   : > { %v950_v55 = vsub.s32 %v947_v47, %v949_v48 }
  0x4c   : > { %1154 = vmatmul.mubr.msk.bf16.vlgmr.msra.gmra.mrb[12].mxu0 %vm549_vm0, %v1423_v60  ;;  %1155 = vmatmul.mubr.msk.bf16.vlgmr.msra.gmra.mrb[12].mxu1 %vm549_vm0, %v1423_v60 }
  0xa7   : > { %v944_v56 = vpop.permute.xlu0 %943 }
  0xa8   : > { %v1464_v1 = vrot.slane %v944_v56, %v950_v55 }
 0x107   : > { %v587_v39 = vpop.f32.mrb[0].mxu0  ;;  %v628_v40 = vpop.f32.mrb[0].mxu1 }
 0x108   : > { %v589_v42 = vpop.f32.mrb[1].mxu0  ;;  %v630_v45 = vpop.f32.mrb[1].mxu1 }
 0x109   : > { %v897_v43 = vcombine.low %v587_v39, %v589_v42  ;;  %v591_v46 = vpop.f32.mrb[2].mxu0  ;;  %v898_v49 = vcombine.low %v628_v40, %v630_v45  ;;  %v632_v50 = vpop.f32.mrb[2].mxu1 }
 0x10a   : > { %v592_v51 = vpop.f32.mrb[3].mxu0  ;;  %v633_v53 = vpop.f32.mrb[3].mxu1 }
 0x10b   : > { %v913_v52 = vadd.f32 %v897_v43, %v348_v41  ;;  %v914_v54 = vadd.f32 %v898_v49, %v349_v44 }
 0x10d   : > { %921 = vst [vmem:[#allocation2] sm:$0x77] %v913_v52  ;;  %922 = vst [vmem:[#allocation2 + $0x8] sm:$0x77] %v914_v54 }
 0x10f   : > { %v669_v57 = vpop.f32.mrb[4].mxu0  ;;  %v710_v58 = vpop.f32.mrb[4].mxu1 }
 0x110   : > { %v671_v60 = vpop.f32.mrb[5].mxu0  ;;  %v712_v63 = vpop.f32.mrb[5].mxu1 }
 0x111   : > { %v899_v61 = vcombine.low %v669_v57, %v671_v60  ;;  %v673_v0 = vpop.f32.mrb[6].mxu0  ;;  %v900_v2 = vcombine.low %v710_v58, %v712_v63  ;;  %v714_v3 = vpop.f32.mrb[6].mxu1 }
 0x112   : > { %v674_v4 = vpop.f32.mrb[7].mxu0  ;;  %v715_v6 = vpop.f32.mrb[7].mxu1 }
 0x113   : > { %v915_v5 = vadd.f32 %v899_v61, %v350_v59  ;;  %v916_v7 = vadd.f32 %v900_v2, %v351_v62 }
 0x114   : > { %v932_v8 = vld [vmem:[#allocation2] sm:$0x77]  ;;  %v933_v9 = vld [vmem:[#allocation2 + $0x8] sm:$0x77] }
 0x115   : > { %923 = vst [vmem:[#allocation2 + $0x10] sm:$0x77] %v915_v5  ;;  %v953_v10 = vadd.f32 %v1464_v1, %v932_v8  ;;  %924 = vst [vmem:[#allocation2 + $0x18] sm:$0x77] %v916_v7  ;;  %v954_v11 = vadd.f32 %v1464_v1, %v933_v9 }
 0x117   : > { %1203 = vtanh.f32 %v953_v10  ;;  %v751_v12 = vpop.f32.mrb[8].mxu0  ;;  %v792_v13 = vpop.f32.mrb[8].mxu1 }
 0x118   : > { %1205 = vtanh.f32 %v954_v11  ;;  %v753_v15 = vpop.f32.mrb[9].mxu0  ;;  %v794_v18 = vpop.f32.mrb[9].mxu1 }
 0x119   : > { %v901_v16 = vcombine.low %v751_v12, %v753_v15  ;;  %v755_v19 = vpop.f32.mrb[10].mxu0  ;;  %v902_v20 = vcombine.low %v792_v13, %v794_v18  ;;  %v796_v21 = vpop.f32.mrb[10].mxu1 }
 0x11a   : > { %v756_v22 = vpop.f32.mrb[11].mxu0  ;;  %v797_v24 = vpop.f32.mrb[11].mxu1 }
 0x11b   : > { %v917_v23 = vadd.f32 %v901_v16, %v352_v14  ;;  %v918_v26 = vadd.f32 %v902_v20, %v353_v17 }
 0x11c   : > { %v934_v25 = vld [vmem:[#allocation2 + $0x10] sm:$0x77]  ;;  %v935_v27 = vld [vmem:[#allocation2 + $0x18] sm:$0x77] }
 0x11d   : > { %v955_v28 = vadd.f32 %v1464_v1, %v934_v25  ;;  %925 = vst [vmem:[#allocation2 + $0x20] sm:$0x77] %v917_v23  ;;  %v956_v29 = vadd.f32 %v1464_v1, %v935_v27  ;;  %926 = vst [vmem:[#allocation2 + $0x28] sm:$0x77] %v918_v26 }
 0x11f   : > { %1207 = vtanh.f32 %v955_v28  ;;  %v833_v30 = vpop.f32.mrb[12].mxu0  ;;  %v874_v31 = vpop.f32.mrb[12].mxu1 }
 0x120   : > { %1209 = vtanh.f32 %v956_v29  ;;  %v835_v34 = vpop.f32.mrb[13].mxu0  ;;  %v876_v38 = vpop.f32.mrb[13].mxu1 }
 0x121   : > { %v1204_v35 = vpop.eup %1203  ;;  %v903_v36 = vcombine.low %v833_v30, %v835_v34  ;;  %v837_v32 = vpop.f32.mrb[14].mxu0  ;;  %v904_v40 = vcombine.low %v874_v31, %v876_v38 }
 0x122   : > { %v1206_v39 = vpop.eup %1205  ;;  %969 = vst [vmem:[%s1473_s12] sm:$0x77] %v1204_v35  ;;  %v878_v41 = vpop.f32.mrb[14].mxu1 }
 0x123   : > { %v838_v42 = vpop.f32.mrb[15].mxu0  ;;  %970 = vst [vmem:[%s1473_s12 + $0x8] sm:$0x77] %v1206_v39  ;;  %v919_v43 = vadd.f32 %v903_v36, %v354_v33  ;;  %v879_v44 = vpop.f32.mrb[15].mxu1  ;;  %v920_v46 = vadd.f32 %v904_v40, %v355_v37 }
 0x124   : > { %v936_v45 = vld [vmem:[#allocation2 + $0x20] sm:$0x77]  ;;  %v937_v48 = vld [vmem:[#allocation2 + $0x28] sm:$0x77] }
 0x125   : > { %v957_v47 = vadd.f32 %v1464_v1, %v936_v45  ;;  %927 = vst [vmem:[#allocation2 + $0x30] sm:$0x77] %v919_v43  ;;  %v958_v49 = vadd.f32 %v1464_v1, %v937_v48  ;;  %928 = vst [vmem:[#allocation2 + $0x38] sm:$0x77] %v920_v46 }
 0x127   : > { %1211 = vtanh.f32 %v957_v47 }
 0x128   : > { %1213 = vtanh.f32 %v958_v49 }
 0x129   : > { %v1208_v50 = vpop.eup %1207 }
 0x12a   : > { %v1210_v51 = vpop.eup %1209  ;;  %971 = vst [vmem:[%s1473_s12 + $0x10] sm:$0x77] %v1208_v50 }
 0x12b   : > { %972 = vst [vmem:[%s1473_s12 + $0x18] sm:$0x77] %v1210_v51 }
 0x12c   : > { %v938_v52 = vld [vmem:[#allocation2 + $0x30] sm:$0x77]  ;;  %v939_v54 = vld [vmem:[#allocation2 + $0x38] sm:$0x77] }
 0x12d   : > { %v959_v53 = vadd.f32 %v1464_v1, %v938_v52  ;;  %v960_v55 = vadd.f32 %v1464_v1, %v939_v54 }
 0x12f   : > { %1215 = vtanh.f32 %v959_v53 }
 0x130   : > { %1217 = vtanh.f32 %v960_v55 }
 0x131   : > { %v1212_v56 = vpop.eup %1211 }
 0x132   : > { %v1214_v57 = vpop.eup %1213  ;;  %973 = vst [vmem:[%s1473_s12 + $0x20] sm:$0x77] %v1212_v56 }
 0x133   : > { %974 = vst [vmem:[%s1473_s12 + $0x28] sm:$0x77] %v1214_v57 }
 0x139   : > { %v1216_v58 = vpop.eup %1215 }
 0x13a   : > { %v1218_v59 = vpop.eup %1217  ;;  %975 = vst [vmem:[%s1473_s12 + $0x30] sm:$0x77] %v1216_v58 }
 0x13b   : > { %976 = vst [vmem:[%s1473_s12 + $0x38] sm:$0x77] %v1218_v59 }
 0x13c PF: > { %s13_s16 = sadd.s32 1, %s1257_s16   ;;  %s1506_s12 = smov %s1245_s13 }
 0x13d   : > { %p10_p10 = scmp.ge.s32.totalorder %s13_s16, 6   ;;  %s1507_s13 = smov %s1317_s20 }
 0x13e   : > { %s1508_s14 = smov %s1253_s15  ;;  %s1509_s15 = smov %s1511_s17 }
 0x13f   :  { %12 = sbr.rel (!%p10_p10) target bundleno = 3 (0x3), region = 104 }

</bundles_post_ra>
